<compile_context>
chip_gen: v7x
topology: tpu7x:2x2x1
jax: 0.10.0
libtpu: 0.0.40
codegen_flags: <defaults>
</compile_context>

<pallas_src>
import math
from functools import partial

import jax
import jax.numpy as jnp
from jax import lax
from jax.experimental import pallas as pl
from jax.experimental.pallas import tpu as pltpu

# ----------------------------- small Llama config -----------------------------
HIDDEN = 256
N_HEADS = 4
N_KV_HEADS = 2
HEAD_DIM = HIDDEN // N_HEADS            # 64
GROUPS = N_HEADS // N_KV_HEADS          # 2
SEQ = 128
BATCH = 1
ROPE_THETA = 10000.0
CU_SEQLENS = [0, 48, 80, 128]           # 3 packed documents
W_DTYPE = jnp.bfloat16                  # weight storage dtype (MXU-native)
NEG_INF = -1e30


# --------------------------------- kernel -------------------------------------
def _fused_attn_kernel(x_ref, wq_ref, wkv_ref, wo_ref, cosq_ref, sinq_ref,
                       cosk_ref, sink_ref, start_ref, o_ref,
                       *, head_dim, n_kv_heads, groups):
    tq = o_ref.shape[0]
    s = x_ref.shape[0]
    d = head_dim
    hq = groups * n_kv_heads * d                 # nh * d
    hkv = n_kv_heads * d

    row0 = pl.multiple_of(pl.program_id(0) * tq, tq)

    x_full = x_ref[...]                                               # (S, H) bf16
    x_rows = x_full if tq == s else x_ref[pl.ds(row0, tq), :]         # (TQ, H) bf16

    # Fused projections: [Wk | Wk_rot | Wv] over all tokens, [Wq | Wq_rot] over this tile.
    kv = jnp.dot(x_full, wkv_ref[...], preferred_element_type=jnp.float32)   # (S, 3*hkv)
    qq = jnp.dot(x_rows, wq_ref[...], preferred_element_type=jnp.float32)    # (TQ, 2*hq)

    # RoPE, vectorized across all heads.  rotate_half is pre-folded into the *_rot
    # projection columns; the softmax scale is pre-folded into the q tables.
    k_rot = (kv[:, :hkv] * cosk_ref[...] +
             kv[:, hkv:2 * hkv] * sink_ref[...]).astype(jnp.bfloat16)        # (S, hkv)
    v_all = kv[:, 2 * hkv:].astype(jnp.bfloat16)                             # (S, hkv)
    q_rot = (qq[:, :hq] * cosq_ref[...] +
             qq[:, hq:] * sinq_ref[...]).astype(jnp.bfloat16)                # (TQ, hq)

    # Packed-document causal mask built in-kernel (no O(S^2) HBM bias):
    #   allowed(q, k)  <=>  doc_start(q) <= k <= q
    q_idx = row0 + lax.broadcasted_iota(jnp.int32, (tq, s), 0)
    k_idx = lax.broadcasted_iota(jnp.int32, (tq, s), 1)
    allowed = (k_idx <= q_idx) & (k_idx >= start_ref[...])                   # (TQ, S)
    bias = jnp.where(allowed, jnp.float32(0.0), jnp.float32(NEG_INF))        # (TQ, S)
    bias_g = jnp.concatenate([bias] * groups, axis=0)                        # (G*TQ, S)

    ctx_heads = []
    for h in range(n_kv_heads):                                              # static (2 iters)
        k_h = k_rot[:, h * d:(h + 1) * d]                                    # (S, d)
        v_h = v_all[:, h * d:(h + 1) * d]                                    # (S, d)
        # Stack this KV head's query-head group along M (head-major): one fat QK^T / PV.
        q_stack = jnp.concatenate(
            [q_rot[:, (h * groups + g) * d:(h * groups + g + 1) * d] for g in range(groups)],
            axis=0)                                                          # (G*TQ, d)
        sc = lax.dot_general(q_stack, k_h, (((1,), (1,)), ((), ())),
                             preferred_element_type=jnp.float32)             # (G*TQ, S)
        sc = sc + bias_g
        m = jnp.max(sc, axis=-1, keepdims=True)
        p = jnp.exp(sc - m)
        l = jnp.sum(p, axis=-1, keepdims=True)
        o_h = jnp.dot(p.astype(jnp.bfloat16), v_h,
                      preferred_element_type=jnp.float32)                    # (G*TQ, d)
        o_h = o_h * pl.reciprocal(l, approx=True)
        for g in range(groups):                                              # unstack to head order
            ctx_heads.append(o_h[g * tq:(g + 1) * tq, :])                    # (TQ, d)

    ctx = jnp.concatenate(ctx_heads, axis=-1).astype(jnp.bfloat16)           # (TQ, nh*d)

    # o_proj, written as a lane-dense (TQ, HIDDEN) row block.
    o_ref[...] = jnp.dot(ctx, wo_ref[...],
                         preferred_element_type=jnp.float32).astype(o_ref.dtype)


# ------------------------------ pallas wrapper ---------------------------------
def llama_flash_attention2(hidden_states, params, cu_seqlens, position_ids, *, tq=None):
    """Forward of LlamaFlashAttention2: attn_output = o_proj(flash_attn_varlen(rope(qkv)))."""
    b, s, h = hidden_states.shape
    d, nh, nkv, groups = HEAD_DIM, N_HEADS, N_KV_HEADS, GROUPS
    if tq is None:
        tq = s                      # grid=(1,): no redundant KV work (best on v5e/v6e);
    assert s % tq == 0              # pass tq=s//2 on v7x to split rows across both cores.
    n_blocks = s // tq
    scale = 1.0 / math.sqrt(d)

    # HF casts f32 hidden states to the projection-weight dtype before flash attention.
    x2d = hidden_states.reshape(b * s, h).astype(W_DTYPE)

    # rotate_half folded into a pre-rotated copy of the Q/K projection columns:
    #   rotate_half(x @ W) == x @ rot_cols(W)   (exact column permutation + negation)
    def rot_cols(w):                                        # w: (H, n*d)
        w3 = w.reshape(h, -1, d)
        return jnp.concatenate([-w3[..., d // 2:], w3[..., :d // 2]], axis=-1).reshape(h, -1)

    wq_all = jnp.concatenate([params["wq_t"], rot_cols(params["wq_t"])], axis=-1)   # (H, 2*nh*d)
    wkv_all = jnp.concatenate([params["wk_t"], rot_cols(params["wk_t"]),
                               params["wv_t"]], axis=-1)                            # (H, 3*nkv*d)
    wo_t = params["wo_t"]                                                           # (nh*d, H)

    # Rotary tables (LlamaRotaryEmbedding, default rope), tiled across heads so RoPE is
    # one full-width FMA pair; the 1/sqrt(d) softmax scale is folded (exactly) into the
    # q tables.
    inv_freq = 1.0 / (ROPE_THETA ** (jnp.arange(0, d, 2, dtype=jnp.float32) / d))
    freqs = position_ids.astype(jnp.float32)[:, None] * inv_freq[None, :]
    emb = jnp.concatenate([freqs, freqs], axis=-1)                                  # (S, d)
    cos1, sin1 = jnp.cos(emb), jnp.sin(emb)
    cos_q = jnp.tile(cos1, (1, nh)) * scale                                         # (S, nh*d)
    sin_q = jnp.tile(sin1, (1, nh)) * scale
    cos_k = jnp.tile(cos1, (1, nkv))                                                # (S, nkv*d)
    sin_k = jnp.tile(sin1, (1, nkv))

    # Per-token document start (== cu_seqlens[doc(i)]) for the in-kernel varlen causal mask.
    pos = jnp.arange(s, dtype=jnp.int32)
    doc = jnp.searchsorted(cu_seqlens[1:], pos, side="right")
    start_col = cu_seqlens[doc][:, None].astype(jnp.int32)                          # (S, 1)

    flops = (2 * s * h * wq_all.shape[-1] + 2 * s * h * wkv_all.shape[-1]
             + nh * 2 * (2 * s * s * d) + 2 * s * (nh * d) * h)
    bytes_accessed = (x2d.size * 2
                      + (wq_all.size + wkv_all.size + wo_t.size) * 2
                      + (cos_q.size + sin_q.size + cos_k.size + sin_k.size) * 4
                      + start_col.size * 4 + s * h * 4)

    out2d = pl.pallas_call(
        partial(_fused_attn_kernel, head_dim=d, n_kv_heads=nkv, groups=groups),
        out_shape=jax.ShapeDtypeStruct((s, h), jnp.float32),
        grid=(n_blocks,),
        in_specs=[
            pl.BlockSpec((s, h), lambda t: (0, 0)),                      # x (all tokens, bf16)
            pl.BlockSpec((h, wq_all.shape[-1]), lambda t: (0, 0)),       # [Wq | Wq_rot]
            pl.BlockSpec((h, wkv_all.shape[-1]), lambda t: (0, 0)),      # [Wk | Wk_rot | Wv]
            pl.BlockSpec((nh * d, h), lambda t: (0, 0)),                 # Wo^T
            pl.BlockSpec((tq, nh * d), lambda t: (t, 0)),                # cos_q (scaled), row tile
            pl.BlockSpec((tq, nh * d), lambda t: (t, 0)),                # sin_q (scaled), row tile
            pl.BlockSpec((s, nkv * d), lambda t: (0, 0)),                # cos_k (all tokens)
            pl.BlockSpec((s, nkv * d), lambda t: (0, 0)),                # sin_k (all tokens)
            pl.BlockSpec((tq, 1), lambda t: (t, 0)),                     # doc-start column
        ],
        out_specs=pl.BlockSpec((tq, h), lambda t: (t, 0)),               # disjoint, lane-dense rows
        compiler_params=pltpu.CompilerParams(
            dimension_semantics=("parallel",),
            vmem_limit_bytes=32 * 1024 * 1024),
        cost_estimate=pl.CostEstimate(flops=flops,
                                      transcendentals=nh * s * s,
                                      bytes_accessed=bytes_accessed),
    )(x2d, wq_all, wkv_all, wo_t, cos_q, sin_q, cos_k, sin_k, start_col)

    return out2d.reshape(b, s, h)


# ----------------------------- pure-JAX reference -------------------------------
def reference_attention(hidden_states, params, cu_seqlens, position_ids):
    b, s, h = hidden_states.shape
    x = hidden_states.reshape(b * s, h).astype(jnp.float32)
    wq = params["wq_t"].astype(jnp.float32)
    wk = params["wk_t"].astype(jnp.float32)
    wv = params["wv_t"].astype(jnp.float32)
    wo = params["wo_t"].astype(jnp.float32)
    d = HEAD_DIM

    inv_freq = 1.0 / (ROPE_THETA ** (jnp.arange(0, d, 2, dtype=jnp.float32) / d))
    freqs = position_ids.astype(jnp.float32)[:, None] * inv_freq[None, :]
    emb = jnp.concatenate([freqs, freqs], axis=-1)
    cos, sin = jnp.cos(emb), jnp.sin(emb)

    q = (x @ wq).reshape(s, N_HEADS, d).transpose(1, 0, 2)
    k = (x @ wk).reshape(s, N_KV_HEADS, d).transpose(1, 0, 2)
    v = (x @ wv).reshape(s, N_KV_HEADS, d).transpose(1, 0, 2)
    k = jnp.repeat(k, GROUPS, axis=0)        # GQA repeat_kv
    v = jnp.repeat(v, GROUPS, axis=0)

    def rope(t):
        t1, t2 = t[..., : d // 2], t[..., d // 2:]
        rot = jnp.concatenate([-t2, t1], axis=-1)
        return t * cos[None] + rot * sin[None]

    qr, kr = rope(q), rope(k)
    scores = jnp.einsum("hqd,hkd->hqk", qr, kr) / math.sqrt(d)
    idx = jnp.arange(s, dtype=jnp.int32)
    seg = jnp.searchsorted(cu_seqlens[1:], idx, side="right")
    mask = (idx[None, :] <= idx[:, None]) & (seg[None, :] == seg[:, None])
    scores = jnp.where(mask[None], scores, NEG_INF)
    probs = jax.nn.softmax(scores, axis=-1)
    attn = jnp.einsum("hqk,hkd->hqd", probs, v)
    attn2d = attn.transpose(1, 0, 2).reshape(s, N_HEADS * d)
    out = attn2d @ wo
    return out.reshape(b, s, h)


# ----------------------------------- main ---------------------------------------
if __name__ == "__main__":
    key = jax.random.PRNGKey(0)
    ks = jax.random.split(key, 5)

    def init(k, shape):
        return (0.02 * jax.random.normal(k, shape, dtype=jnp.float32)).astype(W_DTYPE)

    # weights stored pre-transposed (in, out) and in bf16: y = x @ W^T
    params = {
        "wq_t": init(ks[0], (HIDDEN, N_HEADS * HEAD_DIM)),
        "wk_t": init(ks[1], (HIDDEN, N_KV_HEADS * HEAD_DIM)),
        "wv_t": init(ks[2], (HIDDEN, N_KV_HEADS * HEAD_DIM)),
        "wo_t": init(ks[3], (N_HEADS * HEAD_DIM, HIDDEN)),
    }
    hidden_states = jax.random.normal(ks[4], (BATCH, SEQ, HIDDEN), dtype=jnp.float32)

    # packed-sequence metadata: cu_seqlens -> per-document position ids
    cu_seqlens = jnp.asarray(CU_SEQLENS, dtype=jnp.int32)
    position_ids = jnp.concatenate(
        [jnp.arange(CU_SEQLENS[i + 1] - CU_SEQLENS[i]) for i in range(len(CU_SEQLENS) - 1)]
    ).astype(jnp.int32)

    out = llama_flash_attention2(hidden_states, params, cu_seqlens, position_ids)
    out = jax.block_until_ready(out)

    ref = reference_attention(hidden_states, params, cu_seqlens, position_ids)
    assert out.shape == (BATCH, SEQ, HIDDEN)
    assert bool(jnp.all(jnp.isfinite(out)))
    assert bool(jnp.allclose(out, ref, rtol=2e-2, atol=5e-3)), "mismatch vs JAX reference"

    print("KERNEL_OK")
</pallas_src>

<mosaic_0001>
module attributes {stable_mosaic.version = 11 : i64} {
  func.func @_fused_attn_kernel(%arg0: i32, %arg1: memref<128x256xbf16, #tpu.memory_space<vmem>>, %arg2: memref<256x512xbf16, #tpu.memory_space<vmem>>, %arg3: memref<256x384xbf16, #tpu.memory_space<vmem>>, %arg4: memref<256x256xbf16, #tpu.memory_space<vmem>>, %arg5: memref<128x256xf32, #tpu.memory_space<vmem>>, %arg6: memref<128x256xf32, #tpu.memory_space<vmem>>, %arg7: memref<128x128xf32, #tpu.memory_space<vmem>>, %arg8: memref<128x128xf32, #tpu.memory_space<vmem>>, %arg9: memref<128x1xi32, #tpu.memory_space<vmem>>, %arg10: memref<128x256xf32, #tpu.memory_space<vmem>>) attributes {dimension_semantics = [#tpu.dimension_semantics<parallel>], iteration_bounds = array<i64: 1>, scalar_prefetch = 0 : i64, scratch_operands = 0 : i64, tpu.core_type = #tpu.core_type<tc>, window_params = [{pipeline_mode = #tpu.pipeline_mode<synchronous>, transform_indices = @transform_0, window_bounds = array<i64: 128, 256>}, {pipeline_mode = #tpu.pipeline_mode<synchronous>, transform_indices = @transform_1, window_bounds = array<i64: 256, 512>}, {pipeline_mode = #tpu.pipeline_mode<synchronous>, transform_indices = @transform_2, window_bounds = array<i64: 256, 384>}, {pipeline_mode = #tpu.pipeline_mode<synchronous>, transform_indices = @transform_3, window_bounds = array<i64: 256, 256>}, {transform_indices = @transform_4, window_bounds = array<i64: 128, 256>}, {transform_indices = @transform_5, window_bounds = array<i64: 128, 256>}, {pipeline_mode = #tpu.pipeline_mode<synchronous>, transform_indices = @transform_6, window_bounds = array<i64: 128, 128>}, {pipeline_mode = #tpu.pipeline_mode<synchronous>, transform_indices = @transform_7, window_bounds = array<i64: 128, 128>}, {transform_indices = @transform_8, window_bounds = array<i64: 128, 1>}, {transform_indices = @transform_9, window_bounds = array<i64: 128, 256>}]} {
    %c128_i32 = arith.constant 128 : i32
    %0 = arith.muli %arg0, %c128_i32 : i32
    %1 = tpu.assume_multiple %0, 128 : i32
    %c0 = arith.constant 0 : index
    %c0_0 = arith.constant 0 : index
    %2 = vector.load %arg1[%c0, %c0_0] : memref<128x256xbf16, #tpu.memory_space<vmem>>, vector<128x256xbf16>
    %c0_1 = arith.constant 0 : index
    %c0_2 = arith.constant 0 : index
    %3 = vector.load %arg3[%c0_1, %c0_2] : memref<256x384xbf16, #tpu.memory_space<vmem>>, vector<256x384xbf16>
    %cst = arith.constant dense<0.000000e+00> : vector<128x384xf32>
    %4 = tpu.matmul %2, %3, %cst {dimension_numbers = #tpu.dot_dimension_numbers<[1], [0], [0], [1], [0, 0, 1, 1], [], []>} : vector<128x256xbf16>, vector<256x384xbf16>, vector<128x384xf32> -> vector<128x384xf32>
    %c0_3 = arith.constant 0 : index
    %c0_4 = arith.constant 0 : index
    %5 = vector.load %arg2[%c0_3, %c0_4] : memref<256x512xbf16, #tpu.memory_space<vmem>>, vector<256x512xbf16>
    %cst_5 = arith.constant dense<0.000000e+00> : vector<128x512xf32>
    %6 = tpu.matmul %2, %5, %cst_5 {dimension_numbers = #tpu.dot_dimension_numbers<[1], [0], [0], [1], [0, 0, 1, 1], [], []>} : vector<128x256xbf16>, vector<256x512xbf16>, vector<128x512xf32> -> vector<128x512xf32>
    %7 = vector.extract_strided_slice %4 {offsets = [0, 0], sizes = [128, 128], strides = [1, 1]} : vector<128x384xf32> to vector<128x128xf32>
    %c0_6 = arith.constant 0 : index
    %c0_7 = arith.constant 0 : index
    %8 = vector.load %arg7[%c0_6, %c0_7] : memref<128x128xf32, #tpu.memory_space<vmem>>, vector<128x128xf32>
    %9 = arith.mulf %7, %8 : vector<128x128xf32>
    %10 = vector.extract_strided_slice %4 {offsets = [0, 128], sizes = [128, 128], strides = [1, 1]} : vector<128x384xf32> to vector<128x128xf32>
    %c0_8 = arith.constant 0 : index
    %c0_9 = arith.constant 0 : index
    %11 = vector.load %arg8[%c0_8, %c0_9] : memref<128x128xf32, #tpu.memory_space<vmem>>, vector<128x128xf32>
    %12 = arith.mulf %10, %11 : vector<128x128xf32>
    %13 = arith.addf %9, %12 : vector<128x128xf32>
    %14 = arith.truncf %13 : vector<128x128xf32> to vector<128x128xbf16>
    %15 = vector.extract_strided_slice %4 {offsets = [0, 256], sizes = [128, 128], strides = [1, 1]} : vector<128x384xf32> to vector<128x128xf32>
    %16 = arith.truncf %15 : vector<128x128xf32> to vector<128x128xbf16>
    %17 = vector.extract_strided_slice %6 {offsets = [0, 0], sizes = [128, 256], strides = [1, 1]} : vector<128x512xf32> to vector<128x256xf32>
    %c0_10 = arith.constant 0 : index
    %c0_11 = arith.constant 0 : index
    %18 = vector.load %arg5[%c0_10, %c0_11] : memref<128x256xf32, #tpu.memory_space<vmem>>, vector<128x256xf32>
    %19 = arith.mulf %17, %18 : vector<128x256xf32>
    %20 = vector.extract_strided_slice %6 {offsets = [0, 256], sizes = [128, 256], strides = [1, 1]} : vector<128x512xf32> to vector<128x256xf32>
    %c0_12 = arith.constant 0 : index
    %c0_13 = arith.constant 0 : index
    %21 = vector.load %arg6[%c0_12, %c0_13] : memref<128x256xf32, #tpu.memory_space<vmem>>, vector<128x256xf32>
    %22 = arith.mulf %20, %21 : vector<128x256xf32>
    %23 = arith.addf %19, %22 : vector<128x256xf32>
    %24 = arith.truncf %23 : vector<128x256xf32> to vector<128x256xbf16>
    %25 = tpu.iota {dimensions = array<i32: 0>} : vector<128x128xi32>
    %26 = vector.broadcast %1 : i32 to vector<128x128xi32>
    %27 = arith.addi %26, %25 : vector<128x128xi32>
    %28 = tpu.iota {dimensions = array<i32: 1>} : vector<128x128xi32>
    %29 = arith.cmpi sle, %28, %27 : vector<128x128xi32>
    %c0_14 = arith.constant 0 : index
    %c0_15 = arith.constant 0 : index
    %30 = vector.load %arg9[%c0_14, %c0_15] : memref<128x1xi32, #tpu.memory_space<vmem>>, vector<128x1xi32>
    %31 = vector.broadcast %30 : vector<128x1xi32> to vector<128x128xi32>
    %32 = arith.cmpi sge, %28, %31 : vector<128x128xi32>
    %33 = arith.andi %29, %32 : vector<128x128xi1>
    %cst_16 = arith.constant 0.000000e+00 : f32
    %cst_17 = arith.constant -1.000000e+30 : f32
    %34 = vector.broadcast %cst_16 : f32 to vector<128x128xf32>
    %35 = vector.broadcast %cst_17 : f32 to vector<128x128xf32>
    %36 = arith.select %33, %34, %35 : vector<128x128xi1>, vector<128x128xf32>
    %37 = tpu.concatenate %36, %36 in 0 : vector<128x128xf32>, vector<128x128xf32> -> vector<256x128xf32>
    %38 = vector.extract_strided_slice %14 {offsets = [0, 0], sizes = [128, 64], strides = [1, 1]} : vector<128x128xbf16> to vector<128x64xbf16>
    %39 = vector.extract_strided_slice %16 {offsets = [0, 0], sizes = [128, 64], strides = [1, 1]} : vector<128x128xbf16> to vector<128x64xbf16>
    %40 = vector.extract_strided_slice %24 {offsets = [0, 0], sizes = [128, 64], strides = [1, 1]} : vector<128x256xbf16> to vector<128x64xbf16>
    %41 = vector.extract_strided_slice %24 {offsets = [0, 64], sizes = [128, 64], strides = [1, 1]} : vector<128x256xbf16> to vector<128x64xbf16>
    %42 = tpu.concatenate %40, %41 in 0 : vector<128x64xbf16>, vector<128x64xbf16> -> vector<256x64xbf16>
    %cst_18 = arith.constant dense<0.000000e+00> : vector<256x128xf32>
    %43 = tpu.matmul %42, %38, %cst_18 {dimension_numbers = #tpu.dot_dimension_numbers<[1], [1], [0], [0], [0, 0, 1, 0], [], []>} : vector<256x64xbf16>, vector<128x64xbf16>, vector<256x128xf32> -> vector<256x128xf32>
    %44 = arith.addf %43, %37 : vector<256x128xf32>
    %cst_19 = arith.constant dense<0xFF800000> : vector<256xf32>
    %45 = vector.multi_reduction <maximumf>, %44, %cst_19 [1] : vector<256x128xf32> to vector<256xf32>
    %46 = vector.shape_cast %45 : vector<256xf32> to vector<256x1xf32>
    %47 = vector.broadcast %46 : vector<256x1xf32> to vector<256x128xf32>
    %48 = arith.subf %44, %47 : vector<256x128xf32>
    %49 = math.exp %48 : vector<256x128xf32>
    %cst_20 = arith.constant dense<0.000000e+00> : vector<256xf32>
    %50 = vector.multi_reduction <add>, %49, %cst_20 [1] : vector<256x128xf32> to vector<256xf32>
    %51 = vector.shape_cast %50 : vector<256xf32> to vector<256x1xf32>
    %52 = arith.truncf %49 : vector<256x128xf32> to vector<256x128xbf16>
    %cst_21 = arith.constant dense<0.000000e+00> : vector<256x64xf32>
    %53 = tpu.matmul %52, %39, %cst_21 {dimension_numbers = #tpu.dot_dimension_numbers<[1], [0], [0], [1], [0, 0, 1, 1], [], []>} : vector<256x128xbf16>, vector<128x64xbf16>, vector<256x64xf32> -> vector<256x64xf32>
    %54 = tpu.reciprocal %51 {approx = true} : vector<256x1xf32> -> vector<256x1xf32>
    %55 = vector.broadcast %54 : vector<256x1xf32> to vector<256x64xf32>
    %56 = arith.mulf %53, %55 : vector<256x64xf32>
    %57 = vector.extract_strided_slice %56 {offsets = [0, 0], sizes = [128, 64], strides = [1, 1]} : vector<256x64xf32> to vector<128x64xf32>
    %58 = vector.extract_strided_slice %56 {offsets = [128, 0], sizes = [128, 64], strides = [1, 1]} : vector<256x64xf32> to vector<128x64xf32>
    %59 = vector.extract_strided_slice %14 {offsets = [0, 64], sizes = [128, 64], strides = [1, 1]} : vector<128x128xbf16> to vector<128x64xbf16>
    %60 = vector.extract_strided_slice %16 {offsets = [0, 64], sizes = [128, 64], strides = [1, 1]} : vector<128x128xbf16> to vector<128x64xbf16>
    %61 = vector.extract_strided_slice %24 {offsets = [0, 128], sizes = [128, 64], strides = [1, 1]} : vector<128x256xbf16> to vector<128x64xbf16>
    %62 = vector.extract_strided_slice %24 {offsets = [0, 192], sizes = [128, 64], strides = [1, 1]} : vector<128x256xbf16> to vector<128x64xbf16>
    %63 = tpu.concatenate %61, %62 in 0 : vector<128x64xbf16>, vector<128x64xbf16> -> vector<256x64xbf16>
    %cst_22 = arith.constant dense<0.000000e+00> : vector<256x128xf32>
    %64 = tpu.matmul %63, %59, %cst_22 {dimension_numbers = #tpu.dot_dimension_numbers<[1], [1], [0], [0], [0, 0, 1, 0], [], []>} : vector<256x64xbf16>, vector<128x64xbf16>, vector<256x128xf32> -> vector<256x128xf32>
    %65 = arith.addf %64, %37 : vector<256x128xf32>
    %cst_23 = arith.constant dense<0xFF800000> : vector<256xf32>
    %66 = vector.multi_reduction <maximumf>, %65, %cst_23 [1] : vector<256x128xf32> to vector<256xf32>
    %67 = vector.shape_cast %66 : vector<256xf32> to vector<256x1xf32>
    %68 = vector.broadcast %67 : vector<256x1xf32> to vector<256x128xf32>
    %69 = arith.subf %65, %68 : vector<256x128xf32>
    %70 = math.exp %69 : vector<256x128xf32>
    %cst_24 = arith.constant dense<0.000000e+00> : vector<256xf32>
    %71 = vector.multi_reduction <add>, %70, %cst_24 [1] : vector<256x128xf32> to vector<256xf32>
    %72 = vector.shape_cast %71 : vector<256xf32> to vector<256x1xf32>
    %73 = arith.truncf %70 : vector<256x128xf32> to vector<256x128xbf16>
    %cst_25 = arith.constant dense<0.000000e+00> : vector<256x64xf32>
    %74 = tpu.matmul %73, %60, %cst_25 {dimension_numbers = #tpu.dot_dimension_numbers<[1], [0], [0], [1], [0, 0, 1, 1], [], []>} : vector<256x128xbf16>, vector<128x64xbf16>, vector<256x64xf32> -> vector<256x64xf32>
    %75 = tpu.reciprocal %72 {approx = true} : vector<256x1xf32> -> vector<256x1xf32>
    %76 = vector.broadcast %75 : vector<256x1xf32> to vector<256x64xf32>
    %77 = arith.mulf %74, %76 : vector<256x64xf32>
    %78 = vector.extract_strided_slice %77 {offsets = [0, 0], sizes = [128, 64], strides = [1, 1]} : vector<256x64xf32> to vector<128x64xf32>
    %79 = vector.extract_strided_slice %77 {offsets = [128, 0], sizes = [128, 64], strides = [1, 1]} : vector<256x64xf32> to vector<128x64xf32>
    %80 = tpu.concatenate %57, %58, %78, %79 in 1 : vector<128x64xf32>, vector<128x64xf32>, vector<128x64xf32>, vector<128x64xf32> -> vector<128x256xf32>
    %81 = arith.truncf %80 : vector<128x256xf32> to vector<128x256xbf16>
    %c0_26 = arith.constant 0 : index
    %c0_27 = arith.constant 0 : index
    %82 = vector.load %arg4[%c0_26, %c0_27] : memref<256x256xbf16, #tpu.memory_space<vmem>>, vector<256x256xbf16>
    %cst_28 = arith.constant dense<0.000000e+00> : vector<128x256xf32>
    %83 = tpu.matmul %81, %82, %cst_28 {dimension_numbers = #tpu.dot_dimension_numbers<[1], [0], [0], [1], [0, 0, 1, 1], [], []>} : vector<128x256xbf16>, vector<256x256xbf16>, vector<128x256xf32> -> vector<128x256xf32>
    %c0_29 = arith.constant 0 : index
    %c0_30 = arith.constant 0 : index
    %84 = vector.load %arg10[%c0_29, %c0_30] : memref<128x256xf32, #tpu.memory_space<vmem>>, vector<128x256xf32>
    tpu.vector_store %arg10[%c0_29, %c0_30], %83 {strides = array<i32>} : memref<128x256xf32, #tpu.memory_space<vmem>>, vector<128x256xf32>,
    return
  }
  func.func @transform_0(%arg0: i32) -> (i32, i32) {
    %c0_i32 = arith.constant 0 : i32
    %c0_i32_0 = arith.constant 0 : i32
    %c0_i32_1 = arith.constant 0 : i32
    return %c0_i32, %c0_i32_0 : i32, i32
  }
  func.func @transform_1(%arg0: i32) -> (i32, i32) {
    %c0_i32 = arith.constant 0 : i32
    %c0_i32_0 = arith.constant 0 : i32
    %c0_i32_1 = arith.constant 0 : i32
    return %c0_i32, %c0_i32_0 : i32, i32
  }
  func.func @transform_2(%arg0: i32) -> (i32, i32) {
    %c0_i32 = arith.constant 0 : i32
    %c0_i32_0 = arith.constant 0 : i32
    %c0_i32_1 = arith.constant 0 : i32
    return %c0_i32, %c0_i32_0 : i32, i32
  }
  func.func @transform_3(%arg0: i32) -> (i32, i32) {
    %c0_i32 = arith.constant 0 : i32
    %c0_i32_0 = arith.constant 0 : i32
    %c0_i32_1 = arith.constant 0 : i32
    return %c0_i32, %c0_i32_0 : i32, i32
  }
  func.func @transform_4(%arg0: i32) -> (i32, i32) {
    %c0_i32 = arith.constant 0 : i32
    %c0_i32_0 = arith.constant 0 : i32
    return %arg0, %c0_i32 : i32, i32
  }
  func.func @transform_5(%arg0: i32) -> (i32, i32) {
    %c0_i32 = arith.constant 0 : i32
    %c0_i32_0 = arith.constant 0 : i32
    return %arg0, %c0_i32 : i32, i32
  }
  func.func @transform_6(%arg0: i32) -> (i32, i32) {
    %c0_i32 = arith.constant 0 : i32
    %c0_i32_0 = arith.constant 0 : i32
    %c0_i32_1 = arith.constant 0 : i32
    return %c0_i32, %c0_i32_0 : i32, i32
  }
  func.func @transform_7(%arg0: i32) -> (i32, i32) {
    %c0_i32 = arith.constant 0 : i32
    %c0_i32_0 = arith.constant 0 : i32
    %c0_i32_1 = arith.constant 0 : i32
    return %c0_i32, %c0_i32_0 : i32, i32
  }
  func.func @transform_8(%arg0: i32) -> (i32, i32) {
    %c0_i32 = arith.constant 0 : i32
    %c0_i32_0 = arith.constant 0 : i32
    return %arg0, %c0_i32 : i32, i32
  }
  func.func @transform_9(%arg0: i32) -> (i32, i32) {
    %c0_i32 = arith.constant 0 : i32
    %c0_i32_0 = arith.constant 0 : i32
    return %arg0, %c0_i32 : i32, i32
  }
}

</mosaic_0001>

<bundles_post_ra>
// kernel: tpu_custom_call.1
= control target key start
LH: loop header
LB: loop body
LE: loop exit
PB: predicated region body
PF: predicated region fallthrough
CT: control target
= control target key end

     0   :  { %14 = vsyncpa [#allocation3], 0  ;;  %s6700_s0 = inlined_call_operand.vmem [shape: bf16[128,256], index: 0, kind: input, shape index: {}]   ;;  %s6701_s1 = inlined_call_operand.hbm [shape: bf16[256,512], index: 1, kind: input, shape index: {}]   ;;  %s6702_s2 = inlined_call_operand.hbm [shape: bf16[256,384], index: 2, kind: input, shape index: {}]   ;;  %s6703_s3 = inlined_call_operand.hbm [shape: bf16[256,256], index: 3, kind: input, shape index: {}]   ;;  %s6704_s4 = inlined_call_operand.hbm [shape: f32[128,256], index: 4, kind: input, shape index: {}]   ;;  %s6705_s5 = inlined_call_operand.hbm [shape: f32[128,256], index: 5, kind: input, shape index: {}]   ;;  %s6706_s6 = inlined_call_operand.hbm [shape: f32[128,128], index: 6, kind: input, shape index: {}]   ;;  %s6707_s7 = inlined_call_operand.hbm [shape: f32[128,128], index: 7, kind: input, shape index: {}]   ;;  %s6708_s8 = inlined_call_operand.vmem [shape: s32[128,1], index: 8, kind: input, shape index: {}]   ;;  %s6709_s9 = inlined_call_operand.hbm [shape: f32[128,256], index: 9, kind: output, shape index: {}]  }
   0x1   :  { %15 = vsyncpa [#allocation6], 0 }
   0x2   :  { %16 = vsyncpa [#allocation9], 0 }
   0x3   :  { %17 = vsyncpa [#allocation12], 0 }
   0x4   :  { %18 = vsyncpa [#allocation4], 0  ;;  %s5201_s30 = smov [#allocation5]   ;;  %s5015_s13 = scalar_lea.hbm %s6702_s2, 6144 }
   0x5   :  { %s38_s10 = sshll.u32 %s5201_s30, 4  ;;  %p5016_p0 = scmp.ne.s32.totalorder %s6702_s2, %s5015_s13  ;;  %s39_s10 = int_to_ptr.vmem [resolvable:$true] %s38_s10 }
   0x6   :  { %p5019_p1 = scmp.lt.u32.totalorder %s5015_s13, %s6702_s2 }
   0x8   :  { %p5021_p2 = pnand %p5019_p1, %p5016_p0 }
   0xa   :  { %5024 = shalt.err (!%p5021_p2)
}
   0xb   :  { %s5025_s18 = scalar_lea.vmem %s39_s10, 6144  ;;  %p5030_p4 = scmp.lt.s32.totalorder %s39_s10, %s39_s10 }
   0xc   :  { %p5026_p3 = scmp.ne.s32.totalorder %s39_s10, %s5025_s18  ;;  %p5031_p5 = scmp.lt.s32.totalorder %s5025_s18, %s5025_s18 }
   0xe   :  { %p5032_p6 = por %p5031_p5, %p5030_p4 }
  0x10   :  { %p5033_p7 = pnand %p5032_p6, %p5026_p3 }
  0x12   :  { %5036 = shalt.err (!%p5033_p7)
}
  0x13   :  { %s5202_s19 = smov 192   ;;  %s5203_s20 = smov 12  }
  0x14   :  { %44 = dma.hbm_to_vmem [thread:$0]  %s6702_s2, 6144, %s39_s10, [#allocation6], %s5202_s19, %s5202_s19, %s5203_s20  }
  0x15   :  { %s5204_s23 = smov [#allocation8]   ;;  %s5037_s27 = scalar_lea.hbm %s6704_s4, 4096 }
  0x16   :  { %s62_s24 = sshll.u32 %s5204_s23, 4  ;;  %p5038_p8 = scmp.ne.s32.totalorder %s6704_s4, %s5037_s27  ;;  %s63_s24 = int_to_ptr.vmem [resolvable:$true] %s62_s24 }
  0x17   :  { %p5041_p9 = scmp.lt.u32.totalorder %s5037_s27, %s6704_s4 }
  0x19   :  { %p5043_p10 = pnand %p5041_p9, %p5038_p8 }
  0x1b   :  { %5046 = shalt.err (!%p5043_p10)
}
  0x1c   :  { %s5047_s12 = scalar_lea.vmem %s63_s24, 4096  ;;  %p5052_p12 = scmp.lt.s32.totalorder %s63_s24, %s63_s24 }
  0x1d   :  { %p5048_p11 = scmp.ne.s32.totalorder %s63_s24, %s5047_s12  ;;  %p5053_p13 = scmp.lt.s32.totalorder %s5047_s12, %s5047_s12 }
  0x1f   :  { %p5054_p0 = por %p5053_p13, %p5052_p12 }
  0x21   :  { %p5055_p1 = pnand %p5054_p0, %p5048_p11 }
  0x23   :  { %5058 = shalt.err (!%p5055_p1)
}
  0x24   :  { %s5205_s2 = smov 256   ;;  %s5206_s10 = smov 16  }
  0x25   :  { %68 = dma.hbm_to_vmem [thread:$0]  %s6704_s4, 4096, %s63_s24, [#allocation9], %s5205_s2, %s5205_s2, %s5206_s10  }
  0x26   :  { %s5207_s15 = smov [#allocation11]   ;;  %s5208_s17 = smov [#allocation2]  }
  0x27   :  { %s86_s16 = sshll.u32 %s5207_s15, 4  ;;  %s26_s18 = sshll.u32 %s5208_s17, 4  ;;  %s87_s16 = int_to_ptr.vmem [resolvable:$true] %s86_s16  ;;  %s5295_s18 = int_to_ptr.vmem [resolvable:$true] %s26_s18 }
  0x28   :  { %s5059_s21 = scalar_lea.hbm %s6706_s6, 2048 }
  0x29   :  { %p5060_p2 = scmp.ne.s32.totalorder %s6706_s6, %s5059_s21  ;;  %p5063_p3 = scmp.lt.u32.totalorder %s5059_s21, %s6706_s6 }
  0x2b   :  { %p5065_p4 = pnand %p5063_p3, %p5060_p2 }
  0x2d   :  { %5068 = shalt.err (!%p5065_p4)
}
  0x2e   :  { %s5069_s4 = scalar_lea.vmem %s87_s16, 2048  ;;  %p5074_p6 = scmp.lt.s32.totalorder %s87_s16, %s87_s16 }
  0x2f   :  { %p5070_p5 = scmp.ne.s32.totalorder %s87_s16, %s5069_s4  ;;  %p5075_p7 = scmp.lt.s32.totalorder %s5069_s4, %s5069_s4 }
  0x31   :  { %p5076_p8 = por %p5075_p7, %p5074_p6 }
  0x33   :  { %p5077_p9 = pnand %p5076_p8, %p5070_p5 }
  0x35   :  { %5080 = shalt.err (!%p5077_p9)
}
  0x36   :  { %s5209_s24 = smov 128   ;;  %s5210_s27 = smov 8  }
  0x37   :  { %92 = dma.hbm_to_vmem [thread:$0]  %s6706_s6, 2048, %s87_s16, [#allocation12], %s5209_s24, %s5209_s24, %s5210_s27  }
  0x38   :  { %s5081_s12 = scalar_lea.hbm %s6701_s1, 8192 }
  0x39   :  { %p5082_p10 = scmp.ne.s32.totalorder %s6701_s1, %s5081_s12  ;;  %p5085_p11 = scmp.lt.u32.totalorder %s5081_s12, %s6701_s1 }
  0x3b   :  { %p5087_p12 = pnand %p5085_p11, %p5082_p10 }
  0x3d   :  { %5090 = shalt.err (!%p5087_p12)
}
  0x3e   :  { %s5091_s19 = scalar_lea.vmem %s5295_s18, 8192  ;;  %p5096_p0 = scmp.lt.s32.totalorder %s5295_s18, %s5295_s18 }
  0x3f   :  { %p5092_p13 = scmp.ne.s32.totalorder %s5295_s18, %s5091_s19  ;;  %p5097_p1 = scmp.lt.s32.totalorder %s5091_s19, %s5091_s19 }
  0x41   :  { %p5098_p2 = por %p5097_p1, %p5096_p0 }
  0x43   :  { %p5099_p3 = pnand %p5098_p2, %p5092_p13 }
  0x45   :  { %5102 = shalt.err (!%p5099_p3)
}
  0x46   :  { %32 = dma.hbm_to_vmem [thread:$0]  %s6701_s1, 8192, %s5295_s18, [#allocation3], %s5205_s2, %s5205_s2, %s5206_s10  }
  0x47   :  { %s5211_s20 = smov [#allocation7]   ;;  %s5212_s22 = smov [#allocation10]  }
  0x48   :  { %s50_s21 = sshll.u32 %s5211_s20, 4  ;;  %s74_s23 = sshll.u32 %s5212_s22, 4  ;;  %s51_s21 = int_to_ptr.vmem [resolvable:$true] %s50_s21  ;;  %s5332_s23 = int_to_ptr.vmem [resolvable:$true] %s74_s23 }
  0x49   :  { %s5103_s4 = scalar_lea.hbm %s6703_s3, 4096 }
  0x4a   :  { %p5104_p4 = scmp.ne.s32.totalorder %s6703_s3, %s5103_s4  ;;  %p5107_p5 = scmp.lt.u32.totalorder %s5103_s4, %s6703_s3 }
  0x4c   :  { %p5109_p6 = pnand %p5107_p5, %p5104_p4 }
  0x4e   :  { %5112 = shalt.err (!%p5109_p6)
}
  0x4f   :  { %s5113_s1 = scalar_lea.vmem %s51_s21, 4096  ;;  %p5118_p8 = scmp.lt.s32.totalorder %s51_s21, %s51_s21 }
  0x50   :  { %p5114_p7 = scmp.ne.s32.totalorder %s51_s21, %s5113_s1  ;;  %p5119_p9 = scmp.lt.s32.totalorder %s5113_s1, %s5113_s1 }
  0x52   :  { %p5120_p10 = por %p5119_p9, %p5118_p8 }
  0x54   :  { %p5121_p11 = pnand %p5120_p10, %p5114_p7 }
  0x56   :  { %5124 = shalt.err (!%p5121_p11)
}
  0x57   :  { %56 = dma.hbm_to_vmem [thread:$0]  %s6703_s3, 4096, %s51_s21, [#allocation6], %s5209_s24, %s5209_s24, %s5210_s27  }
  0x58   :  { %s5125_s15 = scalar_lea.hbm %s6705_s5, 4096 }
  0x59   :  { %p5126_p12 = scmp.ne.s32.totalorder %s6705_s5, %s5125_s15  ;;  %p5129_p13 = scmp.lt.u32.totalorder %s5125_s15, %s6705_s5 }
  0x5b   :  { %p5131_p0 = pnand %p5129_p13, %p5126_p12 }
  0x5d   :  { %5134 = shalt.err (!%p5131_p0)
}
  0x5e   :  { %s5135_s20 = scalar_lea.vmem %s5332_s23, 4096  ;;  %p5140_p2 = scmp.lt.s32.totalorder %s5332_s23, %s5332_s23 }
  0x5f   :  { %p5136_p1 = scmp.ne.s32.totalorder %s5332_s23, %s5135_s20  ;;  %p5141_p3 = scmp.lt.s32.totalorder %s5135_s20, %s5135_s20 }
  0x61   :  { %p5142_p4 = por %p5141_p3, %p5140_p2 }
  0x63   :  { %p5143_p5 = pnand %p5142_p4, %p5136_p1 }
  0x65   :  { %5146 = shalt.err (!%p5143_p5)
}
  0x66   :  { %80 = dma.hbm_to_vmem [thread:$0]  %s6705_s5, 4096, %s5332_s23, [#allocation9], %s5205_s2, %s5205_s2, %s5206_s10  }
  0x67   :  { %s5213_s22 = smov [#allocation13]   ;;  %s5147_s28 = scalar_lea.hbm %s6707_s7, 2048 }
  0x68   :  { %s98_s25 = sshll.u32 %s5213_s22, 4  ;;  %p5148_p6 = scmp.ne.s32.totalorder %s6707_s7, %s5147_s28  ;;  %s99_s25 = int_to_ptr.vmem [resolvable:$true] %s98_s25 }
  0x69   :  { %p5151_p7 = scmp.lt.u32.totalorder %s5147_s28, %s6707_s7 }
  0x6b   :  { %p5153_p8 = pnand %p5151_p7, %p5148_p6 }
  0x6d   :  { %5156 = shalt.err (!%p5153_p8)
}
  0x6e   :  { %s5157_s18 = scalar_lea.vmem %s99_s25, 2048  ;;  %p5162_p10 = scmp.lt.s32.totalorder %s99_s25, %s99_s25 }
  0x6f   :  { %p5158_p9 = scmp.ne.s32.totalorder %s99_s25, %s5157_s18  ;;  %p5163_p11 = scmp.lt.s32.totalorder %s5157_s18, %s5157_s18 }
  0x71   :  { %p5164_p12 = por %p5163_p11, %p5162_p10 }
  0x73   :  { %p5165_p13 = pnand %p5164_p12, %p5158_p9 }
  0x75   :  { %5168 = shalt.err (!%p5165_p13)
}
  0x76   :  { %104 = dma.hbm_to_vmem [thread:$0]  %s6707_s7, 2048, %s99_s25, [#allocation12], %s5209_s24, %s5209_s24, %s5210_s27  }
  0x77   :  { %5191 = dma.done.wait [#allocation3], 8192  }
  0x78   :  { %5192 = vsyncadd [#allocation3], 4294959104 }
  0x79   :  { %5193 = dma.done.wait [#allocation6], 10240  }
  0x7a   :  { %5194 = vsyncadd [#allocation6], 4294957056 }
  0x7b   :  { %5195 = dma.done.wait [#allocation9], 8192  }
  0x7c   :  { %5196 = vsyncadd [#allocation9], 4294959104 }
  0x7d   :  { %5197 = dma.done.wait [#allocation12], 4096  }
  0x7e   :  { %5198 = vsyncadd [#allocation12], 4294963200  ;;  %v4527_v0 = vld [vmem:[#allocation5 + $0x4] ss:$12 sps:$4 sm:$0xff]   ;;  %v4529_v1 = vld [vmem:[#allocation5] ss:$12 sps:$4 sm:$0xff]  }
  0x7f   :  { %546 = vmatprep.subr.bf16.mxu0 %v4527_v0  ;;  %v4530_v2 = vld [vmem:[#allocation5 + $0x1c] ss:$12 sps:$4 sm:$0xff]   ;;  %v4532_v3 = vld [vmem:[#allocation5 + $0x18] ss:$12 sps:$4 sm:$0xff]   ;;  %v4533_v4 = vld [vmem:[#allocation5 + $0x34] ss:$12 sps:$4 sm:$0xff]  }
  0x80   :  { %547 = vmatpush1.bf16.msra.mxu0 %v4529_v1  ;;  %v4535_v5 = vld [vmem:[#allocation5 + $0x30] ss:$12 sps:$4 sm:$0xff]   ;;  %v4536_v6 = vld [vmem:[#allocation5 + $0x4c] ss:$12 sps:$4 sm:$0xff]   ;;  %v4538_v7 = vld [vmem:[#allocation5 + $0x48] ss:$12 sps:$4 sm:$0xff]  }
  0x81   :  { %548 = vmatprep.subr.bf16.mxu0 %v4530_v2  ;;  %v4539_v8 = vld [vmem:[#allocation5 + $0x64] ss:$12 sps:$4 sm:$0xff]   ;;  %v4551_v9 = vld [vmem:[#allocation5 + $0xc8] ss:$12 sps:$4 sm:$0xff]   ;;  %v4541_v11 = vld [vmem:[#allocation5 + $0x60] ss:$12 sps:$4 sm:$0xff]  }
  0x82   :  { %v4552_v10 = vld [vmem:[#allocation5 + $0x8] ss:$12 sps:$4 sm:$0xff]   ;;  %4028 = vmatprep.subr.bf16.mxu1 %v4551_v9  ;;  %v4556_v12 = vld [vmem:[#allocation5 + $0xe0] ss:$12 sps:$4 sm:$0xff]   ;;  %v4544_v15 = vld [vmem:[#allocation5 + $0x78] ss:$12 sps:$4 sm:$0xff]  }
  0x83   :  { %4029 = vmatpush3.bf16.msra.mxu1 %v4552_v10  ;;  %v4557_v13 = vld [vmem:[#allocation5 + $0x20] ss:$12 sps:$4 sm:$0xff]   ;;  %v4542_v14 = vld [vmem:[#allocation5 + $0x7c] ss:$12 sps:$4 sm:$0xff]   ;;  %v4561_v16 = vld [vmem:[#allocation5 + $0xf8] ss:$12 sps:$4 sm:$0xff]  }
  0x84   :  { %549 = vmatpush1.bf16.msra.mxu0 %v4532_v3  ;;  %4030 = vmatprep.subr.bf16.mxu1 %v4556_v12  ;;  %v4562_v17 = vld [vmem:[#allocation5 + $0x38] ss:$12 sps:$4 sm:$0xff]   ;;  %v4545_v18 = vld [vmem:[#allocation5 + $0x94] ss:$12 sps:$4 sm:$0xff]   ;;  %v4566_v19 = vld [vmem:[#allocation5 + $0x110] ss:$12 sps:$4 sm:$0xff]  }
  0x85   :  { %550 = vmatprep.subr.bf16.mxu0 %v4533_v4  ;;  %v4567_v20 = vld [vmem:[#allocation5 + $0x50] ss:$12 sps:$4 sm:$0xff]   ;;  %v4548_v22 = vld [vmem:[#allocation5 + $0xac] ss:$12 sps:$4 sm:$0xff]   ;;  %v4571_v23 = vld [vmem:[#allocation5 + $0x128] ss:$12 sps:$4 sm:$0xff]  }
  0x86   :  { %v4547_v21 = vld [vmem:[#allocation5 + $0x90] ss:$12 sps:$4 sm:$0xff]   ;;  %v4550_v24 = vld [vmem:[#allocation5 + $0xa8] ss:$12 sps:$4 sm:$0xff]   ;;  %v4576_v27 = vld [vmem:[#allocation5 + $0x140] ss:$12 sps:$4 sm:$0xff]  }
  0x87   :  { %4031 = vmatpush3.bf16.msra.mxu1 %v4557_v13  ;;  %v4572_v25 = vld [vmem:[#allocation5 + $0x68] ss:$12 sps:$4 sm:$0xff]   ;;  %v4553_v26 = vld [vmem:[#allocation5 + $0xc4] ss:$12 sps:$4 sm:$0xff]   ;;  %v4555_v28 = vld [vmem:[#allocation5 + $0xc0] ss:$12 sps:$4 sm:$0xff]  }
  0x88   :  { %551 = vmatpush1.bf16.msra.mxu0 %v4535_v5  ;;  %4032 = vmatprep.subr.bf16.mxu1 %v4561_v16  ;;  %v4577_v29 = vld [vmem:[#allocation5 + $0x80] ss:$12 sps:$4 sm:$0xff]   ;;  %v4581_v30 = vld [vmem:[#allocation5 + $0x158] ss:$12 sps:$4 sm:$0xff]   ;;  %v4558_v31 = vld [vmem:[#allocation5 + $0xdc] ss:$12 sps:$4 sm:$0xff]  }
  0x89   :  { %552 = vmatprep.subr.bf16.mxu0 %v4536_v6  ;;  %v4560_v32 = vld [vmem:[#allocation5 + $0xd8] ss:$12 sps:$4 sm:$0xff]   ;;  %v4586_v34 = vld [vmem:[#allocation5 + $0x170] ss:$12 sps:$4 sm:$0xff]   ;;  %v4563_v35 = vld [vmem:[#allocation5 + $0xf4] ss:$12 sps:$4 sm:$0xff]  }
  0x8a   :  { %v4582_v33 = vld [vmem:[#allocation5 + $0x98] ss:$12 sps:$4 sm:$0xff]   ;;  %v4587_v37 = vld [vmem:[#allocation5 + $0xb0] ss:$12 sps:$4 sm:$0xff]   ;;  %v4570_v41 = vld [vmem:[#allocation5 + $0x108] ss:$12 sps:$4 sm:$0xff]  }
  0x8b   :  { %4033 = vmatpush3.bf16.msra.mxu1 %v4562_v17  ;;  %v5387_v36 = vld [vmem:[%s6700_s0 + $0x4] ss:$8 sps:$4 sm:$0xff]   ;;  %v4565_v38 = vld [vmem:[#allocation5 + $0xf0] ss:$12 sps:$4 sm:$0xff]   ;;  %v5393_v42 = vld [vmem:[%s6700_s0] ss:$8 sps:$4 sm:$0xff]  }
  0x8c   :  { %553 = vmatpush1.bf16.msra.mxu0 %v4538_v7  ;;  %4034 = vmatprep.subr.bf16.mxu1 %v4566_v19  ;;  %v4596_v39 = vld [vmem:[#allocation2 + $0x4] ss:$16 sps:$4 sm:$0xff]   ;;  %v4568_v40 = vld [vmem:[#allocation5 + $0x10c] ss:$12 sps:$4 sm:$0xff]   ;;  %v4594_v43 = vld [vmem:[#allocation2] ss:$16 sps:$4 sm:$0xff]  }
  0x8d   :  { %554 = vmatprep.subr.bf16.mxu0 %v4539_v8  ;;  %691 = vmatprep.mubr.bf16.mxu1 %v5387_v36  ;;  %v4602_v44 = vld [vmem:[#allocation2 + $0x24] ss:$16 sps:$4 sm:$0xff]   ;;  %v4575_v47 = vld [vmem:[#allocation5 + $0x120] ss:$12 sps:$4 sm:$0xff]   ;;  %v4578_v49 = vld [vmem:[#allocation5 + $0x13c] ss:$12 sps:$4 sm:$0xff]  }
  0x8e   :  { %578 = vmatprep.mubr.bf16.mxu0 %v5387_v36  ;;  %v5399_v45 = vld [vmem:[%s6700_s0 + $0x14] ss:$8 sps:$4 sm:$0xff]   ;;  %v4573_v46 = vld [vmem:[#allocation5 + $0x124] ss:$12 sps:$4 sm:$0xff]   ;;  %v4588_v60 = vld [vmem:[#allocation5 + $0x16c] ss:$12 sps:$4 sm:$0xff]  }
  0x8f   :  { %4035 = vmatpush3.bf16.msra.mxu1 %v4567_v20  ;;  %v4600_v48 = vld [vmem:[#allocation2 + $0x20] ss:$16 sps:$4 sm:$0xff]   ;;  %v4611_v50 = vld [vmem:[#allocation2 + $0x44] ss:$16 sps:$4 sm:$0xff]   ;;  %v4599_v2 = vld [vmem:[#allocation2 + $0xc] ss:$16 sps:$4 sm:$0xff]  }
  0x90   :  { %555 = vmatpush1.bf16.msra.mxu0 %v4541_v11  ;;  %4036 = vmatprep.subr.bf16.mxu1 %v4571_v23  ;;  %v5406_v51 = vld [vmem:[%s6700_s0 + $0x10] ss:$8 sps:$4 sm:$0xff]   ;;  %v5411_v53 = vld [vmem:[%s6700_s0 + $0x24] ss:$8 sps:$4 sm:$0xff]   ;;  %v4583_v56 = vld [vmem:[#allocation5 + $0x154] ss:$12 sps:$4 sm:$0xff]  }
  0x91   :  { %556 = vmatprep.subr.bf16.mxu0 %v4542_v14  ;;  %v4609_v52 = vld [vmem:[#allocation2 + $0x40] ss:$16 sps:$4 sm:$0xff]   ;;  %v4580_v54 = vld [vmem:[#allocation5 + $0x138] ss:$12 sps:$4 sm:$0xff]   ;;  %v5423_v63 = vld [vmem:[%s6700_s0 + $0x34] ss:$8 sps:$4 sm:$0xff]  }
  0x92   :  { %v4617_v55 = vld [vmem:[#allocation2 + $0x64] ss:$16 sps:$4 sm:$0xff]   ;;  %v4615_v57 = vld [vmem:[#allocation2 + $0x60] ss:$16 sps:$4 sm:$0xff]   ;;  %v4597_v4 = vld [vmem:[#allocation2 + $0x8] ss:$16 sps:$4 sm:$0xff]  }
  0x93   :  { %4037 = vmatpush3.bf16.msra.mxu1 %v4572_v25  ;;  %v4585_v58 = vld [vmem:[#allocation5 + $0x150] ss:$12 sps:$4 sm:$0xff]   ;;  %v4626_v59 = vld [vmem:[#allocation2 + $0x84] ss:$16 sps:$4 sm:$0xff]   ;;  %v5418_v61 = vld [vmem:[%s6700_s0 + $0x20] ss:$8 sps:$4 sm:$0xff]  }
  0x94   :  { %557 = vmatpush1.bf16.msra.mxu0 %v4544_v15  ;;  %4038 = vmatprep.subr.bf16.mxu1 %v4576_v27  ;;  %v4624_v62 = vld [vmem:[#allocation2 + $0x80] ss:$16 sps:$4 sm:$0xff]   ;;  %v4592_v0 = vld [vmem:[#allocation5 + $0x168] ss:$12 sps:$4 sm:$0xff]   ;;  %v4607_v5 = vld [vmem:[#allocation2 + $0x2c] ss:$16 sps:$4 sm:$0xff]  }
  0x95   :  { %558 = vmatprep.subr.bf16.mxu0 %v4545_v18  ;;  %v4632_v1 = vld [vmem:[#allocation2 + $0xa4] ss:$16 sps:$4 sm:$0xff]   ;;  %v4630_v3 = vld [vmem:[#allocation2 + $0xa0] ss:$16 sps:$4 sm:$0xff]   ;;  %v4605_v10 = vld [vmem:[#allocation2 + $0x28] ss:$16 sps:$4 sm:$0xff]  }
  0x96   :  { %v4641_v6 = vld [vmem:[#allocation2 + $0xc4] ss:$16 sps:$4 sm:$0xff]   ;;  %v5430_v7 = vld [vmem:[%s6700_s0 + $0x30] ss:$8 sps:$4 sm:$0xff]   ;;  %v4614_v12 = vld [vmem:[#allocation2 + $0x4c] ss:$16 sps:$4 sm:$0xff]  }
  0x97   :  { %4039 = vmatpush3.bf16.msra.mxu1 %v4577_v29  ;;  %v4639_v8 = vld [vmem:[#allocation2 + $0xc0] ss:$16 sps:$4 sm:$0xff]   ;;  %v5436_v9 = vld [vmem:[%s6700_s0 + $0x44] ss:$8 sps:$4 sm:$0xff]   ;;  %v4612_v14 = vld [vmem:[#allocation2 + $0x48] ss:$16 sps:$4 sm:$0xff]  }
  0x98   :  { %559 = vmatpush1.bf16.msra.mxu0 %v4547_v21  ;;  %4040 = vmatprep.subr.bf16.mxu1 %v4581_v30  ;;  %v4647_v11 = vld [vmem:[#allocation2 + $0xe4] ss:$16 sps:$4 sm:$0xff]   ;;  %v4645_v13 = vld [vmem:[#allocation2 + $0xe0] ss:$16 sps:$4 sm:$0xff]   ;;  %v4622_v15 = vld [vmem:[#allocation2 + $0x6c] ss:$16 sps:$4 sm:$0xff]  }
  0x99   :  { %560 = vmatprep.subr.bf16.mxu0 %v4548_v22  ;;  %v4656_v16 = vld [vmem:[#allocation2 + $0x104] ss:$16 sps:$4 sm:$0xff]   ;;  %v5444_v17 = vld [vmem:[%s6700_s0 + $0x40] ss:$8 sps:$4 sm:$0xff]   ;;  %v4629_v22 = vld [vmem:[#allocation2 + $0x8c] ss:$16 sps:$4 sm:$0xff]  }
  0x9a   :  { %v4654_v18 = vld [vmem:[#allocation2 + $0x100] ss:$16 sps:$4 sm:$0xff]   ;;  %v5450_v19 = vld [vmem:[%s6700_s0 + $0x54] ss:$8 sps:$4 sm:$0xff]   ;;  %v4620_v20 = vld [vmem:[#allocation2 + $0x68] ss:$16 sps:$4 sm:$0xff]  }
  0x9b   :  { %4041 = vmatpush3.bf16.msra.mxu1 %v4582_v33  ;;  %v4662_v21 = vld [vmem:[#allocation2 + $0x124] ss:$16 sps:$4 sm:$0xff]   ;;  %v4660_v23 = vld [vmem:[#allocation2 + $0x120] ss:$16 sps:$4 sm:$0xff]   ;;  %v4637_v25 = vld [vmem:[#allocation2 + $0xac] ss:$16 sps:$4 sm:$0xff]  }
  0x9c   :  { %561 = vmatpush1.bf16.msra.mxu0 %v4550_v24  ;;  %4042 = vmatprep.subr.bf16.mxu1 %v4586_v34  ;;  %v4627_v24 = vld [vmem:[#allocation2 + $0x88] ss:$16 sps:$4 sm:$0xff]   ;;  %v4669_v29 = vld [vmem:[#allocation2 + $0x140] ss:$16 sps:$4 sm:$0xff]   ;;  %v5464_v30 = vld [vmem:[%s6700_s0 + $0x64] ss:$8 sps:$4 sm:$0xff]  }
  0x9d   :  { %562 = vmatprep.subr.bf16.mxu0 %v4553_v26  ;;  %v4671_v26 = vld [vmem:[#allocation2 + $0x144] ss:$16 sps:$4 sm:$0xff]   ;;  %v4635_v27 = vld [vmem:[#allocation2 + $0xa8] ss:$16 sps:$4 sm:$0xff]   ;;  %v4675_v34 = vld [vmem:[#allocation2 + $0x160] ss:$16 sps:$4 sm:$0xff]  }
  0x9e   :  { %v4642_v33 = vld [vmem:[#allocation2 + $0xc8] ss:$16 sps:$4 sm:$0xff]   ;;  %vm1826_vm0 = vcmask 523264  }
  0x9f   :  { %4043 = vmatpush3.bf16.msra.mxu1 %v4587_v37  ;;  %v5472_v37 = vld [vmem:[%s6700_s0 + $0x60] ss:$8 sps:$4 sm:$0xff]  }
  0xa0   :  { %563 = vmatpush1.bf16.msra.mxu0 %v4555_v28  ;;  %1140 = vmatprep.subr.bf16.mxu1 %v4596_v39  ;;  %v5458_v28 = vld [vmem:[%s6700_s0 + $0x50] ss:$8 sps:$4 sm:$0xff]  }
  0xa1   :  { %564 = vmatprep.subr.bf16.mxu0 %v4558_v31  ;;  %v4677_v31 = vld [vmem:[#allocation2 + $0x164] ss:$16 sps:$4 sm:$0xff]   ;;  %v4650_v39 = vld [vmem:[#allocation2 + $0xe8] ss:$16 sps:$4 sm:$0xff]  }
  0xa2   :  { %692 = vmatmul.mubr.bf16.vlgmr.msra.gmra.mrb[0].mxu1 %v5393_v42 }
  0xa3   :  { %1141 = vmatpush1.bf16.msra.mxu1 %v4594_v43  ;;  %699 = vmatprep.mubr.bf16.mxu1 %v5399_v45  ;;  %v4692_v43 = vld [vmem:[#allocation2 + $0x1a4] ss:$16 sps:$4 sm:$0xff]  }
  0xa4   :  { %565 = vmatpush1.bf16.msra.mxu0 %v4560_v32  ;;  %1142 = vmatprep.subr.bf16.mxu1 %v4602_v44  ;;  %v4644_v32 = vld [vmem:[#allocation2 + $0xcc] ss:$16 sps:$4 sm:$0xff]  }
  0xa5   :  { %566 = vmatprep.subr.bf16.mxu0 %v4563_v35  ;;  %v4652_v35 = vld [vmem:[#allocation2 + $0xec] ss:$16 sps:$4 sm:$0xff]  }
  0xa6   :  { %v5478_v44 = vld [vmem:[%s6700_s0 + $0x74] ss:$8 sps:$4 sm:$0xff]  }
  0xa7   :  { %1143 = vmatpush1.bf16.msra.mxu1 %v4600_v48  ;;  %v4667_v48 = vld [vmem:[#allocation2 + $0x12c] ss:$16 sps:$4 sm:$0xff]  }
  0xa8   :  { %567 = vmatpush1.bf16.msra.mxu0 %v4565_v38  ;;  %1144 = vmatprep.subr.bf16.mxu1 %v4611_v50  ;;  %v4686_v38 = vld [vmem:[#allocation2 + $0x184] ss:$16 sps:$4 sm:$0xff]   ;;  %v5486_v50 = vld [vmem:[%s6700_s0 + $0x70] ss:$8 sps:$4 sm:$0xff]   ;;  %s5214_s0 = smov 64  }
  0xa9   :  { %568 = vmatprep.subr.bf16.mxu0 %v4568_v40  ;;  %v4684_v40 = vld [vmem:[#allocation2 + $0x180] ss:$16 sps:$4 sm:$0xff]  }
  0xaa   :  { %700 = vmatmul.mubr.bf16.gmra.mrb[4].mxu1 %v5406_v51 }
  0xab   :  { %1145 = vmatpush1.bf16.msra.mxu1 %v4609_v52  ;;  %707 = vmatprep.mubr.bf16.mxu1 %v5411_v53  ;;  %v4699_v52 = vld [vmem:[#allocation2 + $0x1c0] ss:$16 sps:$4 sm:$0xff]  }
  0xac   :  { %569 = vmatpush1.bf16.msra.mxu0 %v4570_v41  ;;  %1146 = vmatprep.subr.bf16.mxu1 %v4617_v55  ;;  %v4659_v41 = vld [vmem:[#allocation2 + $0x10c] ss:$16 sps:$4 sm:$0xff]   ;;  %v4707_v55 = vld [vmem:[#allocation2 + $0x1e4] ss:$16 sps:$4 sm:$0xff]  }
  0xad   :  { %570 = vmatprep.subr.bf16.mxu0 %v4573_v46  ;;  %v4690_v46 = vld [vmem:[#allocation2 + $0x1a0] ss:$16 sps:$4 sm:$0xff]  }
  0xaf   :  { %1147 = vmatpush1.bf16.msra.mxu1 %v4615_v57  ;;  %v4705_v57 = vld [vmem:[#allocation2 + $0x1e0] ss:$16 sps:$4 sm:$0xff]  }
  0xb0   :  { %571 = vmatpush1.bf16.msra.mxu0 %v4575_v47  ;;  %1148 = vmatprep.subr.bf16.mxu1 %v4626_v59  ;;  %v4657_v47 = vld [vmem:[#allocation2 + $0x108] ss:$16 sps:$4 sm:$0xff]   ;;  %v4682_v59 = vld [vmem:[#allocation2 + $0x16c] ss:$16 sps:$4 sm:$0xff]  }
  0xb1   :  { %572 = vmatprep.subr.bf16.mxu0 %v4578_v49  ;;  %v4701_v49 = vld [vmem:[#allocation2 + $0x1c4] ss:$16 sps:$4 sm:$0xff]  }
  0xb2   :  { %708 = vmatmul.mubr.bf16.gmra.mrb[8].mxu1 %v5418_v61 }
  0xb3   :  { %1149 = vmatpush1.bf16.msra.mxu1 %v4624_v62  ;;  %715 = vmatprep.mubr.bf16.mxu1 %v5423_v63  ;;  %v4689_v62 = vld [vmem:[#allocation2 + $0x18c] ss:$16 sps:$4 sm:$0xff]  }
  0xb4   :  { %573 = vmatpush1.bf16.msra.mxu0 %v4580_v54  ;;  %1150 = vmatprep.subr.bf16.mxu1 %v4632_v1  ;;  %v4665_v54 = vld [vmem:[#allocation2 + $0x128] ss:$16 sps:$4 sm:$0xff]   ;;  %v4697_v1 = vld [vmem:[#allocation2 + $0x1ac] ss:$16 sps:$4 sm:$0xff]  }
  0xb5   :  { %574 = vmatprep.subr.bf16.mxu0 %v4583_v56  ;;  %v4674_v56 = vld [vmem:[#allocation2 + $0x14c] ss:$16 sps:$4 sm:$0xff]  }
  0xb7   :  { %1151 = vmatpush1.bf16.msra.mxu1 %v4630_v3  ;;  %v4704_v3 = vld [vmem:[#allocation2 + $0x1cc] ss:$16 sps:$4 sm:$0xff]  }
  0xb8   :  { %575 = vmatpush1.bf16.msra.mxu0 %v4585_v58  ;;  %1152 = vmatprep.subr.bf16.mxu1 %v4641_v6  ;;  %v4672_v58 = vld [vmem:[#allocation2 + $0x148] ss:$16 sps:$4 sm:$0xff]  }
  0xb9   :  { %576 = vmatprep.subr.bf16.mxu0 %v4588_v60  ;;  %v4680_v60 = vld [vmem:[#allocation2 + $0x168] ss:$16 sps:$4 sm:$0xff]  }
  0xba   :  { %716 = vmatmul.mubr.bf16.gmra.mrb[12].mxu1 %v5430_v7  ;;  %v4708_v6 = vld [vmem:[#allocation2 + $0x1e8] ss:$16 sps:$4 sm:$0xff]  }
  0xbb   :  { %1153 = vmatpush1.bf16.msra.mxu1 %v4639_v8  ;;  %723 = vmatprep.mubr.bf16.mxu1 %v5436_v9 }
  0xbc   :  { %577 = vmatpush1.bf16.msra.mxu0 %v4592_v0  ;;  %1154 = vmatprep.subr.bf16.mxu1 %v4647_v11  ;;  %v4687_v0 = vld [vmem:[#allocation2 + $0x188] ss:$16 sps:$4 sm:$0xff]  }
  0xbd   :  { %1253 = vmatprep.subr.bf16.mxu0 %v4599_v2  ;;  %v4695_v2 = vld [vmem:[#allocation2 + $0x1a8] ss:$16 sps:$4 sm:$0xff]  }
  0xbf   :  { %579 = vmatmul.mubr.bf16.vlgmr.msra.gmra.mrb[0].mxu0 %v5393_v42  ;;  %1155 = vmatpush1.bf16.msra.mxu1 %v4645_v13 }
  0xc0   :  { %1254 = vmatpush1.bf16.msra.mxu0 %v4597_v4  ;;  %588 = vmatprep.mubr.bf16.mxu0 %v5399_v45  ;;  %v4702_v4 = vld [vmem:[#allocation2 + $0x1c8] ss:$16 sps:$4 sm:$0xff]  }
  0xc1   :  { %1255 = vmatprep.subr.bf16.mxu0 %v4607_v5  ;;  %1156 = vmatprep.subr.bf16.mxu1 %v4656_v16  ;;  %v4710_v5 = vld [vmem:[#allocation2 + $0x1ec] ss:$16 sps:$4 sm:$0xff]  }
  0xc2   :  { %724 = vmatmul.mubr.bf16.gmra.mrb[16].mxu1 %v5444_v17 }
  0xc3   :  { %1157 = vmatpush1.bf16.msra.mxu1 %v4654_v18  ;;  %731 = vmatprep.mubr.bf16.mxu1 %v5450_v19  ;;  %v1366_v18 = vld [vmem:[#allocation11] sm:$0xff] }
  0xc4   :  { %1256 = vmatpush1.bf16.msra.mxu0 %v4605_v10  ;;  %1158 = vmatprep.subr.bf16.mxu1 %v4662_v21 }
  0xc5   :  { %1257 = vmatprep.subr.bf16.mxu0 %v4614_v12 }
  0xc7   :  { %589 = vmatmul.mubr.bf16.gmra.mrb[4].mxu0 %v5406_v51  ;;  %1159 = vmatpush1.bf16.msra.mxu1 %v4660_v23  ;;  %v1367_v23 = vld [vmem:[#allocation11 + $0x8] sm:$0xff] }
  0xc8   :  { %1258 = vmatpush1.bf16.msra.mxu0 %v4612_v14  ;;  %598 = vmatprep.mubr.bf16.mxu0 %v5411_v53 }
  0xc9   :  { %1259 = vmatprep.subr.bf16.mxu0 %v4622_v15  ;;  %1160 = vmatprep.subr.bf16.mxu1 %v4671_v26  ;;  %v1399_v26 = vld [vmem:[#allocation13 + $0x8] sm:$0xff] }
  0xca   :  { %732 = vmatmul.mubr.bf16.gmra.mrb[20].mxu1 %v5458_v28 }
  0xcb   :  { %1161 = vmatpush1.bf16.msra.mxu1 %v4669_v29  ;;  %739 = vmatprep.mubr.bf16.mxu1 %v5464_v30 }
  0xcc   :  { %1260 = vmatpush1.bf16.msra.mxu0 %v4620_v20  ;;  %1162 = vmatprep.subr.bf16.mxu1 %v4677_v31  ;;  %v1398_v20 = vld [vmem:[#allocation13] sm:$0xff] }
  0xcd   :  { %1261 = vmatprep.subr.bf16.mxu0 %v4629_v22 }
  0xcf   :  { %599 = vmatmul.mubr.bf16.gmra.mrb[8].mxu0 %v5418_v61  ;;  %1163 = vmatpush1.bf16.msra.mxu1 %v4675_v34 }
  0xd0   :  { %1262 = vmatpush1.bf16.msra.mxu0 %v4627_v24  ;;  %608 = vmatprep.mubr.bf16.mxu0 %v5423_v63 }
  0xd1   :  { %1263 = vmatprep.subr.bf16.mxu0 %v4637_v25  ;;  %1164 = vmatprep.subr.bf16.mxu1 %v4686_v38 }
  0xd2   :  { %740 = vmatmul.mubr.bf16.gmra.mrb[24].mxu1 %v5472_v37 }
  0xd3   :  { %1165 = vmatpush1.bf16.msra.mxu1 %v4684_v40  ;;  %747 = vmatprep.mubr.bf16.mxu1 %v5478_v44  ;;  %v1368_v40 = vld [vmem:[#allocation11 + $0x10] sm:$0xff] }
  0xd4   :  { %1264 = vmatpush1.bf16.msra.mxu0 %v4635_v27  ;;  %1166 = vmatprep.subr.bf16.mxu1 %v4692_v43  ;;  %v1400_v43 = vld [vmem:[#allocation13 + $0x10] sm:$0xff] }
  0xd5   :  { %1265 = vmatprep.subr.bf16.mxu0 %v4644_v32 }
  0xd7   :  { %609 = vmatmul.mubr.bf16.gmra.mrb[12].mxu0 %v5430_v7  ;;  %1167 = vmatpush1.bf16.msra.mxu1 %v4690_v46 }
  0xd8   :  { %1266 = vmatpush1.bf16.msra.mxu0 %v4642_v33  ;;  %618 = vmatprep.mubr.bf16.mxu0 %v5436_v9 }
  0xd9   :  { %1267 = vmatprep.subr.bf16.mxu0 %v4652_v35  ;;  %1168 = vmatprep.subr.bf16.mxu1 %v4701_v49 }
  0xda   :  { %748 = vmatmul.mubr.bf16.gmra.mrb[28].mxu1 %v5486_v50 }
  0xdb   :  { %1169 = vmatpush1.bf16.msra.mxu1 %v4699_v52  ;;  %1172 = vmatprep.mubr.bf16.mxu1 %v5387_v36  ;;  %v1401_v52 = vld [vmem:[#allocation13 + $0x18] sm:$0xff] }
  0xdc   :  { %1268 = vmatpush1.bf16.msra.mxu0 %v4650_v39  ;;  %1170 = vmatprep.subr.bf16.mxu1 %v4707_v55 }
  0xdd   :  { %1269 = vmatprep.subr.bf16.mxu0 %v4659_v41 }
  0xdf   :  { %619 = vmatmul.mubr.bf16.gmra.mrb[16].mxu0 %v5444_v17  ;;  %1171 = vmatpush1.bf16.msra.mxu1 %v4705_v57 }
  0xe0   :  { %1270 = vmatpush1.bf16.msra.mxu0 %v4657_v47  ;;  %628 = vmatprep.mubr.bf16.mxu0 %v5450_v19 }
  0xe1   :  { %1271 = vmatprep.subr.bf16.mxu0 %v4667_v48  ;;  %v1369_v48 = vld [vmem:[#allocation11 + $0x18] sm:$0xff] }
  0xe2   :  { %1173 = vmatmul.mubr.bf16.vlgmr.msra.gmra.mrb[32].mxu1 %v5393_v42 }
  0xe3   :  { %1182 = vmatprep.mubr.bf16.mxu1 %v5399_v45 }
  0xe4   :  { %1272 = vmatpush1.bf16.msra.mxu0 %v4665_v54 }
  0xe5   :  { %1273 = vmatprep.subr.bf16.mxu0 %v4674_v56 }
  0xe7   :  { %629 = vmatmul.mubr.bf16.gmra.mrb[20].mxu0 %v5458_v28 }
  0xe8   :  { %1274 = vmatpush1.bf16.msra.mxu0 %v4672_v58  ;;  %638 = vmatprep.mubr.bf16.mxu0 %v5464_v30 }
  0xe9   :  { %1275 = vmatprep.subr.bf16.mxu0 %v4682_v59 }
  0xea   :  { %1183 = vmatmul.mubr.bf16.gmra.mrb[36].mxu1 %v5406_v51 }
  0xeb   :  { %1192 = vmatprep.mubr.bf16.mxu1 %v5411_v53 }
  0xec   :  { %1276 = vmatpush1.bf16.msra.mxu0 %v4680_v60 }
  0xed   :  { %1277 = vmatprep.subr.bf16.mxu0 %v4689_v62 }
  0xef   :  { %639 = vmatmul.mubr.bf16.gmra.mrb[24].mxu0 %v5472_v37 }
  0xf0   :  { %1278 = vmatpush1.bf16.msra.mxu0 %v4687_v0  ;;  %648 = vmatprep.mubr.bf16.mxu0 %v5478_v44 }
  0xf1   :  { %1279 = vmatprep.subr.bf16.mxu0 %v4697_v1 }
  0xf2   :  { %1193 = vmatmul.mubr.bf16.gmra.mrb[40].mxu1 %v5418_v61 }
  0xf3   :  { %1202 = vmatprep.mubr.bf16.mxu1 %v5423_v63 }
  0xf4   :  { %1280 = vmatpush1.bf16.msra.mxu0 %v4695_v2 }
  0xf5   :  { %1281 = vmatprep.subr.bf16.mxu0 %v4704_v3 }
  0xf7   :  { %649 = vmatmul.mubr.bf16.gmra.mrb[28].mxu0 %v5486_v50 }
  0xf8   :  { %1282 = vmatpush1.bf16.msra.mxu0 %v4702_v4  ;;  %1285 = vmatprep.mubr.bf16.mxu0 %v5387_v36 }
  0xf9   :  { %1283 = vmatprep.subr.bf16.mxu0 %v4710_v5  ;;  %v1370_v5 = vld [vmem:[#allocation11 + $0x20] sm:$0xff] }
  0xfa   :  { %1203 = vmatmul.mubr.bf16.gmra.mrb[44].mxu1 %v5430_v7 }
  0xfb   :  { %1212 = vmatprep.mubr.bf16.mxu1 %v5436_v9 }
  0xfc   :  { %1284 = vmatpush1.bf16.msra.mxu0 %v4708_v6 }
  0xff   :  { %1286 = vmatmul.mubr.bf16.vlgmr.msra.gmra.mrb[32].mxu0 %v5393_v42 }
 0x100   :  { %1295 = vmatprep.mubr.bf16.mxu0 %v5399_v45 }
 0x102   :  { %1213 = vmatmul.mubr.bf16.gmra.mrb[48].mxu1 %v5444_v17 }
 0x103   :  { %1222 = vmatprep.mubr.bf16.mxu1 %v5450_v19 }
 0x107   :  { %1296 = vmatmul.mubr.bf16.gmra.mrb[36].mxu0 %v5406_v51 }
 0x108   :  { %1305 = vmatprep.mubr.bf16.mxu0 %v5411_v53 }
 0x10a   :  { %1223 = vmatmul.mubr.bf16.gmra.mrb[52].mxu1 %v5458_v28 }
 0x10b   :  { %1232 = vmatprep.mubr.bf16.mxu1 %v5464_v30 }
 0x10f   :  { %1306 = vmatmul.mubr.bf16.gmra.mrb[40].mxu0 %v5418_v61 }
 0x110   :  { %1315 = vmatprep.mubr.bf16.mxu0 %v5423_v63 }
 0x112   :  { %1233 = vmatmul.mubr.bf16.gmra.mrb[56].mxu1 %v5472_v37 }
 0x113   :  { %1242 = vmatprep.mubr.bf16.mxu1 %v5478_v44 }
 0x117   :  { %1316 = vmatmul.mubr.bf16.gmra.mrb[44].mxu0 %v5430_v7 }
 0x118   :  { %1325 = vmatprep.mubr.bf16.mxu0 %v5436_v9 }
 0x11a   :  { %1243 = vmatmul.mubr.bf16.gmra.mrb[60].mxu1 %v5486_v50 }
 0x11f   :  { %1326 = vmatmul.mubr.bf16.gmra.mrb[48].mxu0 %v5444_v17 }
 0x120   :  { %1335 = vmatprep.mubr.bf16.mxu0 %v5450_v19 }
 0x127   :  { %1336 = vmatmul.mubr.bf16.gmra.mrb[52].mxu0 %v5458_v28 }
 0x128   :  { %1345 = vmatprep.mubr.bf16.mxu0 %v5464_v30 }
 0x12f   :  { %1346 = vmatmul.mubr.bf16.gmra.mrb[56].mxu0 %v5472_v37 }
 0x130   :  { %1355 = vmatprep.mubr.bf16.mxu0 %v5478_v44 }
 0x137   :  { %1356 = vmatmul.mubr.bf16.gmra.mrb[60].mxu0 %v5486_v50 }
 0x175   :  { %v4044_v36 = vpop.f32.mrb[0].mxu1 }
 0x176   :  { %v4045_v42 = vpop.f32.mrb[1].mxu1 }
 0x177   :  { %v4046_v45 = vadd.f32 %v4045_v42, %v4044_v36  ;;  %v4047_v51 = vpop.f32.mrb[2].mxu1  ;;  %v1402_v36 = vld [vmem:[#allocation13 + $0x20] sm:$0xff] }
 0x178   :  { %v4048_v53 = vpop.f32.mrb[3].mxu1 }
 0x179   :  { %v4049_v61 = vadd.f32 %v4048_v53, %v4047_v51 }
 0x17b   :  { %v5528_v63 = vpack.c.bf16 %v4049_v61, %v4046_v45  ;;  %v5215_v45 = vmov 0   ;;  %v1371_v61 = vld [vmem:[#allocation11 + $0x28] sm:$0xff] }
 0x17c   :  { %4446 = vset.pattern.permute.xlu1 %v5215_v45  ;;  %4445 = vset.pattern.permute.xlu0 %v5215_v45 }
 0x17d   :  { %v4050_v7 = vpop.f32.mrb[4].mxu1  ;;  %4236 = vmatprep.subr.bf16.mxu0 %v5528_v63 }
 0x17e   :  { %v4051_v8 = vpop.f32.mrb[5].mxu1  ;;  %4237 = vmatpush3.bf16.msra.mxu0 %v5528_v63 }
 0x17f   :  { %v4052_v9 = vadd.f32 %v4051_v8, %v4050_v7  ;;  %v4053_v10 = vpop.f32.mrb[6].mxu1 }
 0x180   :  { %v4054_v11 = vpop.f32.mrb[7].mxu1 }
 0x181   :  { %v4055_v12 = vadd.f32 %v4054_v11, %v4053_v10 }
 0x183   :  { %v5532_v13 = vpack.c.bf16 %v4055_v12, %v4052_v9  ;;  %v1403_v9 = vld [vmem:[#allocation13 + $0x28] sm:$0xff] }
 0x185   :  { %v4056_v14 = vpop.f32.mrb[8].mxu1  ;;  %4238 = vmatprep.subr.bf16.mxu0 %v5532_v13 }
 0x186   :  { %v4057_v15 = vpop.f32.mrb[9].mxu1  ;;  %4239 = vmatpush3.bf16.msra.mxu0 %v5532_v13 }
 0x187   :  { %v4058_v16 = vadd.f32 %v4057_v15, %v4056_v14  ;;  %v4059_v17 = vpop.f32.mrb[10].mxu1 }
 0x188   :  { %v4060_v19 = vpop.f32.mrb[11].mxu1 }
 0x189   :  { %v4061_v21 = vadd.f32 %v4060_v19, %v4059_v17 }
 0x18b   :  { %v5536_v27 = vpack.c.bf16 %v4061_v21, %v4058_v16 }
 0x18d   :  { %v4062_v32 = vpop.f32.mrb[12].mxu1  ;;  %4240 = vmatprep.subr.bf16.mxu0 %v5536_v27 }
 0x18e   :  { %v4063_v35 = vpop.f32.mrb[13].mxu1  ;;  %4241 = vmatpush3.bf16.msra.mxu0 %v5536_v27 }
 0x18f   :  { %v4064_v37 = vadd.f32 %v4063_v35, %v4062_v32  ;;  %v4065_v38 = vpop.f32.mrb[14].mxu1 }
 0x190   :  { %v4066_v41 = vpop.f32.mrb[15].mxu1 }
 0x191   :  { %v4067_v44 = vadd.f32 %v4066_v41, %v4065_v38 }
 0x192   :  { %v580_v22 = vpop.f32.mrb[0].mxu0 }
 0x193   :  { %v1382_v24 = vmul.f32 %v1366_v18, %v580_v22  ;;  %v582_v25 = vpop.f32.mrb[1].mxu0  ;;  %v5540_v54 = vpack.c.bf16 %v4067_v44, %v4064_v37 }
 0x194   :  { %v1414_v28 = vmul.f32 %v1398_v20, %v582_v25  ;;  %v584_v29 = vpop.f32.mrb[2].mxu0 }
 0x195   :  { %v1383_v30 = vmul.f32 %v1367_v23, %v584_v29  ;;  %v586_v31 = vpop.f32.mrb[3].mxu0  ;;  %v4068_v60 = vpop.f32.mrb[16].mxu1  ;;  %4242 = vmatprep.subr.bf16.mxu0 %v5540_v54 }
 0x196   :  { %v1430_v33 = vadd.f32 %v1414_v28, %v1382_v24  ;;  %v1415_v34 = vmul.f32 %v1399_v26, %v586_v31  ;;  %v4069_v1 = vpop.f32.mrb[17].mxu1  ;;  %4243 = vmatpush3.bf16.msra.mxu0 %v5540_v54  ;;  %v1372_v24 = vld [vmem:[#allocation11 + $0x30] sm:$0xff]  ;;  %v1373_v31 = vld [vmem:[#allocation11 + $0x38] sm:$0xff] }
 0x197   :  { %v4070_v2 = vadd.f32 %v4069_v1, %v4068_v60  ;;  %v4071_v3 = vpop.f32.mrb[18].mxu1  ;;  %v1404_v26 = vld [vmem:[#allocation13 + $0x30] sm:$0xff]  ;;  %v1375_v60 = vld [vmem:[#allocation11 + $0x48] sm:$0xff] }
 0x198   :  { %v1431_v39 = vadd.f32 %v1415_v34, %v1383_v30  ;;  %v4072_v6 = vpop.f32.mrb[19].mxu1  ;;  %v1405_v34 = vld [vmem:[#allocation13 + $0x38] sm:$0xff]  ;;  %v1407_v1 = vld [vmem:[#allocation13 + $0x48] sm:$0xff] }
 0x199   :  { %v4073_v42 = vadd.f32 %v4072_v6, %v4071_v3 }
 0x19a   :  { %v590_v46 = vpop.f32.mrb[4].mxu0  ;;  %v1446_v47 = vpack.c.bf16 %v1431_v39, %v1430_v33 }
 0x19b   :  { %v1384_v49 = vmul.f32 %v1368_v40, %v590_v46  ;;  %v592_v50 = vpop.f32.mrb[5].mxu0  ;;  %v5547_v10 = vpack.c.bf16 %v4073_v42, %v4070_v2 }
 0x19c   :  { %v1416_v55 = vmul.f32 %v1400_v43, %v592_v50  ;;  %2557 = vrot.lane.b32.xlu0 %v1446_v47, %s5214_s0  ;;  %v594_v56 = vpop.f32.mrb[6].mxu0  ;;  %4412 = vmatprep.subr.msk.bf16.mxu1 %vm1826_vm0, %v1446_v47  ;;  %v1876_v57 = vsel %vm1826_vm0, %v1446_v47, 0 }
 0x19d   :  { %v1385_v58 = vmul.f32 %v1369_v48, %v594_v56  ;;  %v596_v59 = vpop.f32.mrb[7].mxu0  ;;  %4189 = vmatpush3.bf16.xpose.msra.mxu1 %v1876_v57  ;;  %v4074_v17 = vpop.f32.mrb[20].mxu1  ;;  %4244 = vmatprep.subr.bf16.mxu0 %v5547_v10  ;;  %v1406_v56 = vld [vmem:[#allocation13 + $0x40] sm:$0xff] }
 0x19e   :  { %v1432_v62 = vadd.f32 %v1416_v55, %v1384_v49  ;;  %v1417_v0 = vmul.f32 %v1401_v52, %v596_v59  ;;  %v4075_v20 = vpop.f32.mrb[21].mxu1  ;;  %4245 = vmatpush3.bf16.msra.mxu0 %v5547_v10  ;;  %v1374_v52 = vld [vmem:[#allocation11 + $0x40] sm:$0xff] }
 0x19f   :  { %v4076_v21 = vadd.f32 %v4075_v20, %v4074_v17  ;;  %v4077_v22 = vpop.f32.mrb[22].mxu1  ;;  %v1377_v17 = vld [vmem:[#allocation11 + $0x58] sm:$0xff] }
 0x1a0   :  { %v1433_v4 = vadd.f32 %v1417_v0, %v1385_v58  ;;  %v4078_v25 = vpop.f32.mrb[23].mxu1  ;;  %v1409_v20 = vld [vmem:[#allocation13 + $0x58] sm:$0xff] }
 0x1a1   :  { %v4079_v28 = vadd.f32 %v4078_v25, %v4077_v22 }
 0x1a2   :  { %v600_v51 = vpop.f32.mrb[8].mxu0  ;;  %v1447_v53 = vpack.c.bf16 %v1433_v4, %v1432_v62 }
 0x1a3   :  { %v1386_v7 = vmul.f32 %v1370_v5, %v600_v51  ;;  %v602_v8 = vpop.f32.mrb[9].mxu0  ;;  %v5554_v35 = vpack.c.bf16 %v4079_v28, %v4076_v21 }
 0x1a4   :  { %v1418_v11 = vmul.f32 %v1402_v36, %v602_v8  ;;  %2559 = vrot.lane.b32.xlu0 %v1447_v53, %s5214_s0  ;;  %v604_v12 = vpop.f32.mrb[10].mxu0  ;;  %4413 = vmatprep.subr.msk.bf16.mxu1 %vm1826_vm0, %v1447_v53  ;;  %v1879_v14 = vsel %vm1826_vm0, %v1447_v53, 0 }
 0x1a5   :  { %v1387_v15 = vmul.f32 %v1371_v61, %v604_v12  ;;  %v606_v16 = vpop.f32.mrb[11].mxu0  ;;  %4191 = vmatpush3.bf16.xpose.msra.mxu1 %v1879_v14  ;;  %v4080_v43 = vpop.f32.mrb[24].mxu1  ;;  %4246 = vmatprep.subr.bf16.mxu0 %v5554_v35  ;;  %v1408_v12 = vld [vmem:[#allocation13 + $0x50] sm:$0xff] }
 0x1a6   :  { %v1434_v18 = vadd.f32 %v1418_v11, %v1386_v7  ;;  %v1419_v19 = vmul.f32 %v1403_v9, %v606_v16  ;;  %v4081_v47 = vpop.f32.mrb[25].mxu1  ;;  %4247 = vmatpush3.bf16.msra.mxu0 %v5554_v35  ;;  %v1376_v9 = vld [vmem:[#allocation11 + $0x50] sm:$0xff] }
 0x1a7   :  { %v4082_v48 = vadd.f32 %v4081_v47, %v4080_v43  ;;  %v4083_v49 = vpop.f32.mrb[26].mxu1 }
 0x1a8   :  { %v1435_v23 = vadd.f32 %v1419_v19, %v1387_v15  ;;  %v4084_v55 = vpop.f32.mrb[27].mxu1 }
 0x1a9   :  { %v4085_v57 = vadd.f32 %v4084_v55, %v4083_v49 }
 0x1aa   :  { %v610_v29 = vpop.f32.mrb[12].mxu0  ;;  %v1448_v30 = vpack.c.bf16 %v1435_v23, %v1434_v18 }
 0x1ab   :  { %v1388_v32 = vmul.f32 %v1372_v24, %v610_v29  ;;  %v612_v33 = vpop.f32.mrb[13].mxu0  ;;  %v5561_v2 = vpack.c.bf16 %v4085_v57, %v4082_v48 }
 0x1ac   :  { %v1420_v37 = vmul.f32 %v1404_v26, %v612_v33  ;;  %2561 = vrot.lane.b32.xlu1 %v1448_v30, %s5214_s0  ;;  %v614_v38 = vpop.f32.mrb[14].mxu0  ;;  %4414 = vmatprep.subr.msk.bf16.mxu1 %vm1826_vm0, %v1448_v30  ;;  %v1882_v39 = vsel %vm1826_vm0, %v1448_v30, 0 }
 0x1ad   :  { %v1389_v40 = vmul.f32 %v1373_v31, %v614_v38  ;;  %v616_v41 = vpop.f32.mrb[15].mxu0  ;;  %4193 = vmatpush3.bf16.xpose.msra.mxu1 %v1882_v39  ;;  %v4086_v42 = vpop.f32.mrb[28].mxu1  ;;  %4248 = vmatprep.subr.bf16.mxu0 %v5561_v2  ;;  %v1410_v38 = vld [vmem:[#allocation13 + $0x60] sm:$0xff] }
 0x1ae   :  { %v1436_v44 = vadd.f32 %v1420_v37, %v1388_v32  ;;  %v1421_v46 = vmul.f32 %v1405_v34, %v616_v41  ;;  %v4087_v53 = vpop.f32.mrb[29].mxu1  ;;  %4249 = vmatpush3.bf16.msra.mxu0 %v5561_v2  ;;  %v1378_v34 = vld [vmem:[#allocation11 + $0x60] sm:$0xff]  ;;  %v1379_v41 = vld [vmem:[#allocation11 + $0x68] sm:$0xff] }
 0x1af   :  { %v4088_v61 = vadd.f32 %v4087_v53, %v4086_v42  ;;  %v4089_v7 = vpop.f32.mrb[30].mxu1  ;;  %v1413_v42 = vld [vmem:[#allocation13 + $0x78] sm:$0xff] }
 0x1b0   :  { %v1437_v50 = vadd.f32 %v1421_v46, %v1389_v40  ;;  %v4090_v11 = vpop.f32.mrb[31].mxu1  ;;  %v1411_v46 = vld [vmem:[#allocation13 + $0x68] sm:$0xff] }
 0x1b1   :  { %v4091_v14 = vadd.f32 %v4090_v11, %v4089_v7 }
 0x1b2   :  { %v620_v58 = vpop.f32.mrb[16].mxu0  ;;  %v1449_v59 = vpack.c.bf16 %v1437_v50, %v1436_v44 }
 0x1b3   :  { %v1390_v62 = vmul.f32 %v1374_v52, %v620_v58  ;;  %v622_v0 = vpop.f32.mrb[17].mxu0  ;;  %v5570_v21 = vpack.c.bf16 %v4091_v14, %v4088_v61 }
 0x1b4   :  { %v1422_v3 = vmul.f32 %v1406_v56, %v622_v0  ;;  %2563 = vrot.lane.b32.xlu1 %v1449_v59, %s5214_s0  ;;  %v624_v4 = vpop.f32.mrb[18].mxu0  ;;  %4415 = vmatprep.subr.msk.bf16.mxu1 %vm1826_vm0, %v1449_v59  ;;  %v1885_v5 = vsel %vm1826_vm0, %v1449_v59, 0 }
 0x1b5   :  { %v1391_v6 = vmul.f32 %v1375_v60, %v624_v4  ;;  %v626_v36 = vpop.f32.mrb[19].mxu0  ;;  %4195 = vmatpush3.bf16.xpose.msra.mxu1 %v1885_v5  ;;  %4250 = vmatprep.subr.bf16.mxu0 %v5570_v21  ;;  %v1174_v28 = vpop.f32.mrb[32].mxu1  ;;  %v1381_v5 = vld [vmem:[#allocation11 + $0x78] sm:$0xff] }
 0x1b6   :  { %v1438_v45 = vadd.f32 %v1422_v3, %v1390_v62  ;;  %v1423_v51 = vmul.f32 %v1407_v1, %v626_v36  ;;  %4251 = vmatpush3.bf16.msra.mxu0 %v5570_v21  ;;  %v1176_v31 = vpop.f32.mrb[33].mxu1  ;;  %v1380_v62 = vld [vmem:[#allocation11 + $0x70] sm:$0xff] }
 0x1b7   :  { %v5578_v32 = vpop.f32.mrb[34].mxu1  ;;  %v1412_v1 = vld [vmem:[#allocation13 + $0x70] sm:$0xff] }
 0x1b8   :  { %v1439_v8 = vadd.f32 %v1423_v51, %v1391_v6  ;;  %v5580_v37 = vpop.f32.mrb[35].mxu1 }
 0x1ba   :  { %v5568_v15 = vpack.c.bf16 %v1439_v8, %v1438_v45  ;;  %v630_v16 = vpop.f32.mrb[20].mxu0 }
 0x1bb   :  { %v1392_v18 = vmul.f32 %v1376_v9, %v630_v16  ;;  %v632_v19 = vpop.f32.mrb[21].mxu0  ;;  %v1463_v16 = vld [vmem:[#allocation8 + $0x8] sm:$0xff] }
 0x1bc   :  { %v1424_v22 = vmul.f32 %v1408_v12, %v632_v19  ;;  %v634_v23 = vpop.f32.mrb[22].mxu0  ;;  %4416 = vmatprep.subr.msk.bf16.mxu1 %vm1826_vm0, %v5568_v15  ;;  %v1888_v24 = vsel %vm1826_vm0, %v5568_v15, 0  ;;  %v1462_v12 = vld [vmem:[#allocation8] sm:$0xff] }
 0x1bd   :  { %v1393_v25 = vmul.f32 %v1377_v17, %v634_v23  ;;  %v636_v26 = vpop.f32.mrb[23].mxu0  ;;  %4197 = vmatpush3.bf16.xpose.msra.mxu1 %v1888_v24  ;;  %v5588_v55 = vpop.f32.mrb[36].mxu1  ;;  %v1526_v19 = vld [vmem:[#allocation10] sm:$0xff]  ;;  %v1527_v23 = vld [vmem:[#allocation10 + $0x8] sm:$0xff] }
 0x1be   :  { %v1440_v29 = vadd.f32 %v1424_v22, %v1392_v18  ;;  %v1425_v30 = vmul.f32 %v1409_v20, %v636_v26  ;;  %v5590_v58 = vpop.f32.mrb[37].mxu1  ;;  %v1494_v22 = vmul.f32 %v1462_v12, %v1174_v28  ;;  %v1464_v26 = vld [vmem:[#allocation8 + $0x10] sm:$0xff]  ;;  %v1533_v12 = vld [vmem:[#allocation10 + $0x38] sm:$0xff] }
 0x1bf   :  { %v5592_v59 = vpop.f32.mrb[38].mxu1  ;;  %v1496_v28 = vmul.f32 %v1464_v26, %v5578_v32 }
 0x1c0   :  { %v1441_v33 = vadd.f32 %v1425_v30, %v1393_v25  ;;  %v5594_v0 = vpop.f32.mrb[39].mxu1  ;;  %v1495_v25 = vmul.f32 %v1463_v16, %v1176_v31  ;;  %v1528_v30 = vld [vmem:[#allocation10 + $0x10] sm:$0xff] }
 0x1c2   :  { %v5582_v39 = vpack.c.bf16 %v1441_v33, %v1440_v29  ;;  %v640_v40 = vpop.f32.mrb[24].mxu0 }
 0x1c3   :  { %v1394_v43 = vmul.f32 %v1378_v34, %v640_v40  ;;  %v642_v44 = vpop.f32.mrb[25].mxu0  ;;  %v1465_v34 = vld [vmem:[#allocation8 + $0x18] sm:$0xff] }
 0x1c4   :  { %v1426_v47 = vmul.f32 %v1410_v38, %v642_v44  ;;  %v644_v48 = vpop.f32.mrb[26].mxu0  ;;  %4417 = vmatprep.subr.msk.bf16.mxu1 %vm1826_vm0, %v5582_v39  ;;  %v1891_v49 = vsel %vm1826_vm0, %v5582_v39, 0  ;;  %v1529_v40 = vld [vmem:[#allocation10 + $0x18] sm:$0xff] }
 0x1c5   :  { %v1395_v50 = vmul.f32 %v1379_v41, %v644_v48  ;;  %v646_v52 = vpop.f32.mrb[27].mxu0  ;;  %4199 = vmatpush3.bf16.xpose.msra.mxu1 %v1891_v49  ;;  %v5602_v8 = vpop.f32.mrb[40].mxu1  ;;  %v1497_v49 = vmul.f32 %v1465_v34, %v5580_v37  ;;  %v1468_v37 = vld [vmem:[#allocation8 + $0x30] sm:$0xff] }
 0x1c6   :  { %v1442_v56 = vadd.f32 %v1426_v47, %v1394_v43  ;;  %v1427_v57 = vmul.f32 %v1411_v46, %v646_v52  ;;  %v5604_v14 = vpop.f32.mrb[41].mxu1 }
 0x1c7   :  { %v5606_v17 = vpop.f32.mrb[42].mxu1 }
 0x1c8   :  { %v1443_v60 = vadd.f32 %v1427_v57, %v1395_v50  ;;  %v5608_v20 = vpop.f32.mrb[43].mxu1 }
 0x1ca   :  { %v5596_v3 = vpack.c.bf16 %v1443_v60, %v1442_v56  ;;  %v650_v4 = vpop.f32.mrb[28].mxu0  ;;  %v1466_v56 = vld [vmem:[#allocation8 + $0x20] sm:$0xff] }
 0x1cb   :  { %v1396_v6 = vmul.f32 %v1380_v62, %v650_v4  ;;  %v652_v36 = vpop.f32.mrb[29].mxu0  ;;  %v1467_v62 = vld [vmem:[#allocation8 + $0x28] sm:$0xff] }
 0x1cc   :  { %v1428_v45 = vmul.f32 %v1412_v1, %v652_v36  ;;  %v654_v51 = vpop.f32.mrb[30].mxu0  ;;  %4418 = vmatprep.subr.msk.bf16.mxu1 %vm1826_vm0, %v5596_v3  ;;  %v1894_v53 = vsel %vm1826_vm0, %v5596_v3, 0 }
 0x1cd   :  { %v1397_v61 = vmul.f32 %v1381_v5, %v654_v51  ;;  %v656_v7 = vpop.f32.mrb[31].mxu0  ;;  %4201 = vmatpush3.bf16.xpose.msra.mxu1 %v1894_v53  ;;  %v5617_v48 = vpop.f32.mrb[44].mxu1  ;;  %v1530_v5 = vld [vmem:[#allocation10 + $0x20] sm:$0xff]  ;;  %v1532_v53 = vld [vmem:[#allocation10 + $0x30] sm:$0xff] }
 0x1ce   :  { %v1444_v9 = vadd.f32 %v1428_v45, %v1396_v6  ;;  %v1429_v11 = vmul.f32 %v1413_v42, %v656_v7  ;;  %v5620_v57 = vpop.f32.mrb[45].mxu1  ;;  %v1498_v6 = vmul.f32 %v1466_v56, %v5588_v55  ;;  %v1531_v42 = vld [vmem:[#allocation10 + $0x28] sm:$0xff]  ;;  %v1499_v45 = vmul.f32 %v1467_v62, %v5590_v58 }
 0x1cf   :  { %v5622_v1 = vpop.f32.mrb[46].mxu1  ;;  %v1500_v55 = vmul.f32 %v1468_v37, %v5592_v59 }
 0x1d0   :  { %v1445_v18 = vadd.f32 %v1429_v11, %v1397_v61  ;;  %v5624_v32 = vpop.f32.mrb[47].mxu1 }
 0x1d2   :  { %v5610_v24 = vpack.c.bf16 %v1445_v18, %v1444_v9  ;;  %v1287_v29 = vpop.f32.mrb[32].mxu0  ;;  %v1469_v9 = vld [vmem:[#allocation8 + $0x38] sm:$0xff] }
 0x1d3   :  { %v1558_v33 = vmul.f32 %v1526_v19, %v1287_v29  ;;  %v1289_v38 = vpop.f32.mrb[33].mxu0 }
 0x1d4   :  { %v1559_v41 = vmul.f32 %v1527_v23, %v1289_v38  ;;  %v1291_v43 = vpop.f32.mrb[34].mxu0  ;;  %4419 = vmatprep.subr.msk.bf16.mxu1 %vm1826_vm0, %v5610_v24  ;;  %v1897_v44 = vsel %vm1826_vm0, %v5610_v24, 0  ;;  %v1471_v38 = vld [vmem:[#allocation8 + $0x48] sm:$0xff] }
 0x1d5   :  { %v1590_v46 = vadd.f32 %v1558_v33, %v1494_v22  ;;  %v1560_v47 = vmul.f32 %v1528_v30, %v1291_v43  ;;  %v1293_v31 = vpop.f32.mrb[35].mxu0  ;;  %4203 = vmatpush3.bf16.xpose.msra.mxu1 %v1897_v44  ;;  %v5633_v23 = vpop.f32.mrb[48].mxu1  ;;  %v1470_v30 = vld [vmem:[#allocation8 + $0x40] sm:$0xff] }
 0x1d6   :  { %v1591_v50 = vadd.f32 %v1559_v41, %v1495_v25  ;;  %v1561_v52 = vmul.f32 %v1529_v40, %v1293_v31  ;;  %v1501_v25 = vmul.f32 %v1469_v9, %v5594_v0  ;;  %v5636_v33 = vpop.f32.mrb[49].mxu1  ;;  %v1534_v41 = vld [vmem:[#allocation10 + $0x40] sm:$0xff]  ;;  %v1502_v44 = vmul.f32 %v1470_v30, %v5602_v8  ;;  %v1535_v0 = vld [vmem:[#allocation10 + $0x48] sm:$0xff]  ;;  %v1477_v30 = vld [vmem:[#allocation8 + $0x78] sm:$0xff] }
 0x1d7   :  { %v1592_v60 = vadd.f32 %v1560_v47, %v1496_v28  ;;  %v5640_v40 = vpop.f32.mrb[50].mxu1  ;;  %v1472_v47 = vld [vmem:[#allocation8 + $0x50] sm:$0xff]  ;;  %v1475_v9 = vld [vmem:[#allocation8 + $0x68] sm:$0xff] }
 0x1d8   :  { %v1593_v4 = vadd.f32 %v1561_v52, %v1497_v49  ;;  %v5642_v43 = vpop.f32.mrb[51].mxu1  ;;  %v1536_v49 = vld [vmem:[#allocation10 + $0x50] sm:$0xff]  ;;  %v1504_v8 = vmul.f32 %v1472_v47, %v5606_v17 }
 0x1d9   :  { %v1622_v36 = vpack.c.bf16 %v1592_v60, %v1590_v46  ;;  %v1503_v46 = vmul.f32 %v1471_v38, %v5604_v14  ;;  %v1537_v60 = vld [vmem:[#allocation10 + $0x58] sm:$0xff] }
 0x1da   :  { %v1297_v51 = vpop.f32.mrb[36].mxu0  ;;  %v5628_v61 = vpack.c.bf16 %v1593_v4, %v1591_v50  ;;  %v1541_v38 = vld [vmem:[#allocation10 + $0x78] sm:$0xff] }
 0x1db   :  { %v1562_v7 = vmul.f32 %v1530_v5, %v1297_v51  ;;  %1810 = vrot.lane.b32.xlu0 %v1622_v36, %s5214_s0  ;;  %v1299_v11 = vpop.f32.mrb[37].mxu0  ;;  %4204 = vmatprep.mubr.msk.bf16.mxu1 %vm1826_vm0, %v1622_v36  ;;  %v1474_v51 = vld [vmem:[#allocation8 + $0x60] sm:$0xff] }
 0x1dc   :  { %v1563_v16 = vmul.f32 %v1531_v42, %v1299_v11  ;;  %v1301_v18 = vpop.f32.mrb[38].mxu0  ;;  %v1506_v17 = vmul.f32 %v1474_v51, %v5617_v48 }
 0x1dd   :  { %v1594_v19 = vadd.f32 %v1562_v7, %v1498_v6  ;;  %v1564_v22 = vmul.f32 %v1532_v53, %v1301_v18  ;;  %v1303_v58 = vpop.f32.mrb[39].mxu0  ;;  %v5651_v36 = vpop.f32.mrb[52].mxu1 }
 0x1de   :  { %v1595_v26 = vadd.f32 %v1563_v16, %v1499_v45  ;;  %v1565_v29 = vmul.f32 %v1533_v12, %v1303_v58  ;;  %v5654_v53 = vpop.f32.mrb[53].mxu1  ;;  %v1538_v16 = vld [vmem:[#allocation10 + $0x60] sm:$0xff] }
 0x1df   :  { %v1596_v34 = vadd.f32 %v1564_v22, %v1500_v55  ;;  %2565 = vrot.lane.b32.xlu0 %v5568_v15, %s5214_s0  ;;  %v1473_v15 = vld [vmem:[#allocation8 + $0x58] sm:$0xff]  ;;  %v5656_v11 = vpop.f32.mrb[54].mxu1  ;;  %v1507_v22 = vmul.f32 %v1475_v9, %v5620_v57 }
 0x1e0   :  { %v1597_v59 = vadd.f32 %v1565_v29, %v1501_v25  ;;  %v1505_v42 = vmul.f32 %v1473_v15, %v5608_v20  ;;  %v5658_v18 = vpop.f32.mrb[55].mxu1  ;;  %v1476_v20 = vld [vmem:[#allocation8 + $0x70] sm:$0xff]  ;;  %v1545_v9 = vld [vmem:[#allocation10 + $0x98] sm:$0xff] }
 0x1e1   :  { %v1624_v28 = vpack.c.bf16 %v1596_v34, %v1594_v19  ;;  %v1539_v19 = vld [vmem:[#allocation10 + $0x68] sm:$0xff]  ;;  %v1540_v25 = vld [vmem:[#allocation10 + $0x70] sm:$0xff]  ;;  %v1508_v48 = vmul.f32 %v1476_v20, %v5622_v1 }
 0x1e2   :  { %v1307_v31 = vpop.f32.mrb[40].mxu0  ;;  %v5646_v50 = vpack.c.bf16 %v1597_v59, %v1595_v26 }
 0x1e3   :  { %v1566_v52 = vmul.f32 %v1534_v41, %v1307_v31  ;;  %1812 = vrot.lane.b32.xlu1 %v1624_v28, %s5214_s0  ;;  %v1309_v56 = vpop.f32.mrb[41].mxu0  ;;  %4205 = vmatmul.mubr.msk.bf16.vlgmr.msra.gmra.mrb[64].mxu1 %vm1826_vm0, %v1624_v28 }
 0x1e4   :  { %v1567_v62 = vmul.f32 %v1535_v0, %v1309_v56  ;;  %v1311_v4 = vpop.f32.mrb[42].mxu0  ;;  %v1479_v56 = vld [vmem:[#allocation8 + $0x88] sm:$0xff] }
 0x1e5   :  { %v1598_v5 = vadd.f32 %v1566_v52, %v1502_v44  ;;  %v1568_v6 = vmul.f32 %v1536_v49, %v1311_v4  ;;  %v1313_v14 = vpop.f32.mrb[43].mxu0  ;;  %v5667_v0 = vpop.f32.mrb[56].mxu1  ;;  %v1478_v49 = vld [vmem:[#allocation8 + $0x80] sm:$0xff] }
 0x1e6   :  { %v1599_v45 = vadd.f32 %v1567_v62, %v1503_v46  ;;  %v1569_v37 = vmul.f32 %v1537_v60, %v1313_v14  ;;  %v1509_v46 = vmul.f32 %v1477_v30, %v5624_v32  ;;  %v5670_v52 = vpop.f32.mrb[57].mxu1  ;;  %v1542_v62 = vld [vmem:[#allocation10 + $0x80] sm:$0xff]  ;;  %v1543_v32 = vld [vmem:[#allocation10 + $0x88] sm:$0xff]  ;;  %v1480_v14 = vld [vmem:[#allocation8 + $0x90] sm:$0xff] }
 0x1e7   :  { %v1600_v7 = vadd.f32 %v1568_v6, %v1504_v8  ;;  %v5674_v60 = vpop.f32.mrb[58].mxu1  ;;  %v1510_v8 = vmul.f32 %v1478_v49, %v5633_v23  ;;  %v1511_v6 = vmul.f32 %v1479_v56, %v5636_v33  ;;  %v1512_v23 = vmul.f32 %v1480_v14, %v5640_v40 }
 0x1e8   :  { %v1601_v12 = vadd.f32 %v1569_v37, %v1505_v42  ;;  %v5676_v4 = vpop.f32.mrb[59].mxu1 }
 0x1e9   :  { %v1626_v55 = vpack.c.bf16 %v1600_v7, %v1598_v5 }
 0x1ea   :  { %v1317_v58 = vpop.f32.mrb[44].mxu0  ;;  %v5662_v26 = vpack.c.bf16 %v1601_v12, %v1599_v45  ;;  %v1544_v45 = vld [vmem:[#allocation10 + $0x90] sm:$0xff] }
 0x1eb   :  { %v1570_v29 = vmul.f32 %v1538_v16, %v1317_v58  ;;  %1814 = vrot.lane.b32.xlu1 %v1626_v55, %s5214_s0  ;;  %v1319_v34 = vpop.f32.mrb[45].mxu0  ;;  %4208 = vmatprep.mubr.msk.bf16.mxu1 %vm1826_vm0, %v1626_v55 }
 0x1ec   :  { %v1571_v59 = vmul.f32 %v1539_v19, %v1319_v34  ;;  %v1321_v41 = vpop.f32.mrb[46].mxu0  ;;  %v1483_v34 = vld [vmem:[#allocation8 + $0xa8] sm:$0xff] }
 0x1ed   :  { %v1602_v44 = vadd.f32 %v1570_v29, %v1506_v17  ;;  %v1572_v28 = vmul.f32 %v1540_v25, %v1321_v41  ;;  %v1323_v57 = vpop.f32.mrb[47].mxu0  ;;  %v5685_v19 = vpop.f32.mrb[60].mxu1  ;;  %v1482_v25 = vld [vmem:[#allocation8 + $0xa0] sm:$0xff] }
 0x1ee   :  { %v1603_v47 = vadd.f32 %v1571_v59, %v1507_v22  ;;  %v1573_v31 = vmul.f32 %v1541_v38, %v1323_v57  ;;  %v5688_v29 = vpop.f32.mrb[61].mxu1  ;;  %v1546_v41 = vld [vmem:[#allocation10 + $0xa0] sm:$0xff]  ;;  %v1514_v40 = vmul.f32 %v1482_v25, %v5651_v36  ;;  %v1515_v57 = vmul.f32 %v1483_v34, %v5654_v53 }
 0x1ef   :  { %v1604_v15 = vadd.f32 %v1572_v28, %v1508_v48  ;;  %2567 = vrot.lane.b32.xlu1 %v5582_v39, %s5214_s0  ;;  %v1481_v39 = vld [vmem:[#allocation8 + $0x98] sm:$0xff]  ;;  %v5690_v38 = vpop.f32.mrb[62].mxu1  ;;  %v1547_v28 = vld [vmem:[#allocation10 + $0xa8] sm:$0xff] }
 0x1f0   :  { %v1605_v1 = vadd.f32 %v1573_v31, %v1509_v46  ;;  %v1513_v22 = vmul.f32 %v1481_v39, %v5642_v43  ;;  %v5692_v48 = vpop.f32.mrb[63].mxu1  ;;  %v1484_v43 = vld [vmem:[#allocation8 + $0xb0] sm:$0xff]  ;;  %v1487_v39 = vld [vmem:[#allocation8 + $0xc8] sm:$0xff] }
 0x1f1   :  { %v1628_v5 = vpack.c.bf16 %v1604_v15, %v1602_v44  ;;  %v1485_v15 = vld [vmem:[#allocation8 + $0xb8] sm:$0xff]  ;;  %v1516_v36 = vmul.f32 %v1484_v43, %v5656_v11  ;;  %v1519_v11 = vmul.f32 %v1487_v39, %v5670_v52  ;;  %v1491_v43 = vld [vmem:[#allocation8 + $0xe8] sm:$0xff] }
 0x1f2   :  { %v1327_v42 = vpop.f32.mrb[48].mxu0  ;;  %v5680_v37 = vpack.c.bf16 %v1605_v1, %v1603_v47  ;;  %v1548_v47 = vld [vmem:[#allocation10 + $0xb0] sm:$0xff]  ;;  %v1549_v1 = vld [vmem:[#allocation10 + $0xb8] sm:$0xff] }
 0x1f3   :  { %v1574_v51 = vmul.f32 %v1542_v62, %v1327_v42  ;;  %1816 = vrot.lane.b32.xlu0 %v1628_v5, %s5214_s0  ;;  %v1329_v7 = vpop.f32.mrb[49].mxu0  ;;  %4209 = vmatmul.mubr.msk.bf16.gmra.mrb[68].mxu1 %vm1826_vm0, %v1628_v5 }
 0x1f4   :  { %v1575_v12 = vmul.f32 %v1543_v32, %v1329_v7  ;;  %v1331_v16 = vpop.f32.mrb[50].mxu0 }
 0x1f5   :  { %v1606_v17 = vadd.f32 %v1574_v51, %v1510_v8  ;;  %v1576_v55 = vmul.f32 %v1544_v45, %v1331_v16  ;;  %v1333_v33 = vpop.f32.mrb[51].mxu0  ;;  %v1486_v45 = vld [vmem:[#allocation8 + $0xc0] sm:$0xff] }
 0x1f6   :  { %v1607_v20 = vadd.f32 %v1575_v12, %v1511_v6  ;;  %v1577_v58 = vmul.f32 %v1545_v9, %v1333_v33  ;;  %v1517_v6 = vmul.f32 %v1485_v15, %v5658_v18  ;;  %v1550_v9 = vld [vmem:[#allocation10 + $0xc0] sm:$0xff]  ;;  %v1518_v12 = vmul.f32 %v1486_v45, %v5667_v0  ;;  %v1552_v33 = vld [vmem:[#allocation10 + $0xd0] sm:$0xff] }
 0x1f7   :  { %v1608_v30 = vadd.f32 %v1576_v55, %v1512_v23  ;;  %v1551_v23 = vld [vmem:[#allocation10 + $0xc8] sm:$0xff] }
 0x1f8   :  { %v1609_v59 = vadd.f32 %v1577_v58, %v1513_v22 }
 0x1f9   :  { %v1630_v44 = vpack.c.bf16 %v1608_v30, %v1606_v17  ;;  %v1488_v17 = vld [vmem:[#allocation8 + $0xd0] sm:$0xff] }
 0x1fa   :  { %v1337_v46 = vpop.f32.mrb[52].mxu0  ;;  %v5696_v31 = vpack.c.bf16 %v1609_v59, %v1607_v20  ;;  %v1489_v20 = vld [vmem:[#allocation8 + $0xd8] sm:$0xff]  ;;  %v1520_v0 = vmul.f32 %v1488_v17, %v5674_v60 }
 0x1fb   :  { %v1578_v49 = vmul.f32 %v1546_v41, %v1337_v46  ;;  %1818 = vrot.lane.b32.xlu0 %v1630_v44, %s5214_s0  ;;  %v1339_v56 = vpop.f32.mrb[53].mxu0  ;;  %4212 = vmatprep.mubr.msk.bf16.mxu1 %vm1826_vm0, %v1630_v44  ;;  %v1521_v41 = vmul.f32 %v1489_v20, %v5676_v4  ;;  %v1493_v4 = vld [vmem:[#allocation8 + $0xf8] sm:$0xff]  ;;  %v1690_v20 = vld [vmem:[%s6708_s8] sm:$0xff] }
 0x1fc   :  { %v1579_v62 = vmul.f32 %v1547_v28, %v1339_v56  ;;  %v1341_v8 = vpop.f32.mrb[54].mxu0  ;;  %v1490_v28 = vld [vmem:[#allocation8 + $0xe0] sm:$0xff]  ;;  %v1555_v56 = vld [vmem:[#allocation10 + $0xe8] sm:$0xff] }
 0x1fd   :  { %v1610_v5 = vadd.f32 %v1578_v49, %v1514_v40  ;;  %v1580_v32 = vmul.f32 %v1548_v47, %v1341_v8  ;;  %v1343_v53 = vpop.f32.mrb[55].mxu0  ;;  %v1554_v47 = vld [vmem:[#allocation10 + $0xe0] sm:$0xff]  ;;  %v1522_v49 = vmul.f32 %v1490_v28, %v5685_v19  ;;  %v1556_v8 = vld [vmem:[#allocation10 + $0xf0] sm:$0xff]  ;;  %v1701_v28 = vld [vmem:[%s6708_s8 + $0x58] sm:$0xff] }
 0x1fe   :  { %v1611_v14 = vadd.f32 %v1579_v62, %v1515_v57  ;;  %v1581_v42 = vmul.f32 %v1549_v1, %v1343_v53  ;;  %v1523_v1 = vmul.f32 %v1491_v43, %v5688_v29  ;;  %v1492_v62 = vld [vmem:[#allocation8 + $0xf0] sm:$0xff]  ;;  %v1557_v53 = vld [vmem:[#allocation10 + $0xf8] sm:$0xff]  ;;  %v1703_v43 = vld [vmem:[%s6708_s8 + $0x68] sm:$0xff] }
 0x1ff   :  { %v1612_v51 = vadd.f32 %v1580_v32, %v1516_v36  ;;  %2569 = vrot.lane.b32.xlu0 %v5596_v3, %s5214_s0  ;;  %v1553_v3 = vld [vmem:[#allocation10 + $0xd8] sm:$0xff]  ;;  %v1524_v19 = vmul.f32 %v1492_v62, %v5690_v38 }
 0x200   :  { %v1613_v7 = vadd.f32 %v1581_v42, %v1517_v6 }
 0x201   :  { %v1632_v16 = vpack.c.bf16 %v1612_v51, %v1610_v5  ;;  %v1525_v51 = vmul.f32 %v1493_v4, %v5692_v48 }
 0x202   :  { %v1347_v55 = vpop.f32.mrb[56].mxu0  ;;  %v5706_v18 = vpack.c.bf16 %v1613_v7, %v1611_v14 }
 0x203   :  { %v1582_v22 = vmul.f32 %v1550_v9, %v1347_v55  ;;  %1820 = vrot.lane.b32.xlu1 %v1632_v16, %s5214_s0  ;;  %v1349_v58 = vpop.f32.mrb[57].mxu0  ;;  %4213 = vmatmul.mubr.msk.bf16.gmra.mrb[72].mxu1 %vm1826_vm0, %v1632_v16 }
 0x204   :  { %v1583_v25 = vmul.f32 %v1551_v23, %v1349_v58  ;;  %v1351_v30 = vpop.f32.mrb[58].mxu0 }
 0x205   :  { %v1614_v34 = vadd.f32 %v1582_v22, %v1518_v12  ;;  %v1584_v59 = vmul.f32 %v1552_v33, %v1351_v30  ;;  %v1353_v52 = vpop.f32.mrb[59].mxu0  ;;  %v1691_v33 = vld [vmem:[%s6708_s8 + $0x8] sm:$0xff]  ;;  %v1692_v22 = vld [vmem:[%s6708_s8 + $0x10] sm:$0xff]  ;;  %v1693_v30 = vld [vmem:[%s6708_s8 + $0x18] sm:$0xff] }
 0x206   :  { %v1615_v40 = vadd.f32 %v1583_v25, %v1519_v11  ;;  %v1585_v44 = vmul.f32 %v1553_v3, %v1353_v52  ;;  %v1694_v25 = vld [vmem:[%s6708_s8 + $0x20] sm:$0xff]  ;;  %v1697_v52 = vld [vmem:[%s6708_s8 + $0x38] sm:$0xff] }
 0x207   :  { %v1616_v57 = vadd.f32 %v1584_v59, %v1520_v0  ;;  %v1696_v0 = vld [vmem:[%s6708_s8 + $0x30] sm:$0xff]  ;;  %v1698_v59 = vld [vmem:[%s6708_s8 + $0x40] sm:$0xff] }
 0x208   :  { %v1617_v46 = vadd.f32 %v1585_v44, %v1521_v41  ;;  %v1700_v41 = vld [vmem:[%s6708_s8 + $0x50] sm:$0xff]  ;;  %v1702_v44 = vld [vmem:[%s6708_s8 + $0x60] sm:$0xff] }
 0x209   :  { %v1634_v15 = vpack.c.bf16 %v1616_v57, %v1614_v34  ;;  %v1695_v34 = vld [vmem:[%s6708_s8 + $0x28] sm:$0xff]  ;;  %v1704_v57 = vld [vmem:[%s6708_s8 + $0x70] sm:$0xff] }
 0x20a   :  { %v1357_v60 = vpop.f32.mrb[60].mxu0  ;;  %v5714_v36 = vpack.c.bf16 %v1617_v46, %v1615_v40  ;;  %v1699_v40 = vld [vmem:[%s6708_s8 + $0x48] sm:$0xff]  ;;  %v1705_v46 = vld [vmem:[%s6708_s8 + $0x78] sm:$0xff]  ;;  %s5217_s8 = smov [#allocation14]  }
 0x20b   :  { %v1586_v5 = vmul.f32 %v1554_v47, %v1357_v60  ;;  %1822 = vrot.lane.b32.xlu1 %v1634_v15, %s5214_s0  ;;  %v1359_v32 = vpop.f32.mrb[61].mxu0  ;;  %4216 = vmatprep.mubr.msk.bf16.mxu1 %vm1826_vm0, %v1634_v15 }
 0x20c   :  { %v1587_v6 = vmul.f32 %v1555_v56, %v1359_v32  ;;  %v1361_v14 = vpop.f32.mrb[62].mxu0 }
 0x20d   :  { %v1618_v42 = vadd.f32 %v1586_v5, %v1522_v49  ;;  %v1588_v45 = vmul.f32 %v1556_v8, %v1361_v14  ;;  %v1363_v29 = vpop.f32.mrb[63].mxu0 }
 0x20e   :  { %v1619_v39 = vadd.f32 %v1587_v6, %v1523_v1  ;;  %v1589_v7 = vmul.f32 %v1557_v53, %v1363_v29  ;;  %v2558_v9 = vpop.permute.xlu0 %2557 }
 0x20f   :  { %v1620_v12 = vadd.f32 %v1588_v45, %v1524_v19  ;;  %4420 = vmatprep.subr.msk.bf16.mxu1 %vm1826_vm0, %v2558_v9  ;;  %2571 = vrot.lane.b32.xlu1 %v5610_v24, %s5214_s0  ;;  %v2622_v16 = vsel %vm1826_vm0, %v2558_v9, 0 }
 0x210   :  { %v1621_v23 = vadd.f32 %v1589_v7, %v1525_v51  ;;  %4285 = vmatpush3.bf16.xpose.msra.mxu1 %v2622_v16 }
 0x211   :  { %v1636_v11 = vpack.c.bf16 %v1620_v12, %v1618_v42  ;;  %v5216_v12 = vmov -1e+30  }
 0x212   :  { %v5724_v38 = vpack.c.bf16 %v1621_v23, %v1619_v39 }
 0x213   :  { %2535 = vrot.lane.b32.xlu1 %v5646_v50, %s5214_s0  ;;  %1824 = vrot.lane.b32.xlu0 %v1636_v11, %s5214_s0 }
 0x214   :  { %4217 = vmatmul.mubr.msk.bf16.gmra.mrb[76].mxu1 %vm1826_vm0, %v1636_v11 }
 0x216   :  { %v2560_v48 = vpop.permute.xlu0 %2559 }
 0x217   :  { %4421 = vmatprep.subr.msk.bf16.mxu1 %vm1826_vm0, %v2560_v48  ;;  %2539 = vrot.lane.b32.xlu1 %v5680_v37, %s5214_s0  ;;  %v2625_v24 = vsel %vm1826_vm0, %v2560_v48, 0 }
 0x218   :  { %2533 = vrot.lane.b32.xlu0 %v5628_v61, %s5214_s0  ;;  %4287 = vmatpush3.bf16.xpose.msra.mxu1 %v2625_v24 }
 0x21b   :  { %2543 = vrot.lane.b32.xlu1 %v5706_v18, %s5214_s0 }
 0x21c   :  { %2537 = vrot.lane.b32.xlu0 %v5662_v26, %s5214_s0 }
 0x21e   :  { %v2562_v17 = vpop.permute.xlu1 %2561 }
 0x21f   :  { %4422 = vmatprep.subr.msk.bf16.mxu1 %vm1826_vm0, %v2562_v17  ;;  %2547 = vrot.lane.b32.xlu1 %v5724_v38, %s5214_s0  ;;  %v2628_v55 = vsel %vm1826_vm0, %v2562_v17, 0 }
 0x220   :  { %2541 = vrot.lane.b32.xlu0 %v5696_v31, %s5214_s0  ;;  %4289 = vmatpush3.bf16.xpose.msra.mxu1 %v2628_v55 }
 0x223   :  { %1710 = vperm.xlu1 %4446, %v1691_v33  }
 0x224   :  { %2545 = vrot.lane.b32.xlu0 %v5714_v36, %s5214_s0 }
 0x226   :  { %v2564_v58 = vpop.permute.xlu1 %2563 }
 0x227   :  { %4423 = vmatprep.subr.msk.bf16.mxu1 %vm1826_vm0, %v2564_v58  ;;  %1713 = vperm.xlu1 %4446, %v1692_v22   ;;  %v2631_v3 = vsel %vm1826_vm0, %v2564_v58, 0 }
 0x228   :  { %1707 = vperm.xlu0 %4445, %v1690_v20   ;;  %4291 = vmatpush3.bf16.xpose.msra.mxu1 %v2631_v3 }
 0x22b   :  { %1719 = vperm.xlu1 %4446, %v1694_v25  }
 0x22c   :  { %1716 = vperm.xlu0 %4445, %v1693_v30  }
 0x22f   :  { %1725 = vperm.xlu1 %4446, %v1696_v0  }
 0x230   :  { %1722 = vperm.xlu0 %4445, %v1695_v34  }
 0x233   :  { %1731 = vperm.xlu1 %4446, %v1698_v59  }
 0x234   :  { %1728 = vperm.xlu0 %4445, %v1697_v52  }
 0x237   :  { %1737 = vperm.xlu1 %4446, %v1700_v41  }
 0x238   :  { %1734 = vperm.xlu0 %4445, %v1699_v40  }
 0x23b   :  { %1743 = vperm.xlu1 %4446, %v1702_v44  }
 0x23c   :  { %1740 = vperm.xlu0 %4445, %v1701_v28  }
 0x23f   :  { %1749 = vperm.xlu1 %4446, %v1704_v57  }
 0x240   :  { %1746 = vperm.xlu0 %4445, %v1703_v43  }
 0x243   :  { %3056 = vrot.lane.b32.xlu1 %v5532_v13, %s5214_s0 }
 0x244   :  { %1752 = vperm.xlu0 %4445, %v1705_v46  }
 0x247   :  { %3060 = vrot.lane.b32.xlu1 %v5540_v54, %s5214_s0 }
 0x248   :  { %3054 = vrot.lane.b32.xlu0 %v5528_v63, %s5214_s0 }
 0x24b   :  { %3066 = vrot.lane.b32.xlu1 %v5561_v2, %s5214_s0 }
 0x24c   :  { %3058 = vrot.lane.b32.xlu0 %v5536_v27, %s5214_s0 }
 0x24d   :  { %v1811_v47 = vpop.permute.xlu0 %1810 }
 0x24e   :  { %4220 = vmatprep.mubr.msk.bf16.mxu1 %vm1826_vm0, %v1811_v47 }
 0x250   :  { %3062 = vrot.lane.b32.xlu0 %v5547_v10, %s5214_s0 }
 0x251   :  { %v2566_v13 = vpop.permute.xlu0 %2565 }
 0x252   :  { %4424 = vmatprep.subr.msk.bf16.mxu1 %vm1826_vm0, %v2566_v13  ;;  %v2634_v54 = vsel %vm1826_vm0, %v2566_v13, 0 }
 0x253   :  { %4293 = vmatpush3.bf16.xpose.msra.mxu1 %v2634_v54 }
 0x254   :  { %3064 = vrot.lane.b32.xlu0 %v5554_v35, %s5214_s0 }
 0x255   :  { %v1813_v63 = vpop.permute.xlu1 %1812 }
 0x256   :  { %4221 = vmatmul.mubr.msk.bf16.gmra.mrb[80].mxu1 %vm1826_vm0, %v1813_v63 }
 0x25d   :  { %v1815_v2 = vpop.permute.xlu1 %1814 }
 0x25e   :  { %4224 = vmatprep.mubr.msk.bf16.mxu1 %vm1826_vm0, %v1815_v2 }
 0x261   :  { %v2568_v27 = vpop.permute.xlu1 %2567 }
 0x262   :  { %4425 = vmatprep.subr.msk.bf16.mxu1 %vm1826_vm0, %v2568_v27  ;;  %v2637_v10 = vsel %vm1826_vm0, %v2568_v27, 0 }
 0x263   :  { %4295 = vmatpush3.bf16.xpose.msra.mxu1 %v2637_v10 }
 0x265   :  { %v1817_v49 = vpop.permute.xlu0 %1816 }
 0x266   :  { %4225 = vmatmul.mubr.msk.bf16.gmra.mrb[84].mxu1 %vm1826_vm0, %v1817_v49 }
 0x26d   :  { %v1819_v15 = vpop.permute.xlu0 %1818 }
 0x26e   :  { %4228 = vmatprep.mubr.msk.bf16.mxu1 %vm1826_vm0, %v1819_v15 }
 0x271   :  { %v2570_v56 = vpop.permute.xlu0 %2569 }
 0x272   :  { %4426 = vmatprep.subr.msk.bf16.mxu1 %vm1826_vm0, %v2570_v56  ;;  %v2640_v35 = vsel %vm1826_vm0, %v2570_v56, 0 }
 0x273   :  { %4297 = vmatpush3.bf16.xpose.msra.mxu1 %v2640_v35 }
 0x275   :  { %v1821_v1 = vpop.permute.xlu1 %1820 }
 0x276   :  { %4229 = vmatmul.mubr.msk.bf16.gmra.mrb[88].mxu1 %vm1826_vm0, %v1821_v1 }
 0x27d   :  { %v1823_v62 = vpop.permute.xlu1 %1822 }
 0x27e   :  { %4232 = vmatprep.mubr.msk.bf16.mxu1 %vm1826_vm0, %v1823_v62 }
 0x281   :  { %v2572_v60 = vpop.permute.xlu1 %2571 }
 0x282   :  { %4427 = vmatprep.subr.msk.bf16.mxu1 %vm1826_vm0, %v2572_v60  ;;  %v2643_v8 = vsel %vm1826_vm0, %v2572_v60, 0 }
 0x283   :  { %4299 = vmatpush3.bf16.xpose.msra.mxu1 %v2643_v8 }
 0x285   :  { %v1825_v5 = vpop.permute.xlu0 %1824  ;;  %v2536_v4 = vpop.permute.xlu1 %2535 }
 0x286   :  { %4233 = vmatmul.mubr.msk.bf16.gmra.mrb[92].mxu1 %vm1826_vm0, %v1825_v5 }
 0x287   :  { %4300 = vmatprep.mubr.msk.bf16.mxu1 %vm1826_vm0, %v5628_v61  ;;  %v1638_v61 = vlaneseq }
 0x289   :  { %v2540_v53 = vpop.permute.xlu1 %2539  ;;  %v5844_v42 = vshrl.u32 %v1638_v61, 7 }
 0x28a   :  { %v2534_v32 = vpop.permute.xlu0 %2533 }
 0x28b   :  { %v1642_v39 = vadd.s32 24, %v5844_v42  ;;  %v1645_v3 = vadd.s32 48, %v5844_v42  ;;  %v1646_v0 = vadd.s32 56, %v5844_v42  ;;  %v1643_v52 = vadd.s32 32, %v5844_v42 }
 0x28c   :  { %v1644_v40 = vadd.s32 40, %v5844_v42  ;;  %v1649_v15 = vadd.s32 80, %v5844_v42  ;;  %v1650_v35 = vadd.s32 88, %v5844_v42  ;;  %v1647_v60 = vadd.s32 64, %v5844_v42 }
 0x28d   :  { %v2544_v14 = vpop.permute.xlu1 %2543  ;;  %v1648_v8 = vadd.s32 72, %v5844_v42 }
 0x28e   :  { %4301 = vmatmul.mubr.msk.bf16.vlgmr.msra.gmra.mrb[96].mxu1 %vm1826_vm0, %v5646_v50  ;;  %v2538_v6 = vpop.permute.xlu0 %2537 }
 0x28f   :  { %4304 = vmatprep.mubr.msk.bf16.mxu1 %vm1826_vm0, %v5662_v26 }
 0x291   :  { %v5842_v50 = vpop.permute.xlu1 %2547 }
 0x292   :  { %v2542_v19 = vpop.permute.xlu0 %2541 }
 0x296   :  { %4305 = vmatmul.mubr.msk.bf16.gmra.mrb[100].mxu1 %vm1826_vm0, %v5680_v37  ;;  %v2546_v26 = vpop.permute.xlu0 %2545 }
 0x297   :  { %4308 = vmatprep.mubr.msk.bf16.mxu1 %vm1826_vm0, %v5696_v31  ;;  %v5849_v31 = vand.u32 127, %v1638_v61 }
 0x299   :  { %vm1674_vm3 = vcmp.le.s32.totalorder %v5849_v31, %v5844_v42  ;;  %vm1677_vm9 = vcmp.le.s32.totalorder %v5849_v31, %v1642_v39  ;;  %vm1680_vm13 = vcmp.le.s32.totalorder %v5849_v31, %v1645_v3  ;;  %vm1681_vm15 = vcmp.le.s32.totalorder %v5849_v31, %v1646_v0 }
 0x29a   :  { %v1651_v39 = vadd.s32 96, %v5844_v42 }
 0x29e   :  { %4309 = vmatmul.mubr.msk.bf16.gmra.mrb[104].mxu1 %vm1826_vm0, %v5706_v18  ;;  %v1641_v18 = vadd.s32 16, %v5844_v42 }
 0x29f   :  { %4312 = vmatprep.mubr.msk.bf16.mxu1 %vm1826_vm0, %v5714_v36  ;;  %v1640_v36 = vadd.s32 8, %v5844_v42 }
 0x2a0   :  { %vm1676_vm1 = vcmp.le.s32.totalorder %v5849_v31, %v1641_v18 }
 0x2a1   :  { %vm1675_vm5 = vcmp.le.s32.totalorder %v5849_v31, %v1640_v36 }
 0x2a2   :  { %v1711_v37 = vpop.permute.xlu1 %1710 }
 0x2a3   :  { %vm1755_vm6 = vcmp.ge.s32.totalorder %v5849_v31, %v1711_v37 }
 0x2a4   :  { %vm1771_vm11 = vmand %vm1675_vm5, %vm1755_vm6  ;;  %vm1679_vm6 = vcmp.le.s32.totalorder %v5849_v31, %v1644_v40 }
 0x2a5   :  { %v5873_v48 = vsel %vm1771_vm11, 0.0, %v5216_v12 }
 0x2a6   :  { %4313 = vmatmul.mubr.msk.bf16.gmra.mrb[108].mxu1 %vm1826_vm0, %v5724_v38  ;;  %v1714_v51 = vpop.permute.xlu1 %1713 }
 0x2a7   :  { %v1708_v45 = vpop.permute.xlu0 %1707  ;;  %4316 = vmatprep.mubr.msk.bf16.mxu1 %vm1826_vm0, %v2534_v32  ;;  %vm1756_vm2 = vcmp.ge.s32.totalorder %v5849_v31, %v1714_v51 }
 0x2a8   :  { %vm1754_vm4 = vcmp.ge.s32.totalorder %v5849_v31, %v1708_v45  ;;  %vm1772_vm7 = vmand %vm1676_vm1, %vm1756_vm2  ;;  %v1653_v45 = vadd.s32 112, %v5844_v42 }
 0x2a9   :  { %vm1770_vm8 = vmand %vm1674_vm3, %vm1754_vm4  ;;  %v5866_v16 = vsel %vm1772_vm7, 0.0, %v5216_v12  ;;  %vm1678_vm3 = vcmp.le.s32.totalorder %v5849_v31, %v1643_v52 }
 0x2aa   :  { %v5869_v23 = vsel %vm1770_vm8, 0.0, %v5216_v12  ;;  %v1720_v11 = vpop.permute.xlu1 %1719 }
 0x2ab   :  { %v1717_v29 = vpop.permute.xlu0 %1716  ;;  %vm1758_vm4 = vcmp.ge.s32.totalorder %v5849_v31, %v1720_v11 }
 0x2ac   :  { %vm1757_vm10 = vcmp.ge.s32.totalorder %v5849_v31, %v1717_v29  ;;  %vm1774_vm8 = vmand %vm1678_vm3, %vm1758_vm4  ;;  %vm1683_vm3 = vcmp.le.s32.totalorder %v5849_v31, %v1648_v8  ;;  %v1654_v29 = vadd.s32 120, %v5844_v42 }
 0x2ad   :  { %vm1773_vm12 = vmand %vm1677_vm9, %vm1757_vm10  ;;  %v5929_v63 = vsel %vm1774_vm8, 0.0, %v5216_v12  ;;  %vm1684_vm10 = vcmp.le.s32.totalorder %v5849_v31, %v1649_v15 }
 0x2ae   :  { %4317 = vmatmul.mubr.msk.bf16.gmra.mrb[112].mxu1 %vm1826_vm0, %v2536_v4  ;;  %v5885_v20 = vsel %vm1773_vm12, 0.0, %v5216_v12  ;;  %v1726_v59 = vpop.permute.xlu1 %1725  ;;  %vm1685_vm12 = vcmp.le.s32.totalorder %v5849_v31, %v1650_v35 }
 0x2af   :  { %v1723_v7 = vpop.permute.xlu0 %1722  ;;  %4320 = vmatprep.mubr.msk.bf16.mxu1 %vm1826_vm0, %v2538_v6  ;;  %vm1760_vm14 = vcmp.ge.s32.totalorder %v5849_v31, %v1726_v59 }
 0x2b0   :  { %vm1776_vm2 = vmand %vm1680_vm13, %vm1760_vm14  ;;  %vm1759_vm7 = vcmp.ge.s32.totalorder %v5849_v31, %v1723_v7  ;;  %v1652_v7 = vadd.s32 104, %v5844_v42 }
 0x2b1   :  { %v5916_v28 = vsel %vm1776_vm2, 0.0, %v5216_v12  ;;  %vm1775_vm9 = vmand %vm1679_vm6, %vm1759_vm7  ;;  %vm1688_vm7 = vcmp.le.s32.totalorder %v5849_v31, %v1653_v45 }
 0x2b2   :  { %v1732_v43 = vpop.permute.xlu1 %1731  ;;  %v5937_v49 = vsel %vm1775_vm9, 0.0, %v5216_v12  ;;  %vm1689_vm9 = vcmp.le.s32.totalorder %v5849_v31, %v1654_v29 }
 0x2b3   :  { %v1729_v9 = vpop.permute.xlu0 %1728 }
 0x2b4   :  { %vm1761_vm1 = vcmp.ge.s32.totalorder %v5849_v31, %v1729_v9 }
 0x2b5   :  { %vm1777_vm5 = vmand %vm1681_vm15, %vm1761_vm1  ;;  %vm1682_vm15 = vcmp.le.s32.totalorder %v5849_v31, %v1647_v60  ;;  %vm1762_vm1 = vcmp.ge.s32.totalorder %v5849_v31, %v1732_v43 }
 0x2b6   :  { %v4206_v38 = vpop.f32.mrb[64].mxu1  ;;  %4321 = vmatmul.mubr.msk.bf16.gmra.mrb[116].mxu1 %vm1826_vm0, %v2540_v53  ;;  %v5919_v57 = vsel %vm1777_vm5, 0.0, %v5216_v12  ;;  %v1738_v1 = vpop.permute.xlu1 %1737  ;;  %vm1778_vm5 = vmand %vm1682_vm15, %vm1762_vm1  ;;  %vm1687_vm15 = vcmp.le.s32.totalorder %v5849_v31, %v1652_v7 }
 0x2b7   :  { %v5876_v24 = vadd.f32 %v4206_v38, %v5866_v16  ;;  %v5878_v17 = vpop.permute.xlu0 %1734  ;;  %v1933_v55 = vpop.f32.mrb[65].mxu1  ;;  %4324 = vmatprep.mubr.msk.bf16.mxu1 %vm1826_vm0, %v2542_v19  ;;  %vm1764_vm11 = vcmp.ge.s32.totalorder %v5849_v31, %v1738_v1 }
 0x2b8   :  { %v5882_v33 = vadd.f32 %v1933_v55, %v5869_v23  ;;  %v4207_v22 = vpop.f32.mrb[66].mxu1  ;;  %vm1780_vm14 = vmand %vm1684_vm10, %vm1764_vm11  ;;  %vm1763_vm4 = vcmp.ge.s32.totalorder %v5849_v31, %v5878_v17 }
 0x2b9   :  { %v1936_v58 = vpop.f32.mrb[67].mxu1  ;;  %2064 = vmax.xlane.f32.xlu0 %v5876_v24  ;;  %v5895_v34 = vadd.f32 %v4207_v22, %v5885_v20  ;;  %v5962_v5 = vsel %vm1780_vm14, 0.0, %v5216_v12  ;;  %vm1779_vm6 = vmand %vm1683_vm3, %vm1763_vm4 }
 0x2ba   :  { %v5890_v25 = vadd.f32 %v1936_v58, %v5873_v48  ;;  %2060 = vmax.xlane.f32.xlu1 %v5882_v33  ;;  %v1744_v19 = vpop.permute.xlu1 %1743  ;;  %v5978_v37 = vsel %vm1779_vm6, 0.0, %v5216_v12 }
 0x2bb   :  { %v1741_v30 = vpop.permute.xlu0 %1740 }
 0x2bc   :  { %vm1765_vm13 = vcmp.ge.s32.totalorder %v5849_v31, %v1741_v30 }
 0x2bd   :  { %2062 = vmax.xlane.f32.xlu0 %v5890_v25  ;;  %vm1781_vm2 = vmand %vm1685_vm12, %vm1765_vm13  ;;  %vm1686_vm12 = vcmp.le.s32.totalorder %v5849_v31, %v1651_v39  ;;  %vm1766_vm13 = vcmp.ge.s32.totalorder %v5849_v31, %v1744_v19 }
 0x2be   :  { %2066 = vmax.xlane.f32.xlu1 %v5895_v34  ;;  %4325 = vmatmul.mubr.msk.bf16.gmra.mrb[120].mxu1 %vm1826_vm0, %v2544_v14  ;;  %v5965_v4 = vsel %vm1781_vm2, 0.0, %v5216_v12  ;;  %v5971_v14 = vsel %vm1778_vm5, 0.0, %v5216_v12  ;;  %v1750_v51 = vpop.permute.xlu1 %1749  ;;  %vm1782_vm2 = vmand %vm1686_vm12, %vm1766_vm13 }
 0x2bf   :  { %v5903_v41 = vpop.permute.xlu0 %1746  ;;  %4328 = vmatprep.mubr.msk.bf16.mxu1 %vm1826_vm0, %v2546_v26  ;;  %vm1768_vm8 = vcmp.ge.s32.totalorder %v5849_v31, %v1750_v51  ;;  %v6013_v55 = vsel %vm1782_vm2, 0.0, %v5216_v12 }
 0x2c0   :  { %vm1784_vm11 = vmand %vm1688_vm7, %vm1768_vm8  ;;  %vm1767_vm1 = vcmp.ge.s32.totalorder %v5849_v31, %v5903_v41 }
 0x2c1   :  { %v6004_v9 = vsel %vm1784_vm11, 0.0, %v5216_v12  ;;  %vm1783_vm3 = vmand %vm1687_vm15, %vm1767_vm1 }
 0x2c2   :  { %v6020_v3 = vsel %vm1783_vm3, 0.0, %v5216_v12 }
 0x2c3   :  { %v5911_v44 = vpop.permute.xlu0 %1752 }
 0x2c4   :  { %vm1769_vm10 = vcmp.ge.s32.totalorder %v5849_v31, %v5911_v44 }
 0x2c5   :  { %vm1785_vm14 = vmand %vm1689_vm9, %vm1769_vm10 }
 0x2c6   :  { %v4210_v46 = vpop.f32.mrb[68].mxu1  ;;  %4329 = vmatmul.mubr.msk.bf16.gmra.mrb[124].mxu1 %vm1826_vm0, %v5842_v50  ;;  %v6007_v42 = vsel %vm1785_vm14, 0.0, %v5216_v12 }
 0x2c7   :  { %v5924_v47 = vadd.f32 %v4210_v46, %v5916_v28  ;;  %v5926_v13 = vpop.permute.xlu0 %3054  ;;  %v1949_v54 = vpop.f32.mrb[69].mxu1 }
 0x2c8   :  { %4332 = vmatprep.subr.bf16.mxu0 %v5926_v13  ;;  %v4211_v2 = vpop.f32.mrb[70].mxu1  ;;  %v5941_v56 = vadd.f32 %v1949_v54, %v5929_v63 }
 0x2c9   :  { %v5933_v27 = vadd.f32 %v4211_v2, %v5919_v57  ;;  %v1952_v10 = vpop.f32.mrb[71].mxu1  ;;  %2072 = vmax.xlane.f32.xlu0 %v5924_v47  ;;  %v6049_v2 = vpop.permute.xlu1 %3056 }
 0x2ca   :  { %v5946_v62 = vadd.f32 %v1952_v10, %v5937_v49 }
 0x2cb   :  { %2074 = vmax.xlane.f32.xlu1 %v5933_v27  ;;  %v6047_v54 = vpop.permute.xlu0 %3058 }
 0x2cd   :  { %2068 = vmax.xlane.f32.xlu0 %v5941_v56 }
 0x2cf   :  { %2070 = vmax.xlane.f32.xlu1 %v5946_v62  ;;  %v6054_v60 = vpop.permute.xlu0 %3062 }
 0x2d6   :  { %v4214_v32 = vpop.f32.mrb[72].mxu1 }
 0x2d7   :  { %v5968_v53 = vadd.f32 %v4214_v32, %v5962_v5  ;;  %v1965_v6 = vpop.f32.mrb[73].mxu1 }
 0x2d8   :  { %v4215_v61 = vpop.f32.mrb[74].mxu1  ;;  %v5982_v18 = vadd.f32 %v1965_v6, %v5971_v14  ;;  %v6060_v6 = vpop.permute.xlu1 %3060 }
 0x2d9   :  { %v5974_v50 = vadd.f32 %v4215_v61, %v5965_v4  ;;  %v1968_v26 = vpop.f32.mrb[75].mxu1  ;;  %2080 = vmax.xlane.f32.xlu0 %v5968_v53 }
 0x2da   :  { %v5987_v36 = vadd.f32 %v1968_v26, %v5978_v37  ;;  %v6070_v26 = vpop.permute.xlu0 %3064 }
 0x2db   :  { %2082 = vmax.xlane.f32.xlu1 %v5974_v50 }
 0x2dc   :  { %v6073_v45 = vpop.permute.xlu1 %3066 }
 0x2dd   :  { %2076 = vmax.xlane.f32.xlu0 %v5982_v18 }
 0x2df   :  { %2078 = vmax.xlane.f32.xlu1 %v5987_v36 }
 0x2e7   :  { %v4218_v11 = vpop.f32.mrb[76].mxu1 }
 0x2e8   :  { %v6010_v38 = vadd.f32 %v4218_v11, %v6004_v9  ;;  %v1981_v17 = vpop.f32.mrb[77].mxu1 }
 0x2e9   :  { %v4219_v22 = vpop.f32.mrb[78].mxu1  ;;  %v6023_v30 = vadd.f32 %v1981_v17, %v6013_v55 }
 0x2ea   :  { %v6016_v58 = vadd.f32 %v4219_v22, %v6007_v42  ;;  %v1984_v31 = vpop.f32.mrb[79].mxu1  ;;  %2088 = vmax.xlane.f32.xlu0 %v6010_v38 }
 0x2eb   :  { %v6027_v0 = vadd.f32 %v1984_v31, %v6020_v3 }
 0x2ec   :  { %2090 = vmax.xlane.f32.xlu1 %v6016_v58 }
 0x2ee   :  { %2084 = vmax.xlane.f32.xlu0 %v6023_v30 }
 0x2f0   :  { %2086 = vmax.xlane.f32.xlu1 %v6027_v0 }
 0x329   :  { %v4222_v59 = vpop.f32.mrb[80].mxu1 }
 0x32a   :  { %v6032_v52 = vadd.f32 %v4222_v59, %v5866_v16  ;;  %v1997_v41 = vpop.f32.mrb[81].mxu1 }
 0x32b   :  { %v4223_v40 = vpop.f32.mrb[82].mxu1  ;;  %v6039_v43 = vadd.f32 %v1997_v41, %v5869_v23 }
 0x32c   :  { %v6035_v12 = vadd.f32 %v4223_v40, %v5885_v20  ;;  %v2000_v44 = vpop.f32.mrb[83].mxu1  ;;  %2096 = vmax.xlane.f32.xlu0 %v6032_v52 }
 0x32d   :  { %v6043_v46 = vadd.f32 %v2000_v44, %v5873_v48 }
 0x32e   :  { %2098 = vmax.xlane.f32.xlu1 %v6035_v12 }
 0x330   :  { %2092 = vmax.xlane.f32.xlu0 %v6039_v43 }
 0x332   :  { %2094 = vmax.xlane.f32.xlu1 %v6043_v46 }
 0x339   :  { %v4226_v10 = vpop.f32.mrb[84].mxu1 }
 0x33a   :  { %v6052_v15 = vadd.f32 %v4226_v10, %v5916_v28  ;;  %v2013_v35 = vpop.f32.mrb[85].mxu1 }
 0x33b   :  { %v4227_v1 = vpop.f32.mrb[86].mxu1  ;;  %v6063_v19 = vadd.f32 %v2013_v35, %v5929_v63 }
 0x33c   :  { %v6057_v8 = vadd.f32 %v4227_v1, %v5919_v57  ;;  %v2016_v32 = vpop.f32.mrb[87].mxu1  ;;  %2104 = vmax.xlane.f32.xlu0 %v6052_v15 }
 0x33d   :  { %v6067_v61 = vadd.f32 %v2016_v32, %v5937_v49 }
 0x33e   :  { %2106 = vmax.xlane.f32.xlu1 %v6057_v8 }
 0x340   :  { %2100 = vmax.xlane.f32.xlu0 %v6063_v19 }
 0x342   :  { %2102 = vmax.xlane.f32.xlu1 %v6067_v61 }
 0x346   :  { %v2065_v29 = vpop.xlane.xlu0 %2064 }
 0x347   :  { %v2061_v51 = vpop.xlane.xlu1 %2060  ;;  %v2126_v7 = vsub.f32 %v5876_v24, %v2065_v29 }
 0x348   :  { %v2124_v39 = vsub.f32 %v5882_v33, %v2061_v51 }
 0x349   :  { %v4230_v11 = vpop.f32.mrb[88].mxu1  ;;  %v2160_v24 = vmul.f32 1.442695, %v2126_v7 }
 0x34a   :  { %v2156_v17 = vmul.f32 1.442695, %v2124_v39  ;;  %v6078_v22 = vadd.f32 %v4230_v11, %v5962_v5  ;;  %v2029_v31 = vpop.f32.mrb[89].mxu1  ;;  %v2063_v59 = vpop.xlane.xlu0 %2062 }
 0x34b   :  { %v2125_v41 = vsub.f32 %v5890_v25, %v2063_v59  ;;  %v4231_v40 = vpop.f32.mrb[90].mxu1  ;;  %v2067_v44 = vpop.xlane.xlu1 %2066  ;;  %v6087_v32 = vadd.f32 %v2029_v31, %v5971_v14 }
 0x34c   :  { %v6082_v10 = vadd.f32 %v4231_v40, %v5965_v4  ;;  %v2127_v35 = vsub.f32 %v5895_v34, %v2067_v44  ;;  %v2032_v1 = vpop.f32.mrb[91].mxu1  ;;  %2112 = vmax.xlane.f32.xlu0 %v6078_v22  ;;  %4759 = vpow2.f32 %v2156_v17 }
 0x34d   :  { %v2158_v33 = vmul.f32 1.442695, %v2125_v41  ;;  %6730 = vst [vmem:[#allocation21_spill] sm:$0xff] %v6087_v32  ;;  %v6091_v25 = vadd.f32 %v2032_v1, %v5978_v37 }
 0x34e   :  { %6729 = vst [vmem:[#allocation20_spill] sm:$0xff] %v6082_v10  ;;  %v2162_v29 = vmul.f32 1.442695, %v2127_v35  ;;  %2114 = vmax.xlane.f32.xlu1 %v6082_v10 }
 0x34f   :  { %4761 = vpow2.f32 %v2158_v33  ;;  %6731 = vst [vmem:[#allocation22_spill] sm:$0xff] %v6091_v25 }
 0x350   :  { %4763 = vpow2.f32 %v2162_v29  ;;  %2108 = vmax.xlane.f32.xlu0 %v6087_v32 }
 0x351   :  { %4765 = vpow2.f32 %v2160_v24 }
 0x352   :  { %2110 = vmax.xlane.f32.xlu1 %v6091_v25 }
 0x356   :  { %v2073_v34 = vpop.xlane.xlu0 %2072  ;;  %v6095_v51 = vpop.eup %4759 }
 0x357   :  { %v2130_v1 = vsub.f32 %v5924_v47, %v2073_v34 }
 0x358   :  { %v2075_v39 = vpop.xlane.xlu1 %2074 }
 0x359   :  { %v6097_v7 = vpop.eup %4761  ;;  %v2131_v11 = vsub.f32 %v5933_v27, %v2075_v39  ;;  %v4234_v17 = vpop.f32.mrb[92].mxu1 }
 0x35a   :  { %v6100_v31 = vpop.eup %4763  ;;  %v6103_v59 = vadd.f32 %v4234_v17, %v6004_v9  ;;  %v2045_v41 = vpop.f32.mrb[93].mxu1  ;;  %v2284_v44 = vpack.c.bf16 %v6097_v7, %v6095_v51 }
 0x35b   :  { %v2069_v40 = vpop.xlane.xlu0 %2068  ;;  %v6107_v35 = vpop.eup %4765  ;;  %v2170_v24 = vmul.f32 1.442695, %v2131_v11  ;;  %v6119_v47 = vadd.f32 %v2045_v41, %v6013_v55 }
 0x35c   :  { %v2128_v33 = vsub.f32 %v5941_v56, %v2069_v40  ;;  %v4235_v29 = vpop.f32.mrb[94].mxu1  ;;  %2120 = vmax.xlane.f32.xlu0 %v6103_v59  ;;  %4252 = vmatprep.mubr.bf16.mxu0 %v2284_v44  ;;  %v2071_v17 = vpop.xlane.xlu1 %2070  ;;  %v2285_v25 = vpack.c.bf16 %v6100_v31, %v6107_v35  ;;  %v2168_v56 = vmul.f32 1.442695, %v2130_v1 }
 0x35d   :  { %v6112_v27 = vadd.f32 %v4235_v29, %v6007_v42  ;;  %v2048_v39 = vpop.f32.mrb[95].mxu1  ;;  %v2129_v10 = vsub.f32 %v5946_v62, %v2071_v17  ;;  %4767 = vpow2.f32 %v2170_v24 }
 0x35e   :  { %v2164_v32 = vmul.f32 1.442695, %v2128_v33  ;;  %4253 = vmatmul.mubr.bf16.vlgmr.msra.gmra.mrb[64].mxu0 %v2285_v25  ;;  %v6124_v11 = vadd.f32 %v2048_v39, %v6020_v3 }
 0x35f   :  { %2122 = vmax.xlane.f32.xlu1 %v6112_v27  ;;  %v2166_v34 = vmul.f32 1.442695, %v2129_v10  ;;  %4333 = vmatpush3.bf16.msra.mxu0 %v5926_v13 }
 0x360   :  { %4769 = vpow2.f32 %v2164_v32  ;;  %4334 = vmatprep.subr.bf16.mxu0 %v6049_v2  ;;  %2116 = vmax.xlane.f32.xlu0 %v6119_v47 }
 0x361   :  { %4771 = vpow2.f32 %v2166_v34  ;;  %v4302_v62 = vpop.f32.mrb[96].mxu1 }
 0x362   :  { %v2679_v41 = vpop.f32.mrb[97].mxu1  ;;  %4773 = vpow2.f32 %v2168_v56  ;;  %v6134_v32 = vadd.f32 %v4302_v62, %v5866_v16 }
 0x363   :  { %2118 = vmax.xlane.f32.xlu1 %v6124_v11  ;;  %4335 = vmatpush3.bf16.msra.mxu0 %v6049_v2  ;;  %v6131_v10 = vadd.f32 %v2679_v41, %v5869_v23  ;;  %v4303_v13 = vpop.f32.mrb[98].mxu1 }
 0x364   :  { %6732 = vst [vmem:[#allocation23_spill] sm:$0xff] %v6134_v32  ;;  %4336 = vmatprep.subr.bf16.mxu0 %v6047_v54  ;;  %v2682_v25 = vpop.f32.mrb[99].mxu1  ;;  %v6141_v44 = vadd.f32 %v4303_v13, %v5885_v20 }
 0x365   :  { %2806 = vmax.xlane.f32.xlu0 %v6131_v10 }
 0x366   :  { %v2081_v40 = vpop.xlane.xlu0 %2080  ;;  %6733 = vst [vmem:[#allocation24_spill] sm:$0xff] %v6141_v44 }
 0x367   :  { %2810 = vmax.xlane.f32.xlu1 %v6134_v32  ;;  %4337 = vmatpush3.bf16.msra.mxu0 %v6047_v54  ;;  %v6144_v1 = vpop.eup %4767  ;;  %v2134_v54 = vsub.f32 %v5968_v53, %v2081_v40 }
 0x368   :  { %4338 = vmatprep.subr.bf16.mxu0 %v6060_v6  ;;  %v2083_v2 = vpop.xlane.xlu1 %2082 }
 0x369   :  { %v2135_v24 = vsub.f32 %v5974_v50, %v2083_v2  ;;  %v4306_v33 = vpop.f32.mrb[100].mxu1  ;;  %v6159_v50 = vadd.f32 %v2682_v25, %v5873_v48  ;;  %v2176_v25 = vmul.f32 1.442695, %v2134_v54 }
 0x36a   :  { %v6147_v29 = vpop.eup %4769  ;;  %v2695_v39 = vpop.f32.mrb[101].mxu1 }
 0x36b   :  { %2812 = vmax.xlane.f32.xlu1 %v6141_v44  ;;  %v2077_v17 = vpop.xlane.xlu0 %2076  ;;  %v6150_v56 = vpop.eup %4771  ;;  %4339 = vmatpush3.bf16.msra.mxu0 %v6060_v6  ;;  %v6155_v34 = vadd.f32 %v2695_v39, %v5929_v63  ;;  %6735 = vst [vmem:[#allocation26_spill] sm:$0xff] %v6159_v50  ;;  %v2178_v13 = vmul.f32 1.442695, %v2135_v24  ;;  %v6173_v39 = vadd.f32 %v4306_v33, %v5916_v28 }
 0x36c   :  { %v2132_v62 = vsub.f32 %v5982_v18, %v2077_v17  ;;  %v4307_v41 = vpop.f32.mrb[102].mxu1  ;;  %4340 = vmatprep.subr.bf16.mxu0 %v6054_v60  ;;  %v2079_v44 = vpop.xlane.xlu1 %2078  ;;  %v2286_v32 = vpack.c.bf16 %v6150_v56, %v6147_v29 }
 0x36d   :  { %6734 = vst [vmem:[#allocation25_spill] sm:$0xff] %v6155_v34  ;;  %v2698_v2 = vpop.f32.mrb[103].mxu1  ;;  %v6164_v53 = vpop.eup %4773  ;;  %v2133_v6 = vsub.f32 %v5987_v36, %v2079_v44  ;;  %2814 = vmax.xlane.f32.xlu0 %v6155_v34  ;;  %4775 = vpow2.f32 %v2178_v13  ;;  %6736 = vst [vmem:[#allocation27_spill] sm:$0xff] %v6173_v39  ;;  %v6182_v17 = vadd.f32 %v4307_v41, %v5919_v57 }
 0x36e   :  { %v2172_v40 = vmul.f32 1.442695, %v2132_v62  ;;  %4256 = vmatprep.mubr.bf16.mxu0 %v2286_v32  ;;  %v2287_v18 = vpack.c.bf16 %v6144_v1, %v6164_v53  ;;  %v6189_v62 = vadd.f32 %v2698_v2, %v5937_v49 }
 0x36f   :  { %2808 = vmax.xlane.f32.xlu1 %v6159_v50  ;;  %v2174_v24 = vmul.f32 1.442695, %v2133_v6  ;;  %4341 = vmatpush3.bf16.msra.mxu0 %v6054_v60  ;;  %6738 = vst [vmem:[#allocation29_spill] sm:$0xff] %v6182_v17 }
 0x370   :  { %4342 = vmatprep.subr.bf16.mxu0 %v6070_v26  ;;  %4257 = vmatmul.mubr.bf16.gmra.mrb[68].mxu0 %v2287_v18  ;;  %6739 = vst [vmem:[#allocation30_spill] sm:$0xff] %v6189_v62 }
 0x371   :  { %4777 = vpow2.f32 %v2174_v24  ;;  %v4310_v36 = vpop.f32.mrb[104].mxu1 }
 0x372   :  { %4779 = vpow2.f32 %v2172_v40  ;;  %v2711_v44 = vpop.f32.mrb[105].mxu1  ;;  %v6201_v2 = vadd.f32 %v4310_v36, %v5962_v5 }
 0x373   :  { %2818 = vmax.xlane.f32.xlu1 %v6173_v39  ;;  %4781 = vpow2.f32 %v2176_v25  ;;  %4343 = vmatpush3.bf16.msra.mxu0 %v6070_v26  ;;  %v6179_v32 = vadd.f32 %v2711_v44, %v5971_v14  ;;  %v4311_v60 = vpop.f32.mrb[106].mxu1 }
 0x374   :  { %4344 = vmatprep.subr.bf16.mxu0 %v6073_v45  ;;  %v2714_v33 = vpop.f32.mrb[107].mxu1  ;;  %6740 = vst [vmem:[#allocation31_spill] sm:$0xff] %v6201_v2 }
 0x375   :  { %6737 = vst [vmem:[#allocation28_spill] sm:$0xff] %v6179_v32  ;;  %2822 = vmax.xlane.f32.xlu0 %v6179_v32 }
 0x377   :  { %2820 = vmax.xlane.f32.xlu1 %v6182_v17  ;;  %4345 = vmatpush3.bf16.msra.mxu0 %v6073_v45  ;;  %v2089_v54 = vpop.xlane.xlu0 %2088  ;;  %v6191_v6 = vpop.eup %4775 }
 0x378   :  { %v2138_v25 = vsub.f32 %v6010_v38, %v2089_v54 }
 0x379   :  { %v2091_v26 = vpop.xlane.xlu1 %2090  ;;  %v4314_v13 = vpop.f32.mrb[108].mxu1 }
 0x37a   :  { %v2139_v41 = vsub.f32 %v6016_v58, %v2091_v26  ;;  %v2727_v40 = vpop.f32.mrb[109].mxu1  ;;  %v2184_v36 = vmul.f32 1.442695, %v2138_v25  ;;  %v6225_v25 = vadd.f32 %v2714_v33, %v5978_v37 }
 0x37b   :  { %2816 = vmax.xlane.f32.xlu1 %v6189_v62  ;;  %v6195_v18 = vpop.eup %4777  ;;  %v2085_v24 = vpop.xlane.xlu0 %2084  ;;  %v6239_v33 = vadd.f32 %v2727_v40, %v6013_v55 }
 0x37c   :  { %v4315_v44 = vpop.f32.mrb[110].mxu1  ;;  %v6198_v45 = vpop.eup %4779  ;;  %v2186_v32 = vmul.f32 1.442695, %v2139_v41  ;;  %v2136_v17 = vsub.f32 %v6023_v30, %v2085_v24  ;;  %v6217_v41 = vadd.f32 %v4311_v60, %v5965_v4  ;;  %6744 = vst [vmem:[#allocation35_spill] sm:$0xff] %v6225_v25 }
 0x37d   :  { %v6205_v39 = vadd.f32 %v4315_v44, %v6007_v42  ;;  %v2730_v58 = vpop.f32.mrb[111].mxu1  ;;  %v6207_v26 = vpop.eup %4781  ;;  %v2288_v38 = vpack.c.bf16 %v6195_v18, %v6198_v45  ;;  %6746 = vst [vmem:[#allocation37_spill] sm:$0xff] %v6239_v33 }
 0x37e   :  { %v2087_v62 = vpop.xlane.xlu1 %2086  ;;  %v2180_v54 = vmul.f32 1.442695, %v2136_v17  ;;  %v2289_v30 = vpack.c.bf16 %v6191_v6, %v6207_v26  ;;  %6742 = vst [vmem:[#allocation33_spill] sm:$0xff] %v6217_v41  ;;  %4783 = vpow2.f32 %v2186_v32  ;;  %v6220_v44 = vadd.f32 %v2730_v58, %v6020_v3 }
 0x37f   :  { %6741 = vst [vmem:[#allocation32_spill] sm:$0xff] %v6205_v39  ;;  %v2137_v34 = vsub.f32 %v6027_v0, %v2087_v62  ;;  %2826 = vmax.xlane.f32.xlu1 %v6201_v2  ;;  %2836 = vmax.xlane.f32.xlu0 %v6205_v39 }
 0x380   :  { %4260 = vmatprep.mubr.bf16.mxu0 %v2288_v38  ;;  %6743 = vst [vmem:[#allocation34_spill] sm:$0xff] %v6220_v44  ;;  %4785 = vpow2.f32 %v2180_v54 }
 0x381   :  { %v2182_v24 = vmul.f32 1.442695, %v2137_v34  ;;  %4261 = vmatmul.mubr.bf16.gmra.mrb[72].mxu0 %v2289_v30  ;;  %v4318_v0 = vpop.f32.mrb[112].mxu1  ;;  %v6229_v34 = vadd.f32 %v4314_v13, %v6004_v9 }
 0x382   :  { %v2743_v17 = vpop.f32.mrb[113].mxu1  ;;  %v6253_v2 = vadd.f32 %v4318_v0, %v5866_v16 }
 0x383   :  { %4787 = vpow2.f32 %v2182_v24  ;;  %2828 = vmax.xlane.f32.xlu1 %v6217_v41  ;;  %2832 = vmax.xlane.f32.xlu0 %v6220_v44  ;;  %v4319_v62 = vpop.f32.mrb[114].mxu1  ;;  %6745 = vst [vmem:[#allocation36_spill] sm:$0xff] %v6229_v34 }
 0x384   :  { %4789 = vpow2.f32 %v2184_v36  ;;  %v2746_v60 = vpop.f32.mrb[115].mxu1 }
 0x385   :  { %v6290_v0 = vadd.f32 %v2746_v60, %v5873_v48 }
 0x387   :  { %2824 = vmax.xlane.f32.xlu1 %v6225_v25  ;;  %v6249_v25 = vadd.f32 %v2743_v17, %v5869_v23 }
 0x388   :  { %v6231_v58 = vpop.eup %4783 }
 0x389   :  { %v4322_v32 = vpop.f32.mrb[116].mxu1 }
 0x38a   :  { %v2759_v38 = vpop.f32.mrb[117].mxu1  ;;  %v6234_v54 = vpop.eup %4785 }
 0x38b   :  { %2834 = vmax.xlane.f32.xlu1 %v6229_v34  ;;  %v4323_v30 = vpop.f32.mrb[118].mxu1  ;;  %v6267_v16 = vadd.f32 %v2759_v38, %v5929_v63 }
 0x38c   :  { %v2762_v24 = vpop.f32.mrb[119].mxu1 }
 0x38d   :  { %v6236_v36 = vpop.eup %4787 }
 0x38e   :  { %v6241_v44 = vpop.eup %4789  ;;  %v2290_v13 = vpack.c.bf16 %v6236_v36, %v6234_v54 }
 0x38f   :  { %6747 = vst [vmem:[#allocation38_spill] sm:$0xff] %v6241_v44  ;;  %2830 = vmax.xlane.f32.xlu1 %v6239_v33  ;;  %v2291_v34 = vpack.c.bf16 %v6231_v58, %v6241_v44  ;;  %v6257_v33 = vadd.f32 %v4319_v62, %v5885_v20  ;;  %v6271_v20 = vadd.f32 %v2762_v24, %v5937_v49 }
 0x390   :  { %4264 = vmatprep.mubr.bf16.mxu0 %v2290_v13  ;;  %v6263_v13 = vadd.f32 %v4322_v32, %v5916_v28 }
 0x391   :  { %4265 = vmatmul.mubr.bf16.gmra.mrb[76].mxu0 %v2291_v34  ;;  %v4326_v39 = vpop.f32.mrb[120].mxu1 }
 0x392   :  { %v2775_v41 = vpop.f32.mrb[121].mxu1  ;;  %v6283_v63 = vadd.f32 %v4326_v39, %v5962_v5 }
 0x393   :  { %2838 = vmax.xlane.f32.xlu1 %v6249_v25  ;;  %v4327_v40 = vpop.f32.mrb[122].mxu1  ;;  %v6279_v28 = vadd.f32 %v2775_v41, %v5971_v14 }
 0x394   :  { %v2778_v50 = vpop.f32.mrb[123].mxu1  ;;  %v6304_v48 = vadd.f32 %v4327_v40, %v5965_v4 }
 0x395   :  { %v6298_v14 = vadd.f32 %v2778_v50, %v5978_v37 }
 0x397   :  { %2842 = vmax.xlane.f32.xlu1 %v6253_v2 }
 0x399   :  { %3068 = vrot.lane.b32.xlu0 %v5570_v21, %s5214_s0  ;;  %v4330_v23 = vpop.f32.mrb[124].mxu1  ;;  %v6275_v21 = vadd.f32 %v4323_v30, %v5919_v57 }
 0x39a   :  { %v2791_v17 = vpop.f32.mrb[125].mxu1  ;;  %v6295_v57 = vadd.f32 %v4330_v23, %v6004_v9 }
 0x39b   :  { %2844 = vmax.xlane.f32.xlu1 %v6257_v33  ;;  %v4331_v34 = vpop.f32.mrb[126].mxu1  ;;  %v6287_v49 = vadd.f32 %v2791_v17, %v6013_v55 }
 0x39c   :  { %v2794_v44 = vpop.f32.mrb[127].mxu1 }
 0x39d   :  { %v6312_v38 = vadd.f32 %v2794_v44, %v6020_v3 }
 0x39f   :  { %2850 = vmax.xlane.f32.xlu1 %v6263_v13 }
 0x3a3   :  { %2846 = vmax.xlane.f32.xlu1 %v6267_v16 }
 0x3a7   :  { %2848 = vmax.xlane.f32.xlu1 %v6271_v20 }
 0x3ab   :  { %2852 = vmax.xlane.f32.xlu1 %v6275_v21 }
 0x3af   :  { %2854 = vmax.xlane.f32.xlu1 %v6279_v28 }
 0x3b3   :  { %2858 = vmax.xlane.f32.xlu1 %v6283_v63 }
 0x3b7   :  { %2862 = vmax.xlane.f32.xlu1 %v6287_v49 }
 0x3b8   :  { %2840 = vmax.xlane.f32.xlu0 %v6290_v0 }
 0x3b9   :  { %v2097_v5 = vpop.xlane.xlu0 %2096 }
 0x3ba   :  { %v2142_v41 = vsub.f32 %v6032_v52, %v2097_v5  ;;  %v6317_v52 = vadd.f32 %v4331_v34, %v6007_v42 }
 0x3bb   :  { %2866 = vmax.xlane.f32.xlu1 %v6295_v57  ;;  %v2099_v39 = vpop.xlane.xlu1 %2098 }
 0x3bc   :  { %2856 = vmax.xlane.f32.xlu0 %v6298_v14  ;;  %v2143_v55 = vsub.f32 %v6035_v12, %v2099_v39  ;;  %v2192_v12 = vmul.f32 1.442695, %v2142_v41  ;;  %v6748_v39 = vld [vmem:[#allocation20_spill] sm:$0xff] }
 0x3bd   :  { %v2093_v62 = vpop.xlane.xlu0 %2092 }
 0x3be   :  { %v2194_v60 = vmul.f32 1.442695, %v2143_v55  ;;  %v2140_v9 = vsub.f32 %v6039_v43, %v2093_v62  ;;  %v6749_v62 = vld [vmem:[#allocation21_spill] sm:$0xff] }
 0x3bf   :  { %2228 = vadd.xlane.f32.xlu1 %v6147_v29  ;;  %v2095_v37 = vpop.xlane.xlu1 %2094 }
 0x3c0   :  { %2860 = vmax.xlane.f32.xlu0 %v6304_v48  ;;  %v2188_v50 = vmul.f32 1.442695, %v2140_v9  ;;  %v2141_v32 = vsub.f32 %v6043_v46, %v2095_v37  ;;  %4791 = vpow2.f32 %v2194_v60 }
 0x3c2   :  { %v2190_v4 = vmul.f32 1.442695, %v2141_v32  ;;  %4793 = vpow2.f32 %v2188_v50  ;;  %v6750_v50 = vld [vmem:[#allocation22_spill] sm:$0xff] }
 0x3c3   :  { %2232 = vadd.xlane.f32.xlu1 %v6164_v53 }
 0x3c4   :  { %2864 = vmax.xlane.f32.xlu0 %v6312_v38  ;;  %4795 = vpow2.f32 %v2190_v4 }
 0x3c5   :  { %4797 = vpow2.f32 %v2192_v12 }
 0x3c7   :  { %2236 = vadd.xlane.f32.xlu1 %v6198_v45 }
 0x3c8   :  { %2868 = vmax.xlane.f32.xlu0 %v6317_v52 }
 0x3c9   :  { %v2105_v43 = vpop.xlane.xlu0 %2104 }
 0x3ca   :  { %v4792_v46 = vpop.eup %4791  ;;  %v2146_v44 = vsub.f32 %v6052_v15, %v2105_v43 }
 0x3cb   :  { %2240 = vadd.xlane.f32.xlu1 %v6207_v26  ;;  %v2107_v3 = vpop.xlane.xlu1 %2106 }
 0x3cc   :  { %2230 = vadd.xlane.f32.xlu0 %v6150_v56  ;;  %v2147_v29 = vsub.f32 %v6057_v8, %v2107_v3  ;;  %v4794_v53 = vpop.eup %4793  ;;  %v2200_v8 = vmul.f32 1.442695, %v2146_v44 }
 0x3cd   :  { %v2101_v30 = vpop.xlane.xlu0 %2100 }
 0x3ce   :  { %v4796_v42 = vpop.eup %4795  ;;  %v2202_v24 = vmul.f32 1.442695, %v2147_v29  ;;  %v2144_v40 = vsub.f32 %v6063_v19, %v2101_v30 }
 0x3cf   :  { %2220 = vadd.xlane.f32.xlu1 %v6095_v51  ;;  %v4798_v45 = vpop.eup %4797  ;;  %v2103_v23 = vpop.xlane.xlu1 %2102  ;;  %v2292_v26 = vpack.c.bf16 %v4796_v42, %v4794_v53 }
 0x3d0   :  { %2234 = vadd.xlane.f32.xlu0 %v6144_v1  ;;  %v2196_v17 = vmul.f32 1.442695, %v2144_v40  ;;  %v2145_v56 = vsub.f32 %v6067_v61, %v2103_v23  ;;  %v2293_v34 = vpack.c.bf16 %v4792_v46, %v4798_v45  ;;  %4799 = vpow2.f32 %v2202_v24 }
 0x3d1   :  { %4268 = vmatprep.mubr.bf16.mxu0 %v2292_v26 }
 0x3d2   :  { %v2198_v15 = vmul.f32 1.442695, %v2145_v56  ;;  %4269 = vmatmul.mubr.bf16.gmra.mrb[80].mxu0 %v2293_v34  ;;  %4801 = vpow2.f32 %v2196_v17 }
 0x3d3   :  { %2244 = vadd.xlane.f32.xlu1 %v6234_v54 }
 0x3d4   :  { %2238 = vadd.xlane.f32.xlu0 %v6195_v18  ;;  %4803 = vpow2.f32 %v2198_v15 }
 0x3d5   :  { %4805 = vpow2.f32 %v2200_v8 }
 0x3d7   :  { %2224 = vadd.xlane.f32.xlu1 %v6107_v35 }
 0x3d8   :  { %2242 = vadd.xlane.f32.xlu0 %v6191_v6 }
 0x3d9   :  { %v2113_v19 = vpop.xlane.xlu0 %2112 }
 0x3da   :  { %v2150_v61 = vsub.f32 %v6078_v22, %v2113_v19  ;;  %v4800_v1 = vpop.eup %4799 }
 0x3db   :  { %2256 = vadd.xlane.f32.xlu1 %v4798_v45  ;;  %v2115_v51 = vpop.xlane.xlu1 %2114 }
 0x3dc   :  { %2222 = vadd.xlane.f32.xlu0 %v6097_v7  ;;  %v2208_v5 = vmul.f32 1.442695, %v2150_v61  ;;  %v2151_v54 = vsub.f32 %v6748_v39, %v2115_v51  ;;  %v4802_v55 = vpop.eup %4801 }
 0x3dd   :  { %v2109_v41 = vpop.xlane.xlu0 %2108 }
 0x3de   :  { %v4804_v18 = vpop.eup %4803  ;;  %4807 = vpow2.f32 %v2208_v5  ;;  %v2148_v60 = vsub.f32 %v6749_v62, %v2109_v41  ;;  %v2210_v6 = vmul.f32 1.442695, %v2151_v54 }
 0x3df   :  { %2252 = vadd.xlane.f32.xlu1 %v4794_v53  ;;  %v4806_v35 = vpop.eup %4805  ;;  %v2111_v9 = vpop.xlane.xlu1 %2110  ;;  %v2294_v22 = vpack.c.bf16 %v4804_v18, %v4802_v55 }
 0x3e0   :  { %2246 = vadd.xlane.f32.xlu0 %v6236_v36  ;;  %v2204_v37 = vmul.f32 1.442695, %v2148_v60  ;;  %v2149_v7 = vsub.f32 %v6750_v50, %v2111_v9  ;;  %v2295_v32 = vpack.c.bf16 %v4800_v1, %v4806_v35 }
 0x3e1   :  { %4272 = vmatprep.mubr.bf16.mxu0 %v2294_v22 }
 0x3e2   :  { %4809 = vpow2.f32 %v2204_v37  ;;  %v2206_v12 = vmul.f32 1.442695, %v2149_v7  ;;  %4273 = vmatmul.mubr.bf16.gmra.mrb[84].mxu0 %v2295_v32  ;;  %v6755_v37 = vld [vmem:[#allocation27_spill] sm:$0xff] }
 0x3e3   :  { %2264 = vadd.xlane.f32.xlu1 %v4806_v35  ;;  %4811 = vpow2.f32 %v2210_v6  ;;  %v6754_v35 = vld [vmem:[#allocation25_spill] sm:$0xff] }
 0x3e4   :  { %2226 = vadd.xlane.f32.xlu0 %v6100_v31  ;;  %4813 = vpow2.f32 %v2206_v12 }
 0x3e7   :  { %2260 = vadd.xlane.f32.xlu1 %v4802_v55  ;;  %v6753_v55 = vld [vmem:[#allocation26_spill] sm:$0xff] }
 0x3e8   :  { %2258 = vadd.xlane.f32.xlu0 %v4792_v46  ;;  %v4808_v4 = vpop.eup %4807 }
 0x3e9   :  { %v2121_v43 = vpop.xlane.xlu0 %2120 }
 0x3ea   :  { %v2154_v36 = vsub.f32 %v6103_v59, %v2121_v43 }
 0x3eb   :  { %2272 = vadd.xlane.f32.xlu1 %v4808_v4 }
 0x3ec   :  { %v2123_v3 = vpop.xlane.xlu1 %2122  ;;  %2254 = vadd.xlane.f32.xlu0 %v4796_v42  ;;  %v4810_v29 = vpop.eup %4809  ;;  %v2216_v53 = vmul.f32 1.442695, %v2154_v36  ;;  %v6756_v36 = vld [vmem:[#allocation29_spill] sm:$0xff] }
 0x3ed   :  { %v2155_v44 = vsub.f32 %v6112_v27, %v2123_v3  ;;  %v4812_v30 = vpop.eup %4811  ;;  %v2117_v24 = vpop.xlane.xlu0 %2116 }
 0x3ee   :  { %v4814_v40 = vpop.eup %4813  ;;  %4815 = vpow2.f32 %v2216_v53  ;;  %v2152_v31 = vsub.f32 %v6119_v47, %v2117_v24  ;;  %v2297_v17 = vpack.c.bf16 %v4812_v30, %v4808_v4  ;;  %v6751_v47 = vld [vmem:[#allocation23_spill] sm:$0xff] }
 0x3ef   :  { %2268 = vadd.xlane.f32.xlu1 %v4810_v29  ;;  %v2218_v45 = vmul.f32 1.442695, %v2155_v44  ;;  %v2296_v23 = vpack.c.bf16 %v4814_v40, %v4810_v29 }
 0x3f0   :  { %v2119_v46 = vpop.xlane.xlu1 %2118  ;;  %2266 = vadd.xlane.f32.xlu0 %v4800_v1  ;;  %v2212_v26 = vmul.f32 1.442695, %v2152_v31 }
 0x3f1   :  { %v2153_v59 = vsub.f32 %v6124_v11, %v2119_v46  ;;  %4276 = vmatprep.mubr.bf16.mxu0 %v2296_v23  ;;  %v6752_v11 = vld [vmem:[#allocation24_spill] sm:$0xff] }
 0x3f2   :  { %4817 = vpow2.f32 %v2212_v26  ;;  %v2807_v56 = vpop.xlane.xlu0 %2806  ;;  %4277 = vmatmul.mubr.bf16.gmra.mrb[88].mxu0 %v2297_v17  ;;  %v6758_v23 = vld [vmem:[#allocation28_spill] sm:$0xff] }
 0x3f3   :  { %v2214_v42 = vmul.f32 1.442695, %v2153_v59  ;;  %4819 = vpow2.f32 %v2218_v45  ;;  %v2870_v27 = vsub.f32 %v6131_v10, %v2807_v56  ;;  %v6759_v56 = vld [vmem:[#allocation31_spill] sm:$0xff] }
 0x3f4   :  { %v2811_v34 = vpop.xlane.xlu1 %2810  ;;  %2262 = vadd.xlane.f32.xlu0 %v4804_v18 }
 0x3f5   :  { %4821 = vpow2.f32 %v2214_v42  ;;  %v2872_v8 = vsub.f32 %v6751_v47, %v2811_v34  ;;  %v2902_v19 = vmul.f32 1.442695, %v2870_v27 }
 0x3f7   :  { %v2906_v15 = vmul.f32 1.442695, %v2872_v8 }
 0x3f8   :  { %v2813_v61 = vpop.xlane.xlu1 %2812  ;;  %2274 = vadd.xlane.f32.xlu0 %v4812_v30  ;;  %v4816_v51 = vpop.eup %4815 }
 0x3f9   :  { %4823 = vpow2.f32 %v2906_v15  ;;  %v2873_v1 = vsub.f32 %v6752_v11, %v2813_v61  ;;  %2280 = vadd.xlane.f32.xlu1 %v4816_v51  ;;  %v6760_v61 = vld [vmem:[#allocation33_spill] sm:$0xff] }
 0x3fa   :  { %4825 = vpow2.f32 %v2902_v19  ;;  %v2815_v10 = vpop.xlane.xlu0 %2814 }
 0x3fb   :  { %v2908_v5 = vmul.f32 1.442695, %v2873_v1  ;;  %v2874_v6 = vsub.f32 %v6754_v35, %v2815_v10 }
 0x3fc   :  { %v2809_v39 = vpop.xlane.xlu1 %2808  ;;  %2270 = vadd.xlane.f32.xlu0 %v4814_v40  ;;  %v4818_v54 = vpop.eup %4817  ;;  %v6757_v40 = vld [vmem:[#allocation30_spill] sm:$0xff] }
 0x3fd   :  { %4827 = vpow2.f32 %v2908_v5  ;;  %v2871_v41 = vsub.f32 %v6753_v55, %v2809_v39  ;;  %v4820_v18 = vpop.eup %4819  ;;  %2276 = vadd.xlane.f32.xlu1 %v4818_v54  ;;  %v2910_v4 = vmul.f32 1.442695, %v2874_v6  ;;  %v6761_v39 = vld [vmem:[#allocation32_spill] sm:$0xff] }
 0x3fe   :  { %v2299_v7 = vpack.c.bf16 %v4820_v18, %v4816_v51 }
 0x3ff   :  { %v4822_v62 = vpop.eup %4821  ;;  %v2904_v60 = vmul.f32 1.442695, %v2871_v41  ;;  %v6762_v41 = vld [vmem:[#allocation35_spill] sm:$0xff] }
 0x400   :  { %v2819_v9 = vpop.xlane.xlu1 %2818  ;;  %2282 = vadd.xlane.f32.xlu0 %v4820_v18  ;;  %v2298_v22 = vpack.c.bf16 %v4822_v62, %v4818_v54 }
 0x401   :  { %4829 = vpow2.f32 %v2904_v60  ;;  %v2876_v50 = vsub.f32 %v6755_v37, %v2819_v9  ;;  %v6763_v9 = vld [vmem:[#allocation34_spill] sm:$0xff] }
 0x402   :  { %4280 = vmatprep.mubr.bf16.mxu0 %v2298_v22  ;;  %v2823_v30 = vpop.xlane.xlu0 %2822 }
 0x403   :  { %v4824_v32 = vpop.eup %4823  ;;  %v2914_v12 = vmul.f32 1.442695, %v2876_v50  ;;  %4281 = vmatmul.mubr.bf16.gmra.mrb[92].mxu0 %v2299_v7  ;;  %v2878_v26 = vsub.f32 %v6758_v23, %v2823_v30  ;;  %v6764_v7 = vld [vmem:[#allocation36_spill] sm:$0xff] }
 0x404   :  { %v2821_v43 = vpop.xlane.xlu1 %2820  ;;  %2278 = vadd.xlane.f32.xlu0 %v4822_v62  ;;  %2970 = vadd.xlane.f32.xlu1 %v4824_v32  ;;  %v4826_v29 = vpop.eup %4825 }
 0x405   :  { %4831 = vpow2.f32 %v2914_v12  ;;  %v2877_v3 = vsub.f32 %v6756_v36, %v2821_v43  ;;  %v2918_v8 = vmul.f32 1.442695, %v2878_v26 }
 0x406   :  { %4833 = vpow2.f32 %v2910_v4 }
 0x407   :  { %v4828_v53 = vpop.eup %4827  ;;  %v2916_v44 = vmul.f32 1.442695, %v2877_v3 }
 0x408   :  { %v2817_v24 = vpop.xlane.xlu1 %2816  ;;  %2972 = vadd.xlane.f32.xlu0 %v4828_v53  ;;  %2966 = vadd.xlane.f32.xlu1 %v4826_v29  ;;  %v3031_v35 = vpack.c.bf16 %v4828_v53, %v4824_v32 }
 0x409   :  { %4835 = vpow2.f32 %v2916_v44  ;;  %v2875_v31 = vsub.f32 %v6757_v40, %v2817_v24 }
 0x40b   :  { %v4830_v45 = vpop.eup %4829  ;;  %v2912_v46 = vmul.f32 1.442695, %v2875_v31 }
 0x40c   :  { %v2827_v59 = vpop.xlane.xlu1 %2826  ;;  %v2837_v17 = vpop.xlane.xlu0 %2836  ;;  %2968 = vadd.xlane.f32.xlu0 %v4830_v45  ;;  %v3030_v42 = vpack.c.bf16 %v4830_v45, %v4826_v29  ;;  %v6765_v29 = vld [vmem:[#allocation37_spill] sm:$0xff] }
 0x40d   :  { %4837 = vpow2.f32 %v2912_v46  ;;  %v2880_v27 = vsub.f32 %v6759_v56, %v2827_v59  ;;  %v2885_v54 = vsub.f32 %v6761_v39, %v2837_v17 }
 0x40e   :  { %4348 = vmatprep.mubr.bf16.mxu0 %v3030_v42 }
 0x40f   :  { %v4832_v34 = vpop.eup %4831  ;;  %v2922_v47 = vmul.f32 1.442695, %v2880_v27  ;;  %v2932_v6 = vmul.f32 1.442695, %v2885_v54 }
 0x410   :  { %v2829_v15 = vpop.xlane.xlu1 %2828  ;;  %v2833_v19 = vpop.xlane.xlu0 %2832  ;;  %2978 = vadd.xlane.f32.xlu1 %v4832_v34 }
 0x411   :  { %4839 = vpow2.f32 %v2922_v47  ;;  %v2881_v51 = vsub.f32 %v6760_v61, %v2829_v15  ;;  %v4834_v11 = vpop.eup %4833  ;;  %v2883_v22 = vsub.f32 %v6763_v9, %v2833_v19 }
 0x412   :  { %4841 = vpow2.f32 %v2918_v8 }
 0x413   :  { %v4836_v1 = vpop.eup %4835  ;;  %v2924_v5 = vmul.f32 1.442695, %v2881_v51  ;;  %v2928_v36 = vmul.f32 1.442695, %v2883_v22 }
 0x414   :  { %v2825_v10 = vpop.xlane.xlu1 %2824  ;;  %2980 = vadd.xlane.f32.xlu0 %v4836_v1  ;;  %v3069_v55 = vpop.permute.xlu0 %3068  ;;  %2974 = vadd.xlane.f32.xlu1 %v4834_v11  ;;  %v3033_v24 = vpack.c.bf16 %v4836_v1, %v4832_v34 }
 0x415   :  { %4843 = vpow2.f32 %v2924_v5  ;;  %v2879_v18 = vsub.f32 %v6762_v41, %v2825_v10  ;;  %4346 = vmatprep.subr.bf16.mxu0 %v3069_v55 }
 0x416   :  { %4347 = vmatpush3.bf16.msra.mxu0 %v3069_v55 }
 0x417   :  { %v4838_v62 = vpop.eup %4837  ;;  %v2920_v60 = vmul.f32 1.442695, %v2879_v18 }
 0x418   :  { %v2835_v37 = vpop.xlane.xlu1 %2834  ;;  %2976 = vadd.xlane.f32.xlu0 %v4838_v62  ;;  %v3032_v50 = vpack.c.bf16 %v4838_v62, %v4834_v11 }
 0x419   :  { %4845 = vpow2.f32 %v2920_v60  ;;  %v2884_v12 = vsub.f32 %v6764_v7, %v2835_v37  ;;  %4349 = vmatmul.mubr.bf16.vlgmr.msra.gmra.mrb[96].mxu0 %v3031_v35 }
 0x41a   :  { %4352 = vmatprep.mubr.bf16.mxu0 %v3032_v50  ;;  %4847 = vpow2.f32 %v2932_v6 }
 0x41b   :  { %v4840_v4 = vpop.eup %4839  ;;  %v2930_v43 = vmul.f32 1.442695, %v2884_v12 }
 0x41c   :  { %2986 = vadd.xlane.f32.xlu1 %v4840_v4  ;;  %v2831_v3 = vpop.xlane.xlu1 %2830  ;;  %v4842_v53 = vpop.eup %4841 }
 0x41d   :  { %4849 = vpow2.f32 %v2930_v43  ;;  %v2882_v32 = vsub.f32 %v6765_v29, %v2831_v3 }
 0x41e   :  { %4851 = vpow2.f32 %v2928_v36 }
 0x41f   :  { %v4844_v44 = vpop.eup %4843  ;;  %v2926_v30 = vmul.f32 1.442695, %v2882_v32 }
 0x420   :  { %2988 = vadd.xlane.f32.xlu0 %v4844_v44  ;;  %2982 = vadd.xlane.f32.xlu1 %v4842_v53  ;;  %v2839_v40 = vpop.xlane.xlu1 %2838  ;;  %v3035_v56 = vpack.c.bf16 %v4844_v44, %v4840_v4 }
 0x421   :  { %4853 = vpow2.f32 %v2926_v30  ;;  %4353 = vmatmul.mubr.bf16.gmra.mrb[100].mxu0 %v3033_v24  ;;  %v2886_v45 = vsub.f32 %v6249_v25, %v2839_v40 }
 0x423   :  { %v4846_v31 = vpop.eup %4845  ;;  %v2934_v27 = vmul.f32 1.442695, %v2886_v45 }
 0x424   :  { %2984 = vadd.xlane.f32.xlu0 %v4846_v31  ;;  %v2843_v46 = vpop.xlane.xlu1 %2842  ;;  %v3034_v23 = vpack.c.bf16 %v4846_v31, %v4842_v53  ;;  %v4848_v59 = vpop.eup %4847 }
 0x425   :  { %v2888_v26 = vsub.f32 %v6253_v2, %v2843_v46 }
 0x426   :  { %4356 = vmatprep.mubr.bf16.mxu0 %v3034_v23 }
 0x427   :  { %v4850_v17 = vpop.eup %4849  ;;  %v2938_v42 = vmul.f32 1.442695, %v2888_v26 }
 0x428   :  { %2996 = vadd.xlane.f32.xlu0 %v4848_v59  ;;  %2994 = vadd.xlane.f32.xlu1 %v4850_v17  ;;  %v2845_v34 = vpop.xlane.xlu1 %2844  ;;  %v4852_v8 = vpop.eup %4851  ;;  %v3037_v11 = vpack.c.bf16 %v4848_v59, %v4850_v17 }
 0x429   :  { %4855 = vpow2.f32 %v2938_v42  ;;  %v2889_v47 = vsub.f32 %v6257_v33, %v2845_v34  ;;  %4357 = vmatmul.mubr.bf16.gmra.mrb[104].mxu0 %v3035_v56 }
 0x42a   :  { %4857 = vpow2.f32 %v2934_v27 }
 0x42b   :  { %v4854_v25 = vpop.eup %4853  ;;  %v2940_v15 = vmul.f32 1.442695, %v2889_v47 }
 0x42c   :  { %2992 = vadd.xlane.f32.xlu0 %v4852_v8  ;;  %2990 = vadd.xlane.f32.xlu1 %v4854_v25  ;;  %v2851_v2 = vpop.xlane.xlu1 %2850  ;;  %v3036_v19 = vpack.c.bf16 %v4852_v8, %v4854_v25 }
 0x42d   :  { %4859 = vpow2.f32 %v2940_v15  ;;  %v2892_v61 = vsub.f32 %v6263_v13, %v2851_v2 }
 0x42e   :  { %4360 = vmatprep.mubr.bf16.mxu0 %v3036_v19 }
 0x42f   :  { %v2946_v51 = vmul.f32 1.442695, %v2892_v61 }
 0x430   :  { %v2847_v1 = vpop.xlane.xlu1 %2846 }
 0x431   :  { %4861 = vpow2.f32 %v2946_v51  ;;  %v2890_v5 = vsub.f32 %v6267_v16, %v2847_v1  ;;  %4361 = vmatmul.mubr.bf16.gmra.mrb[108].mxu0 %v3037_v11  ;;  %v6365_v33 = vpop.f32.mrb[64].mxu0 }
 0x432   :  { %v6369_v10 = vpop.f32.mrb[65].mxu0 }
 0x433   :  { %v6367_v39 = vpop.eup %4855  ;;  %v2942_v54 = vmul.f32 1.442695, %v2890_v5  ;;  %v6371_v55 = vpop.f32.mrb[66].mxu0 }
 0x434   :  { %3002 = vadd.xlane.f32.xlu1 %v6367_v39  ;;  %v2849_v13 = vpop.xlane.xlu1 %2848  ;;  %v6374_v41 = vpop.f32.mrb[67].mxu0 }
 0x435   :  { %4863 = vpow2.f32 %v2942_v54  ;;  %v6376_v18 = vpop.eup %4857  ;;  %v2891_v9 = vsub.f32 %v6271_v20, %v2849_v13 }
 0x437   :  { %v6378_v62 = vpop.eup %4859  ;;  %v2944_v12 = vmul.f32 1.442695, %v2891_v9 }
 0x438   :  { %2998 = vadd.xlane.f32.xlu1 %v6376_v18  ;;  %3004 = vadd.xlane.f32.xlu0 %v6378_v62  ;;  %v2853_v16 = vpop.xlane.xlu1 %2852 }
 0x439   :  { %v2893_v32 = vsub.f32 %v6275_v21, %v2853_v16 }
 0x43b   :  { %v6382_v60 = vpop.eup %4861  ;;  %v2948_v31 = vmul.f32 1.442695, %v2893_v32 }
 0x43c   :  { %3010 = vadd.xlane.f32.xlu1 %v6382_v60  ;;  %v2855_v35 = vpop.xlane.xlu1 %2854 }
 0x43d   :  { %v2894_v37 = vsub.f32 %v6279_v28, %v2855_v35 }
 0x43f   :  { %v6385_v6 = vpop.eup %4863  ;;  %v2950_v36 = vmul.f32 1.442695, %v2894_v37 }
 0x440   :  { %3006 = vadd.xlane.f32.xlu1 %v6385_v6  ;;  %v2859_v22 = vpop.xlane.xlu1 %2858 }
 0x441   :  { %v2896_v50 = vsub.f32 %v6283_v63, %v2859_v22 }
 0x443   :  { %v2954_v7 = vmul.f32 1.442695, %v2896_v50  ;;  %v6391_v4 = vpop.f32.mrb[68].mxu0 }
 0x444   :  { %v2863_v43 = vpop.xlane.xlu1 %2862  ;;  %v6393_v3 = vpop.f32.mrb[69].mxu0 }
 0x445   :  { %4865 = vpow2.f32 %v2954_v7  ;;  %v2841_v29 = vpop.xlane.xlu0 %2840  ;;  %v6396_v20 = vpop.f32.mrb[70].mxu0  ;;  %v2898_v28 = vsub.f32 %v6287_v49, %v2863_v43 }
 0x446   :  { %v2887_v53 = vsub.f32 %v6290_v0, %v2841_v29  ;;  %v6399_v44 = vpop.f32.mrb[71].mxu0  ;;  %4867 = vpow2.f32 %v2944_v12 }
 0x447   :  { %4869 = vpow2.f32 %v2950_v36  ;;  %v2958_v46 = vmul.f32 1.442695, %v2898_v28 }
 0x448   :  { %v2936_v63 = vmul.f32 1.442695, %v2887_v53  ;;  %v2867_v30 = vpop.xlane.xlu1 %2866 }
 0x449   :  { %v2900_v24 = vsub.f32 %v6295_v57, %v2867_v30  ;;  %v2857_v40 = vpop.xlane.xlu0 %2856 }
 0x44a   :  { %4871 = vpow2.f32 %v2936_v63  ;;  %v2895_v45 = vsub.f32 %v6298_v14, %v2857_v40 }
 0x44b   :  { %v2962_v21 = vmul.f32 1.442695, %v2900_v24 }
 0x44c   :  { %v2229_v23 = vpop.xlane.xlu1 %2228  ;;  %v2952_v26 = vmul.f32 1.442695, %v2895_v45 }
 0x44d   :  { %4873 = vpow2.f32 %v2962_v21  ;;  %v2861_v0 = vpop.xlane.xlu0 %2860 }
 0x44e   :  { %4875 = vpow2.f32 %v2948_v31  ;;  %v2897_v59 = vsub.f32 %v6304_v48, %v2861_v0 }
 0x44f   :  { %v6405_v49 = vpop.eup %4865  ;;  %4877 = vrcp.f32 %v2229_v23 }
 0x450   :  { %4879 = vpow2.f32 %v2958_v46  ;;  %3018 = vadd.xlane.f32.xlu1 %v6405_v49  ;;  %v2233_v57 = vpop.xlane.xlu1 %2232  ;;  %v4868_v42 = vpop.eup %4867  ;;  %v2956_v14 = vmul.f32 1.442695, %v2897_v59 }
 0x451   :  { %4881 = vrcp.f32 %v2233_v57  ;;  %v2865_v17 = vpop.xlane.xlu0 %2864  ;;  %v4870_v27 = vpop.eup %4869  ;;  %v3040_v1 = vpack.c.bf16 %v4868_v42, %v6385_v6 }
 0x452   :  { %4883 = vpow2.f32 %v2952_v26  ;;  %v2899_v56 = vsub.f32 %v6312_v38, %v2865_v17  ;;  %v3039_v38 = vpack.c.bf16 %v6378_v62, %v6367_v39 }
 0x454   :  { %v4872_v34 = vpop.eup %4871  ;;  %v4262_v47 = vpop.f32.mrb[72].mxu0  ;;  %3014 = vadd.xlane.f32.xlu1 %v4870_v27  ;;  %v2960_v2 = vmul.f32 1.442695, %v2899_v56 }
 0x455   :  { %v2237_v8 = vpop.xlane.xlu1 %2236  ;;  %v2366_v48 = vpop.f32.mrb[73].mxu0  ;;  %3000 = vadd.xlane.f32.xlu0 %v4872_v34  ;;  %v3038_v15 = vpack.c.bf16 %v4872_v34, %v6376_v18 }
 0x456   :  { %4885 = vrcp.f32 %v2237_v8  ;;  %v2869_v25 = vpop.xlane.xlu0 %2868  ;;  %v6410_v19 = vpop.f32.mrb[74].mxu0 }
 0x457   :  { %4887 = vpow2.f32 %v2956_v14  ;;  %v2901_v61 = vsub.f32 %v6317_v52, %v2869_v25  ;;  %v6415_v51 = vpop.eup %4873  ;;  %v6417_v11 = vpop.f32.mrb[75].mxu0  ;;  %4364 = vmatprep.mubr.bf16.mxu0 %v3038_v15 }
 0x458   :  { %v4876_v5 = vpop.eup %4875  ;;  %4365 = vmatmul.mubr.bf16.gmra.mrb[112].mxu0 %v3039_v38  ;;  %3026 = vadd.xlane.f32.xlu1 %v6415_v51 }
 0x459   :  { %v2964_v54 = vmul.f32 1.442695, %v2901_v61  ;;  %v2241_v13 = vpop.xlane.xlu1 %2240  ;;  %v4878_v18 = vpop.eup %4877  ;;  %4368 = vmatprep.mubr.bf16.mxu0 %v3040_v1  ;;  %3012 = vadd.xlane.f32.xlu0 %v4876_v5  ;;  %v3041_v37 = vpack.c.bf16 %v4876_v5, %v6382_v60 }
 0x45a   :  { %4889 = vrcp.f32 %v2241_v13  ;;  %v2231_v16 = vpop.xlane.xlu0 %2230  ;;  %v4880_v52 = vpop.eup %4879  ;;  %v6422_v39 = vmul.f32 %v4878_v18, %v6393_v3 }
 0x45b   :  { %4891 = vpow2.f32 %v2960_v2  ;;  %v4882_v62 = vpop.eup %4881 }
 0x45c   :  { %4893 = vrcp.f32 %v2231_v16  ;;  %v4884_v35 = vpop.eup %4883  ;;  %3022 = vadd.xlane.f32.xlu1 %v4880_v52  ;;  %v6425_v9 = vmul.f32 %v4882_v62, %v6391_v4 }
 0x45d   :  { %4895 = vpow2.f32 %v2964_v54  ;;  %v2221_v6 = vpop.xlane.xlu1 %2220  ;;  %3008 = vadd.xlane.f32.xlu0 %v4868_v42  ;;  %v3042_v7 = vpack.c.bf16 %v4884_v35, %v4870_v27 }
 0x45e   :  { %4897 = vrcp.f32 %v2221_v6  ;;  %v2235_v22 = vpop.xlane.xlu0 %2234 }
 0x45f   :  { %4899 = vrcp.f32 %v2235_v22 }
 0x460   :  { %v4886_v50 = vpop.eup %4885  ;;  %4369 = vmatmul.mubr.bf16.gmra.mrb[116].mxu0 %v3041_v37 }
 0x461   :  { %v4888_v12 = vpop.eup %4887  ;;  %v2245_v43 = vpop.xlane.xlu1 %2244  ;;  %v6428_v36 = vmul.f32 %v4886_v50, %v2366_v48  ;;  %4372 = vmatprep.mubr.bf16.mxu0 %v3042_v7 }
 0x462   :  { %4901 = vrcp.f32 %v2245_v43  ;;  %v2239_v3 = vpop.xlane.xlu0 %2238  ;;  %3020 = vadd.xlane.f32.xlu0 %v4888_v12  ;;  %v3043_v31 = vpack.c.bf16 %v4888_v12, %v6405_v49  ;;  %v4750_v12 = vld [vmem:[#allocation7 + $0xd0] ss:$8 sps:$4 sm:$0xff]  }
 0x463   :  { %4903 = vrcp.f32 %v2239_v3 }
 0x464   :  { %v4890_v4 = vpop.eup %4889  ;;  %v6430_v32 = vpop.f32.mrb[76].mxu0 }
 0x465   :  { %v4892_v29 = vpop.eup %4891  ;;  %v2225_v53 = vpop.xlane.xlu1 %2224  ;;  %v6432_v28 = vmul.f32 %v4890_v4, %v4262_v47 }
 0x466   :  { %v4894_v60 = vpop.eup %4893  ;;  %v2382_v63 = vpop.f32.mrb[77].mxu0  ;;  %4905 = vrcp.f32 %v2225_v53  ;;  %3016 = vadd.xlane.f32.xlu0 %v4884_v35  ;;  %v3044_v23 = vpack.c.bf16 %v4892_v29, %v4880_v52 }
 0x467   :  { %v2243_v30 = vpop.xlane.xlu0 %2242  ;;  %v4896_v24 = vpop.eup %4895  ;;  %v6438_v45 = vmul.f32 %v4894_v60, %v6399_v44 }
 0x468   :  { %v6434_v40 = vpop.f32.mrb[78].mxu0  ;;  %4907 = vrcp.f32 %v2243_v30  ;;  %v4898_v21 = vpop.eup %4897  ;;  %4373 = vmatmul.mubr.bf16.gmra.mrb[120].mxu0 %v3043_v31 }
 0x469   :  { %v2385_v46 = vpop.f32.mrb[79].mxu0  ;;  %v4900_v0 = vpop.eup %4899  ;;  %v6441_v26 = vmul.f32 %v4898_v21, %v6369_v10  ;;  %4376 = vmatprep.mubr.bf16.mxu0 %v3044_v23  ;;  %v3045_v10 = vpack.c.bf16 %v4896_v24, %v6415_v51 }
 0x46a   :  { %3028 = vadd.xlane.f32.xlu0 %v4896_v24  ;;  %v6444_v57 = vmul.f32 %v4900_v0, %v6396_v20  ;;  %v2257_v38 = vpop.xlane.xlu1 %2256 }
 0x46b   :  { %6766 = vst [vmem:[#allocation20_spill] sm:$0xff] %v6441_v26  ;;  %v2223_v59 = vpop.xlane.xlu0 %2222 }
 0x46c   :  { %4909 = vrcp.f32 %v2223_v59  ;;  %v4902_v17 = vpop.eup %4901 }
 0x46d   :  { %v4904_v49 = vpop.eup %4903  ;;  %v6446_v42 = vmul.f32 %v4902_v17, %v2382_v63 }
 0x46e   :  { %3024 = vadd.xlane.f32.xlu0 %v4892_v29  ;;  %v6449_v14 = vmul.f32 %v4904_v49, %v6417_v11 }
 0x46f   :  { %v2247_v44 = vpop.xlane.xlu0 %2246 }
 0x470   :  { %4911 = vrcp.f32 %v2247_v44  ;;  %v4906_v56 = vpop.eup %4905  ;;  %4377 = vmatmul.mubr.bf16.gmra.mrb[124].mxu0 %v3045_v10 }
 0x471   :  { %v6453_v34 = vmul.f32 %v4906_v56, %v6365_v33  ;;  %v2253_v33 = vpop.xlane.xlu1 %2252 }
 0x472   :  { %v4908_v27 = vpop.eup %4907 }
 0x473   :  { %6767 = vst [vmem:[#allocation21_spill] sm:$0xff] %v6453_v34  ;;  %v2227_v20 = vpop.xlane.xlu0 %2226  ;;  %v6456_v47 = vmul.f32 %v4908_v27, %v6410_v19 }
 0x474   :  { %4913 = vrcp.f32 %v2227_v20 }
 0x475   :  { %4915 = vrcp.f32 %v2257_v38  ;;  %v2265_v19 = vpop.xlane.xlu1 %2264 }
 0x476   :  { %v4910_v8 = vpop.eup %4909  ;;  %4917 = vrcp.f32 %v2253_v33 }
 0x477   :  { %v6459_v48 = vmul.f32 %v4910_v8, %v6374_v41  ;;  %v2259_v51 = vpop.xlane.xlu0 %2258 }
 0x478   :  { %4919 = vrcp.f32 %v2259_v51 }
 0x479   :  { %6768 = vst [vmem:[#allocation22_spill] sm:$0xff] %v6459_v48  ;;  %v2261_v22 = vpop.xlane.xlu1 %2260 }
 0x47a   :  { %v4912_v25 = vpop.eup %4911 }
 0x47b   :  { %v6461_v15 = vmul.f32 %v4912_v25, %v2385_v46  ;;  %v2255_v11 = vpop.xlane.xlu0 %2254 }
 0x47c   :  { %4921 = vrcp.f32 %v2255_v11 }
 0x47d   :  { %4923 = vrcp.f32 %v2265_v19  ;;  %v2273_v43 = vpop.xlane.xlu1 %2272 }
 0x47e   :  { %v4914_v2 = vpop.eup %4913  ;;  %4925 = vrcp.f32 %v2261_v22 }
 0x47f   :  { %v6464_v61 = vmul.f32 %v4914_v2, %v6371_v55  ;;  %v4916_v1 = vpop.eup %4915  ;;  %v2267_v5 = vpop.xlane.xlu0 %2266 }
 0x480   :  { %v4918_v54 = vpop.eup %4917  ;;  %4927 = vrcp.f32 %v2267_v5 }
 0x481   :  { %6769 = vst [vmem:[#allocation23_spill] sm:$0xff] %v6464_v61  ;;  %v2269_v23 = vpop.xlane.xlu1 %2268 }
 0x482   :  { %v4920_v16 = vpop.eup %4919 }
 0x483   :  { %v2263_v7 = vpop.xlane.xlu0 %2262 }
 0x484   :  { %4929 = vrcp.f32 %v2263_v7 }
 0x485   :  { %4931 = vrcp.f32 %v2273_v43 }
 0x486   :  { %v4922_v62 = vpop.eup %4921  ;;  %4933 = vrcp.f32 %v2269_v23  ;;  %v2281_v10 = vpop.xlane.xlu1 %2280 }
 0x487   :  { %v4924_v3 = vpop.eup %4923  ;;  %v2275_v4 = vpop.xlane.xlu0 %2274 }
 0x488   :  { %v4926_v53 = vpop.eup %4925  ;;  %4935 = vrcp.f32 %v2275_v4 }
 0x48a   :  { %v4928_v63 = vpop.eup %4927 }
 0x48b   :  { %v2271_v49 = vpop.xlane.xlu0 %2270 }
 0x48c   :  { %4937 = vrcp.f32 %v2271_v49 }
 0x48d   :  { %4939 = vrcp.f32 %v2281_v10 }
 0x48e   :  { %v4930_v24 = vpop.eup %4929 }
 0x48f   :  { %v4932_v56 = vpop.eup %4931  ;;  %v2283_v27 = vpop.xlane.xlu0 %2282 }
 0x490   :  { %v4934_v8 = vpop.eup %4933 }
 0x492   :  { %v4936_v38 = vpop.eup %4935 }
 0x496   :  { %v4938_v33 = vpop.eup %4937 }
 0x4a5   :  { %v4270_v41 = vpop.f32.mrb[80].mxu0 }
 0x4a6   :  { %v6466_v13 = vmul.f32 %v4916_v1, %v4270_v41  ;;  %v2398_v18 = vpop.f32.mrb[81].mxu0  ;;  %v2277_v1 = vpop.xlane.xlu1 %2276 }
 0x4a7   :  { %v6468_v52 = vmul.f32 %v4918_v54, %v2398_v18  ;;  %v4271_v55 = vpop.f32.mrb[82].mxu0  ;;  %v2279_v18 = vpop.xlane.xlu0 %2278  ;;  %4941 = vrcp.f32 %v2277_v1 }
 0x4a8   :  { %v6470_v35 = vmul.f32 %v4920_v16, %v4271_v55  ;;  %v2401_v6 = vpop.f32.mrb[83].mxu0  ;;  %4943 = vrcp.f32 %v2283_v27 }
 0x4a9   :  { %v6472_v37 = vmul.f32 %v4922_v62, %v2401_v6  ;;  %4945 = vrcp.f32 %v2279_v18  ;;  %v4940_v6 = vpop.eup %4939 }
 0x4aa   :  { %v2971_v55 = vpop.xlane.xlu1 %2970 }
 0x4ab   :  { %v2973_v62 = vpop.xlane.xlu0 %2972  ;;  %4947 = vrcp.f32 %v2971_v55 }
 0x4b1   :  { %v4942_v7 = vpop.eup %4941 }
 0x4b2   :  { %v4944_v4 = vpop.eup %4943 }
 0x4b5   :  { %v4274_v29 = vpop.f32.mrb[84].mxu0 }
 0x4b6   :  { %v2414_v60 = vpop.f32.mrb[85].mxu0  ;;  %v2515_v31 = vmul.f32 %v4924_v3, %v4274_v29 }
 0x4b7   :  { %v4275_v30 = vpop.f32.mrb[86].mxu0  ;;  %v2513_v0 = vmul.f32 %v4926_v53, %v2414_v60  ;;  %v4946_v60 = vpop.eup %4945 }
 0x4b8   :  { %v2516_v21 = vmul.f32 %v4928_v63, %v4275_v30  ;;  %v2417_v46 = vpop.f32.mrb[87].mxu0  ;;  %v2967_v63 = vpop.xlane.xlu1 %2966 }
 0x4b9   :  { %v2514_v59 = vmul.f32 %v4930_v24, %v2417_v46  ;;  %4949 = vrcp.f32 %v2967_v63 }
 0x4ba   :  { %v4447_v17 = vpack.i.bf16 %v2516_v21, %v2515_v31  ;;  %v2969_v31 = vpop.xlane.xlu0 %2968  ;;  %4951 = vrcp.f32 %v2973_v62 }
 0x4bb   :  { %v4452_v44 = vpack.i.bf16 %v2514_v59, %v2513_v0  ;;  %4953 = vrcp.f32 %v2969_v31 }
 0x4bc   :  { %4448 = vrot.lane.b32.xlu0 %v4447_v17, %s5214_s0  ;;  %v2979_v0 = vpop.xlane.xlu1 %2978 }
 0x4bd   :  { %4955 = vrcp.f32 %v2979_v0 }
 0x4be   :  { %v2981_v59 = vpop.xlane.xlu0 %2980 }
 0x4c0   :  { %4453 = vrot.lane.b32.xlu0 %v4452_v44, %s5214_s0  ;;  %v2975_v17 = vpop.xlane.xlu1 %2974 }
 0x4c1   :  { %4957 = vrcp.f32 %v2975_v17 }
 0x4c2   :  { %v2977_v49 = vpop.xlane.xlu0 %2976  ;;  %4959 = vrcp.f32 %v2981_v59 }
 0x4c3   :  { %4961 = vrcp.f32 %v2977_v49 }
 0x4c4   :  { %v2987_v44 = vpop.xlane.xlu1 %2986 }
 0x4c5   :  { %v4278_v20 = vpop.f32.mrb[88].mxu0  ;;  %4963 = vrcp.f32 %v2987_v44 }
 0x4c6   :  { %v6480_v25 = vmul.f32 %v4932_v56, %v4278_v20  ;;  %v2430_v2 = vpop.f32.mrb[89].mxu0  ;;  %v2989_v10 = vpop.xlane.xlu0 %2988 }
 0x4c7   :  { %v4279_v51 = vpop.f32.mrb[90].mxu0  ;;  %v6484_v5 = vmul.f32 %v4934_v8, %v2430_v2  ;;  %v4948_v56 = vpop.eup %4947 }
 0x4c8   :  { %v6482_v11 = vmul.f32 %v4936_v38, %v4279_v51  ;;  %v2433_v19 = vpop.f32.mrb[91].mxu0  ;;  %v4950_v20 = vpop.eup %4949 }
 0x4c9   :  { %v6486_v41 = vmul.f32 %v4938_v33, %v2433_v19  ;;  %v2983_v8 = vpop.xlane.xlu1 %2982 }
 0x4ca   :  { %v2985_v51 = vpop.xlane.xlu0 %2984  ;;  %4965 = vrcp.f32 %v2983_v8 }
 0x4cb   :  { %v4472_v16 = vpack.i.bf16 %v6486_v41, %v6484_v5  ;;  %4967 = vrcp.f32 %v2989_v10  ;;  %v4714_v10 = vld [vmem:[#allocation7 + $0x10] ss:$8 sps:$4 sm:$0xff]   ;;  %v4719_v5 = vld [vmem:[#allocation7 + $0x24] ss:$8 sps:$4 sm:$0xff]  }
 0x4cc   :  { %4969 = vrcp.f32 %v2985_v51 }
 0x4d6   :  { %v4282_v22 = vpop.f32.mrb[92].mxu0 }
 0x4d7   :  { %v6492_v43 = vmul.f32 %v4940_v6, %v4282_v22  ;;  %v2446_v3 = vpop.f32.mrb[93].mxu0  ;;  %v2995_v6 = vpop.xlane.xlu1 %2994  ;;  %v4711_v22 = vld [vmem:[#allocation7] ss:$8 sps:$4 sm:$0xff]  }
 0x4d8   :  { %v6494_v29 = vmul.f32 %v4942_v7, %v2446_v3  ;;  %v4283_v53 = vpop.f32.mrb[94].mxu0  ;;  %v4713_v7 = vld [vmem:[#allocation7 + $0x4] ss:$8 sps:$4 sm:$0xff]   ;;  %4971 = vrcp.f32 %v2995_v6 }
 0x4d9   :  { %v6496_v30 = vmul.f32 %v4944_v4, %v4283_v53  ;;  %v2449_v24 = vpop.f32.mrb[95].mxu0  ;;  %v2997_v4 = vpop.xlane.xlu0 %2996  ;;  %4380 = vmatprep.subr.bf16.mxu1 %v4713_v7  ;;  %3671 = vmatprep.subr.bf16.mxu0 %v4713_v7 }
 0x4da   :  { %v6498_v21 = vmul.f32 %v4946_v60, %v2449_v24  ;;  %4396 = vmatpush1.bf16.msra.mxu1 %v4711_v22  ;;  %3672 = vmatpush1.bf16.msra.mxu0 %v4711_v22 }
 0x4dd   :  { %v2993_v8 = vpop.xlane.xlu0 %2992 }
 0x4df   :  { %2250 = vadd.xlane.f32.xlu0 %v6231_v58  ;;  %v4952_v58 = vpop.eup %4951 }
 0x4e0   :  { %v4954_v1 = vpop.eup %4953 }
 0x4e1   :  { %v4956_v3 = vpop.eup %4955 }
 0x4e2   :  { %v4958_v60 = vpop.eup %4957 }
 0x4e3   :  { %v4960_v31 = vpop.eup %4959 }
 0x4e4   :  { %v4962_v17 = vpop.eup %4961 }
 0x4e5   :  { %v4964_v41 = vpop.eup %4963 }
 0x4ec   :  { %v4350_v27 = vpop.f32.mrb[96].mxu0 }
 0x4ed   :  { %v6505_v2 = vmul.f32 %v4948_v56, %v4350_v27  ;;  %v3112_v38 = vpop.f32.mrb[97].mxu0  ;;  %v4716_v56 = vld [vmem:[#allocation7 + $0x14] ss:$8 sps:$4 sm:$0xff]   ;;  %v2991_v27 = vpop.xlane.xlu1 %2990 }
 0x4ee   :  { %v6507_v33 = vmul.f32 %v4950_v20, %v3112_v38  ;;  %v4351_v19 = vpop.f32.mrb[98].mxu0  ;;  %4381 = vmatprep.subr.bf16.mxu1 %v4716_v56  ;;  %3673 = vmatprep.subr.bf16.mxu0 %v4716_v56  ;;  %4973 = vrcp.f32 %v2991_v27  ;;  %v4717_v38 = vld [vmem:[#allocation7 + $0x20] ss:$8 sps:$4 sm:$0xff]  }
 0x4ef   :  { %6770 = vst [vmem:[#allocation24_spill] sm:$0xff] %v6505_v2  ;;  %v6509_v18 = vmul.f32 %v4952_v58, %v4351_v19  ;;  %v3115_v55 = vpop.f32.mrb[99].mxu0  ;;  %4397 = vmatpush1.bf16.msra.mxu1 %v4714_v10  ;;  %3674 = vmatpush1.bf16.msra.mxu0 %v4714_v10  ;;  %4975 = vrcp.f32 %v2997_v4  ;;  %v4966_v58 = vpop.eup %4965 }
 0x4f0   :  { %6771 = vst [vmem:[#allocation26_spill] sm:$0xff] %v6507_v33  ;;  %v6511_v62 = vmul.f32 %v4954_v1, %v3115_v55  ;;  %4977 = vrcp.f32 %v2993_v8  ;;  %4382 = vmatprep.subr.bf16.mxu1 %v4719_v5  ;;  %3675 = vmatprep.subr.bf16.mxu0 %v4719_v5  ;;  %v4968_v1 = vpop.eup %4967 }
 0x4f1   :  { %6772 = vst [vmem:[#allocation25_spill] sm:$0xff] %v6509_v18  ;;  %v4970_v22 = vpop.eup %4969 }
 0x4f2   :  { %6773 = vst [vmem:[#allocation27_spill] sm:$0xff] %v6511_v62 }
 0x4f3   :  { %4398 = vmatpush1.bf16.msra.mxu1 %v4717_v38  ;;  %3676 = vmatpush1.bf16.msra.mxu0 %v4717_v38 }
 0x4f4   :  { %v4354_v53 = vpop.f32.mrb[100].mxu0 }
 0x4f5   :  { %v6513_v63 = vmul.f32 %v4956_v3, %v4354_v53  ;;  %v3128_v24 = vpop.f32.mrb[101].mxu0  ;;  %4473 = vrot.lane.b32.xlu0 %v4472_v16, %s5214_s0  ;;  %v4720_v53 = vld [vmem:[#allocation7 + $0x30] ss:$8 sps:$4 sm:$0xff]  }
 0x4f6   :  { %v6515_v0 = vmul.f32 %v4958_v60, %v3128_v24  ;;  %v4355_v59 = vpop.f32.mrb[102].mxu0  ;;  %v4722_v60 = vld [vmem:[#allocation7 + $0x34] ss:$8 sps:$4 sm:$0xff]   ;;  %v6533_v24 = vpop.xlane.xlu0 %3004 }
 0x4f7   :  { %v6521_v49 = vmul.f32 %v4960_v31, %v4355_v59  ;;  %v3131_v44 = vpop.f32.mrb[103].mxu0  ;;  %4383 = vmatprep.subr.bf16.mxu1 %v4722_v60  ;;  %3677 = vmatprep.subr.bf16.mxu0 %v4722_v60  ;;  %v4723_v31 = vld [vmem:[#allocation7 + $0x40] ss:$8 sps:$4 sm:$0xff]   ;;  %v4725_v59 = vld [vmem:[#allocation7 + $0x44] ss:$8 sps:$4 sm:$0xff]  }
 0x4f8   :  { %v6523_v20 = vmul.f32 %v4962_v17, %v3131_v44  ;;  %4399 = vmatpush1.bf16.msra.mxu1 %v4720_v53  ;;  %3678 = vmatpush1.bf16.msra.mxu0 %v4720_v53  ;;  %v4972_v17 = vpop.eup %4971  ;;  %v4731_v53 = vld [vmem:[#allocation7 + $0x64] ss:$8 sps:$4 sm:$0xff]   ;;  %v4734_v60 = vld [vmem:[#allocation7 + $0x74] ss:$8 sps:$4 sm:$0xff]  }
 0x4f9   :  { %v4974_v10 = vpop.eup %4973  ;;  %4384 = vmatprep.subr.bf16.mxu1 %v4725_v59  ;;  %3679 = vmatprep.subr.bf16.mxu0 %v4725_v59 }
 0x4fa   :  { %v4976_v8 = vpop.eup %4975 }
 0x4fc   :  { %v4358_v16 = vpop.f32.mrb[104].mxu0  ;;  %4400 = vmatpush1.bf16.msra.mxu1 %v4723_v31  ;;  %3680 = vmatpush1.bf16.msra.mxu0 %v4723_v31  ;;  %v4735_v31 = vld [vmem:[#allocation7 + $0x80] ss:$8 sps:$4 sm:$0xff]  }
 0x4fd   :  { %v6525_v51 = vmul.f32 %v4964_v41, %v4358_v16  ;;  %v3144_v19 = vpop.f32.mrb[105].mxu0  ;;  %v4978_v41 = vpop.eup %4977 }
 0x4fe   :  { %v6527_v55 = vmul.f32 %v4966_v58, %v3144_v19  ;;  %v4359_v6 = vpop.f32.mrb[106].mxu0  ;;  %v3001_v16 = vpop.xlane.xlu0 %3000 }
 0x4ff   :  { %v6529_v7 = vmul.f32 %v4968_v1, %v4359_v6  ;;  %v3147_v3 = vpop.f32.mrb[107].mxu0  ;;  %v4726_v1 = vld [vmem:[#allocation7 + $0x50] ss:$8 sps:$4 sm:$0xff]   ;;  %v4728_v6 = vld [vmem:[#allocation7 + $0x54] ss:$8 sps:$4 sm:$0xff]  }
 0x500   :  { %v6531_v4 = vmul.f32 %v4970_v22, %v3147_v3  ;;  %4385 = vmatprep.subr.bf16.mxu1 %v4728_v6  ;;  %3681 = vmatprep.subr.bf16.mxu0 %v4728_v6  ;;  %v4729_v3 = vld [vmem:[#allocation7 + $0x60] ss:$8 sps:$4 sm:$0xff]  }
 0x501   :  { %4401 = vmatpush1.bf16.msra.mxu1 %v4726_v1  ;;  %3682 = vmatpush1.bf16.msra.mxu0 %v4726_v1 }
 0x502   :  { %v3013_v59 = vpop.xlane.xlu0 %3012  ;;  %4386 = vmatprep.subr.bf16.mxu1 %v4731_v53  ;;  %3683 = vmatprep.subr.bf16.mxu0 %v4731_v53  ;;  %v4746_v53 = vld [vmem:[#allocation7 + $0xb4] ss:$8 sps:$4 sm:$0xff]  }
 0x504   :  { %v4362_v44 = vpop.f32.mrb[108].mxu0 }
 0x505   :  { %v6535_v56 = vmul.f32 %v4972_v17, %v4362_v44  ;;  %v3160_v27 = vpop.f32.mrb[109].mxu0  ;;  %v3003_v17 = vpop.xlane.xlu1 %3002  ;;  %4402 = vmatpush1.bf16.msra.mxu1 %v4729_v3  ;;  %v4732_v44 = vld [vmem:[#allocation7 + $0x70] ss:$8 sps:$4 sm:$0xff]   ;;  %3684 = vmatpush1.bf16.msra.mxu0 %v4729_v3  ;;  %v4741_v3 = vld [vmem:[#allocation7 + $0xa0] ss:$8 sps:$4 sm:$0xff]  }
 0x506   :  { %v6537_v38 = vmul.f32 %v4974_v10, %v3160_v27  ;;  %v4363_v5 = vpop.f32.mrb[110].mxu0  ;;  %4387 = vmatprep.subr.bf16.mxu1 %v4734_v60  ;;  %v4737_v10 = vld [vmem:[#allocation7 + $0x84] ss:$8 sps:$4 sm:$0xff]   ;;  %3685 = vmatprep.subr.bf16.mxu0 %v4734_v60  ;;  %v3009_v27 = vpop.xlane.xlu0 %3008  ;;  %v4744_v60 = vld [vmem:[#allocation7 + $0xb0] ss:$8 sps:$4 sm:$0xff]   ;;  %4979 = vrcp.f32 %v3003_v17 }
 0x507   :  { %v6539_v58 = vmul.f32 %v4976_v8, %v4363_v5  ;;  %v3163_v19 = vpop.f32.mrb[111].mxu0  ;;  %v4740_v8 = vld [vmem:[#allocation7 + $0x94] ss:$8 sps:$4 sm:$0xff]  }
 0x508   :  { %v6541_v22 = vmul.f32 %v4978_v41, %v3163_v19  ;;  %v4738_v41 = vld [vmem:[#allocation7 + $0x90] ss:$8 sps:$4 sm:$0xff]   ;;  %v4743_v19 = vld [vmem:[#allocation7 + $0xa4] ss:$8 sps:$4 sm:$0xff]  }
 0x509   :  { %4403 = vmatpush1.bf16.msra.mxu1 %v4732_v44  ;;  %3686 = vmatpush1.bf16.msra.mxu0 %v4732_v44  ;;  %v2999_v5 = vpop.xlane.xlu1 %2998 }
 0x50a   :  { %4388 = vmatprep.subr.bf16.mxu1 %v4737_v10  ;;  %3687 = vmatprep.subr.bf16.mxu0 %v4737_v10  ;;  %v6543_v1 = vpop.xlane.xlu0 %3020  ;;  %v4749_v10 = vld [vmem:[#allocation7 + $0xc4] ss:$8 sps:$4 sm:$0xff]   ;;  %4981 = vrcp.f32 %v2999_v5 }
 0x50b   :  { %4983 = vrcp.f32 %v6533_v24 }
 0x50c   :  { %4985 = vrcp.f32 %v3001_v16 }
 0x50d   :  { %4404 = vmatpush1.bf16.msra.mxu1 %v4735_v31  ;;  %3688 = vmatpush1.bf16.msra.mxu0 %v4735_v31  ;;  %v3011_v6 = vpop.xlane.xlu1 %3010  ;;  %v4747_v31 = vld [vmem:[#allocation7 + $0xc0] ss:$8 sps:$4 sm:$0xff]  }
 0x50e   :  { %4389 = vmatprep.subr.bf16.mxu1 %v4740_v8  ;;  %3689 = vmatprep.subr.bf16.mxu0 %v4740_v8  ;;  %v6545_v44 = vpop.xlane.xlu0 %3016  ;;  %v4752_v8 = vld [vmem:[#allocation7 + $0xd4] ss:$8 sps:$4 sm:$0xff]   ;;  %4987 = vrcp.f32 %v3011_v6  ;;  %v4755_v6 = vld [vmem:[#allocation7 + $0xe4] ss:$8 sps:$4 sm:$0xff]  }
 0x510   :  { %v4980_v5 = vpop.eup %4979 }
 0x511   :  { %4405 = vmatpush1.bf16.msra.mxu1 %v4738_v41  ;;  %3690 = vmatpush1.bf16.msra.mxu0 %v4738_v41  ;;  %v3007_v50 = vpop.xlane.xlu1 %3006 }
 0x512   :  { %4390 = vmatprep.subr.bf16.mxu1 %v4743_v19  ;;  %3691 = vmatprep.subr.bf16.mxu0 %v4743_v19  ;;  %v6548_v19 = vpop.xlane.xlu0 %3028  ;;  %4989 = vrcp.f32 %v3007_v50 }
 0x513   :  { %4991 = vrcp.f32 %v3013_v59 }
 0x514   :  { %4993 = vrcp.f32 %v3009_v27 }
 0x515   :  { %4406 = vmatpush1.bf16.msra.mxu1 %v4741_v3  ;;  %3692 = vmatpush1.bf16.msra.mxu0 %v4741_v3  ;;  %v3019_v41 = vpop.xlane.xlu1 %3018 }
 0x516   :  { %4391 = vmatprep.subr.bf16.mxu1 %v4746_v53  ;;  %3693 = vmatprep.subr.bf16.mxu0 %v4746_v53  ;;  %v6550_v24 = vpop.xlane.xlu0 %3024  ;;  %v4982_v53 = vpop.eup %4981  ;;  %4995 = vrcp.f32 %v3019_v41 }
 0x519   :  { %4407 = vmatpush1.bf16.msra.mxu1 %v4744_v60  ;;  %3694 = vmatpush1.bf16.msra.mxu0 %v4744_v60  ;;  %v3015_v17 = vpop.xlane.xlu1 %3014 }
 0x51a   :  { %4392 = vmatprep.subr.bf16.mxu1 %v4749_v10  ;;  %3695 = vmatprep.subr.bf16.mxu0 %v4749_v10  ;;  %v4984_v10 = vpop.eup %4983  ;;  %4997 = vrcp.f32 %v3015_v17 }
 0x51b   :  { %v4986_v50 = vpop.eup %4985  ;;  %4999 = vrcp.f32 %v6543_v1 }
 0x51c   :  { %5001 = vrcp.f32 %v6545_v44 }
 0x51d   :  { %4408 = vmatpush1.bf16.msra.mxu1 %v4747_v31  ;;  %3696 = vmatpush1.bf16.msra.mxu0 %v4747_v31 }
 0x51e   :  { %4393 = vmatprep.subr.bf16.mxu1 %v4752_v8  ;;  %3697 = vmatprep.subr.bf16.mxu0 %v4752_v8  ;;  %v4753_v8 = vld [vmem:[#allocation7 + $0xe0] ss:$8 sps:$4 sm:$0xff]  }
 0x521   :  { %4409 = vmatpush1.bf16.msra.mxu1 %v4750_v12  ;;  %3698 = vmatpush1.bf16.msra.mxu0 %v4750_v12 }
 0x522   :  { %4394 = vmatprep.subr.bf16.mxu1 %v4755_v6  ;;  %3699 = vmatprep.subr.bf16.mxu0 %v4755_v6  ;;  %v4988_v6 = vpop.eup %4987 }
 0x525   :  { %4410 = vmatpush1.bf16.msra.mxu1 %v4753_v8  ;;  %3700 = vmatpush1.bf16.msra.mxu0 %v4753_v8 }
 0x52b   :  { %v4366_v3 = vpop.f32.mrb[112].mxu0 }
 0x52c   :  { %v6552_v16 = vmul.f32 %v4980_v5, %v4366_v3  ;;  %v3176_v60 = vpop.f32.mrb[113].mxu0  ;;  %v3027_v3 = vpop.xlane.xlu1 %3026 }
 0x52d   :  { %v6554_v54 = vmul.f32 %v4982_v53, %v3176_v60  ;;  %v4367_v31 = vpop.f32.mrb[114].mxu0  ;;  %v4756_v60 = vld [vmem:[#allocation7 + $0xf0] ss:$8 sps:$4 sm:$0xff]   ;;  %5003 = vrcp.f32 %v3027_v3 }
 0x52e   :  { %v6556_v46 = vmul.f32 %v4984_v10, %v4367_v31  ;;  %v3179_v23 = vpop.f32.mrb[115].mxu0  ;;  %v4449_v61 = vpop.permute.xlu0 %4448  ;;  %v4758_v10 = vld [vmem:[#allocation7 + $0xf4] ss:$8 sps:$4 sm:$0xff]  }
 0x52f   :  { %v6558_v59 = vmul.f32 %v4986_v50, %v3179_v23  ;;  %v4451_v27 = vunpack.i.h.bf16 %v4449_v61  ;;  %v4450_v5 = vunpack.i.l.bf16 %v4449_v61  ;;  %4395 = vmatprep.subr.bf16.mxu1 %v4758_v10  ;;  %3701 = vmatprep.subr.bf16.mxu0 %v4758_v10  ;;  %v4990_v50 = vpop.eup %4989 }
 0x530   :  { %4411 = vmatpush1.bf16.msra.mxu1 %v4756_v60  ;;  %3702 = vmatpush1.bf16.msra.mxu0 %v4756_v60  ;;  %v3023_v44 = vpop.xlane.xlu1 %3022 }
 0x531   :  { %v6566_v23 = vsel %vm1826_vm0, %v6425_v9, %v4450_v5  ;;  %v6570_v31 = vsel %vm1826_vm0, %v6444_v57, %v4451_v27  ;;  %v4992_v57 = vpop.eup %4991  ;;  %5005 = vrcp.f32 %v3023_v44 }
 0x532   :  { %v4454_v41 = vpop.permute.xlu0 %4453  ;;  %v4994_v12 = vpop.eup %4993  ;;  %5007 = vrcp.f32 %v6548_v19 }
 0x533   :  { %v4370_v61 = vpop.f32.mrb[116].mxu0  ;;  %v4456_v17 = vunpack.i.h.bf16 %v4454_v41  ;;  %v4455_v9 = vunpack.i.l.bf16 %v4454_v41  ;;  %5009 = vrcp.f32 %v6550_v24 }
 0x534   :  { %v3192_v5 = vpop.f32.mrb[117].mxu0  ;;  %v3293_v53 = vmul.f32 %v4988_v6, %v4370_v61 }
 0x535   :  { %v4371_v27 = vpop.f32.mrb[118].mxu0  ;;  %v6578_v1 = vsel %vm1826_vm0, %v6438_v45, %v4456_v17  ;;  %v6582_v8 = vsel %vm1826_vm0, %v6422_v39, %v4455_v9  ;;  %v3291_v18 = vmul.f32 %v4990_v50, %v3192_v5  ;;  %v4996_v45 = vpop.eup %4995 }
 0x536   :  { %v3294_v10 = vmul.f32 %v4992_v57, %v4371_v27  ;;  %v3195_v34 = vpop.f32.mrb[119].mxu0  ;;  %v4998_v39 = vpop.eup %4997 }
 0x537   :  { %v3292_v60 = vmul.f32 %v4994_v12, %v3195_v34  ;;  %v5000_v17 = vpop.eup %4999 }
 0x538   :  { %v4457_v2 = vpack.i.bf16 %v3294_v10, %v3293_v53  ;;  %v5002_v57 = vpop.eup %5001 }
 0x539   :  { %v4462_v26 = vpack.i.bf16 %v3292_v60, %v3291_v18  ;;  %v5004_v53 = vpop.eup %5003 }
 0x53a   :  { %4458 = vrot.lane.b32.xlu1 %v4457_v2, %s5214_s0 }
 0x53b   :  { %v4374_v6 = vpop.f32.mrb[120].mxu0  ;;  %v5006_v19 = vpop.eup %5005 }
 0x53c   :  { %v3208_v61 = vpop.f32.mrb[121].mxu0  ;;  %v3297_v27 = vmul.f32 %v4996_v45, %v4374_v6  ;;  %v5008_v44 = vpop.eup %5007 }
 0x53d   :  { %v4375_v9 = vpop.f32.mrb[122].mxu0  ;;  %v3295_v18 = vmul.f32 %v4998_v39, %v3208_v61  ;;  %v5010_v24 = vpop.eup %5009  ;;  %v6775_v39 = vpack.i.bf16 %v6496_v30, %v6492_v43  ;;  %v6776_v61 = vld [vmem:[#allocation38_spill] sm:$0xff]  ;;  %v6777_v43 = vpack.i.bf16 %v6482_v11, %v6480_v25  ;;  %v6778_v30 = vpack.i.bf16 %v6558_v59, %v6554_v54 }
 0x53e   :  { %v3298_v50 = vmul.f32 %v5000_v17, %v4375_v9  ;;  %v3211_v34 = vpop.f32.mrb[123].mxu0  ;;  %4463 = vrot.lane.b32.xlu1 %v4462_v26, %s5214_s0  ;;  %v6774_v26 = vpack.i.bf16 %v6498_v21, %v6494_v29  ;;  %v6781_v25 = vpack.i.bf16 %v6470_v35, %v6466_v13 }
 0x53f   :  { %v3296_v12 = vmul.f32 %v5002_v57, %v3211_v34 }
 0x540   :  { %v4477_v3 = vpack.i.bf16 %v3298_v50, %v3297_v27 }
 0x541   :  { %v4467_v2 = vpack.i.bf16 %v3296_v12, %v3295_v18  ;;  %v6783_v12 = vpack.c.bf16 %v6570_v31, %v6566_v23 }
 0x543   :  { %v4378_v5 = vpop.f32.mrb[124].mxu0 }
 0x544   :  { %v3224_v10 = vpop.f32.mrb[125].mxu0  ;;  %v3301_v41 = vmul.f32 %v5004_v53, %v4378_v5 }
 0x545   :  { %v4379_v60 = vpop.f32.mrb[126].mxu0  ;;  %v3299_v33 = vmul.f32 %v5006_v19, %v3224_v10 }
 0x546   :  { %v3302_v48 = vmul.f32 %v5008_v44, %v4379_v60  ;;  %v3227_v62 = vpop.f32.mrb[127].mxu0 }
 0x547   :  { %v3300_v45 = vmul.f32 %v5010_v24, %v3227_v62 }
 0x548   :  { %v4512_v6 = vpack.i.bf16 %v3302_v48, %v3301_v41 }
 0x549   :  { %v4497_v17 = vpack.i.bf16 %v3300_v45, %v3299_v33 }
 0x54b   :  { %4498 = vrot.lane.b32.xlu0 %v4497_v17, %s5214_s0 }
 0x54f   :  { %4503 = vrot.lane.b32.xlu0 %v6774_v26, %s5214_s0 }
 0x553   :  { %4513 = vrot.lane.b32.xlu0 %v4512_v6, %s5214_s0 }
 0x557   :  { %4523 = vrot.lane.b32.xlu0 %v6775_v39, %s5214_s0 }
 0x562   :  { %2248 = vadd.xlane.f32.xlu1 %v6776_v61 }
 0x56c   :  { %v2251_v9 = vpop.xlane.xlu0 %2250 }
 0x56d   :  { %5011 = vrcp.f32 %v2251_v9 }
 0x570   :  { %v4474_v62 = vpop.permute.xlu0 %4473 }
 0x571   :  { %v4476_v48 = vunpack.i.h.bf16 %v4474_v62  ;;  %v4475_v33 = vunpack.i.l.bf16 %v4474_v62 }
 0x573   :  { %4468 = vrot.lane.b32.xlu1 %v4467_v2, %s5214_s0  ;;  %v3439_v41 = vsel %vm1826_vm0, %v6428_v36, %v4475_v33  ;;  %v3440_v29 = vsel %vm1826_vm0, %v6449_v14, %v4476_v48  ;;  %v6779_v36 = vpack.i.bf16 %v6472_v37, %v6468_v52  ;;  %v6780_v14 = vpack.i.bf16 %v6556_v46, %v6552_v16 }
 0x574   :  { %v3471_v21 = vpack.c.bf16 %v3440_v29, %v3439_v41  ;;  %v6782_v16 = vpack.c.bf16 %v6578_v1, %v6582_v8 }
 0x577   :  { %4478 = vrot.lane.b32.xlu1 %v4477_v3, %s5214_s0 }
 0x57b   :  { %4483 = vrot.lane.b32.xlu1 %v6777_v43, %s5214_s0 }
 0x57f   :  { %4488 = vrot.lane.b32.xlu1 %v6778_v30, %s5214_s0 }
 0x583   :  { %4493 = vrot.lane.b32.xlu1 %v6779_v36, %s5214_s0 }
 0x587   :  { %4508 = vrot.lane.b32.xlu1 %v6780_v14, %s5214_s0 }
 0x58b   :  { %4518 = vrot.lane.b32.xlu1 %v6781_v25, %s5214_s0  ;;  %s3821_s0 = sshll.u32 %s5217_s8, 4  ;;  %s3822_s0 = int_to_ptr.vmem [resolvable:$true] %s3821_s0 }
 0x58c   :  { %s5169_s3 = scalar_lea.vmem %s3822_s0, 4096  ;;  %p5174_p1 = scmp.lt.s32.totalorder %s3822_s0, %s3822_s0 }
 0x58d   :  { %p5170_p0 = scmp.ne.s32.totalorder %s3822_s0, %s5169_s3  ;;  %p5175_p2 = scmp.lt.s32.totalorder %s5169_s3, %s5169_s3 }
 0x58f   :  { %p5176_p3 = por %p5175_p2, %p5174_p1 }
 0x591   :  { %p5177_p4 = pnand %p5176_p3, %p5170_p0 }
 0x5ac   :  { %v4459_v11 = vpop.permute.xlu1 %4458 }
 0x5ad   :  { %v4461_v57 = vunpack.i.h.bf16 %v4459_v11  ;;  %v4460_v27 = vunpack.i.l.bf16 %v4459_v11 }
 0x5af   :  { %v3453_v54 = vsel %vm1826_vm0, %v6513_v63, %v4460_v27  ;;  %v3454_v52 = vsel %vm1826_vm0, %v6521_v49, %v4461_v57 }
 0x5b0   :  { %v4464_v37 = vpop.permute.xlu1 %4463  ;;  %v3470_v59 = vpack.c.bf16 %v3454_v52, %v3453_v54  ;;  %v6785_v52 = vld [vmem:[#allocation27_spill] sm:$0xff] }
 0x5b1   :  { %v4466_v50 = vunpack.i.h.bf16 %v4464_v37  ;;  %v4465_v34 = vunpack.i.l.bf16 %v4464_v37 }
 0x5b3   :  { %v3451_v46 = vsel %vm1826_vm0, %v6515_v0, %v4465_v34  ;;  %v3452_v13 = vsel %vm1826_vm0, %v6523_v20, %v4466_v50 }
 0x5b4   :  { %v3468_v35 = vpack.c.bf16 %v3452_v13, %v3451_v46  ;;  %v6786_v46 = vld [vmem:[#allocation22_spill] sm:$0xff]  ;;  %v6787_v13 = vld [vmem:[#allocation20_spill] sm:$0xff] }
 0x5b6   :  { %3723 = vmatprep.mubr.bf16.mxu1 %v3468_v35 }
 0x5b7   :  { %3724 = vmatmul.mubr.bf16.vlgmr.msra.gmra.mrb[128].mxu1 %v6782_v16 }
 0x5b8   :  { %3733 = vmatprep.mubr.bf16.mxu1 %v3470_v59 }
 0x5bd   :  { %v4499_v63 = vpop.permute.xlu0 %4498 }
 0x5be   :  { %v4501_v18 = vunpack.i.h.bf16 %v4499_v63  ;;  %v4500_v49 = vunpack.i.l.bf16 %v4499_v63 }
 0x5bf   :  { %3734 = vmatmul.mubr.bf16.gmra.mrb[132].mxu1 %v6783_v12  ;;  %v6788_v12 = vld [vmem:[#allocation24_spill] sm:$0xff] }
 0x5c0   :  { %v3459_v0 = vsel %vm1826_vm0, %v6537_v38, %v4500_v49  ;;  %v3460_v20 = vsel %vm1826_vm0, %v6541_v22, %v4501_v18 }
 0x5c1   :  { %v4504_v3 = vpop.permute.xlu0 %4503  ;;  %v3476_v2 = vpack.c.bf16 %v3460_v20, %v3459_v0  ;;  %v6789_v20 = vld [vmem:[#allocation25_spill] sm:$0xff] }
 0x5c2   :  { %v4506_v53 = vunpack.i.h.bf16 %v4504_v3  ;;  %v4505_v5 = vunpack.i.l.bf16 %v4504_v3 }
 0x5c4   :  { %v3443_v8 = vsel %vm1826_vm0, %v6446_v42, %v4505_v5  ;;  %v3444_v1 = vsel %vm1826_vm0, %v6461_v15, %v4506_v53 }
 0x5c5   :  { %v4514_v19 = vpop.permute.xlu0 %4513  ;;  %v3475_v10 = vpack.c.bf16 %v3444_v1, %v3443_v8  ;;  %v6790_v1 = vld [vmem:[#allocation21_spill] sm:$0xff] }
 0x5c6   :  { %v4516_v23 = vunpack.i.h.bf16 %v4514_v19  ;;  %v4515_v31 = vunpack.i.l.bf16 %v4514_v19 }
 0x5c8   :  { %v3461_v38 = vsel %vm1826_vm0, %v6535_v56, %v4515_v31  ;;  %v3462_v22 = vsel %vm1826_vm0, %v6539_v58, %v4516_v23  ;;  %v5012_v56 = vpop.eup %5011  ;;  %v6791_v23 = vld [vmem:[#allocation23_spill] sm:$0xff] }
 0x5c9   :  { %v3478_v44 = vpack.c.bf16 %v3462_v22, %v3461_v38  ;;  %v4524_v6 = vpop.permute.xlu0 %4523  ;;  %v2508_v43 = vmul.f32 %v5012_v56, %v6434_v40  ;;  %v6784_v40 = vld [vmem:[#allocation26_spill] sm:$0xff] }
 0x5ca   :  { %v4526_v58 = vunpack.i.h.bf16 %v4524_v6  ;;  %v4525_v41 = vunpack.i.l.bf16 %v4524_v6 }
 0x5ef   :  { %v2249_v60 = vpop.xlane.xlu1 %2248 }
 0x5f0   :  { %5013 = vrcp.f32 %v2249_v60 }
 0x5f3   :  { %v4469_v24 = vpop.permute.xlu1 %4468 }
 0x5f4   :  { %v4471_v45 = vunpack.i.h.bf16 %v4469_v24  ;;  %v4470_v42 = vunpack.i.l.bf16 %v4469_v24 }
 0x5f6   :  { %v3455_v15 = vsel %vm1826_vm0, %v6527_v55, %v4470_v42  ;;  %v3456_v17 = vsel %vm1826_vm0, %v6531_v4, %v4471_v45 }
 0x5f7   :  { %v4479_v26 = vpop.permute.xlu1 %4478  ;;  %v3472_v39 = vpack.c.bf16 %v3456_v17, %v3455_v15 }
 0x5f8   :  { %v4481_v61 = vunpack.i.h.bf16 %v4479_v26  ;;  %v4480_v62 = vunpack.i.l.bf16 %v4479_v26 }
 0x5f9   :  { %3743 = vmatprep.mubr.bf16.mxu1 %v3472_v39 }
 0x5fa   :  { %v5014_v9 = vpop.eup %5013  ;;  %3744 = vmatmul.mubr.bf16.gmra.mrb[136].mxu1 %v3471_v21  ;;  %v3457_v48 = vsel %vm1826_vm0, %v6525_v51, %v4480_v62  ;;  %v3458_v33 = vsel %vm1826_vm0, %v6529_v7, %v4481_v61  ;;  %v3446_v21 = vsel %vm1826_vm0, %v2508_v43, %v4526_v58 }
 0x5fb   :  { %v4484_v55 = vpop.permute.xlu1 %4483  ;;  %v3474_v29 = vpack.c.bf16 %v3458_v33, %v3457_v48  ;;  %v2507_v4 = vmul.f32 %v5014_v9, %v6430_v32 }
 0x5fc   :  { %v4486_v30 = vunpack.i.h.bf16 %v4484_v55  ;;  %v4485_v36 = vunpack.i.l.bf16 %v4484_v55 }
 0x5fd   :  { %3753 = vmatprep.mubr.bf16.mxu1 %v3474_v29  ;;  %v3445_v14 = vsel %vm1826_vm0, %v2507_v4, %v4525_v41 }
 0x5fe   :  { %v3441_v51 = vsel %vm1826_vm0, %v6432_v28, %v4485_v36  ;;  %v3442_v7 = vsel %vm1826_vm0, %v6456_v47, %v4486_v30  ;;  %v3477_v25 = vpack.c.bf16 %v3446_v21, %v3445_v14 }
 0x5ff   :  { %v4489_v11 = vpop.permute.xlu1 %4488  ;;  %v3473_v57 = vpack.c.bf16 %v3442_v7, %v3441_v51 }
 0x600   :  { %v4491_v27 = vunpack.i.h.bf16 %v4489_v11  ;;  %v4490_v32 = vunpack.i.l.bf16 %v4489_v11 }
 0x602   :  { %3754 = vmatmul.mubr.bf16.gmra.mrb[140].mxu1 %v3473_v57  ;;  %v3447_v54 = vsel %vm1826_vm0, %v6784_v40, %v4490_v32  ;;  %v3448_v37 = vsel %vm1826_vm0, %v6785_v52, %v4491_v27 }
 0x603   :  { %v4494_v59 = vpop.permute.xlu1 %4493  ;;  %3763 = vmatprep.mubr.bf16.mxu1 %v3476_v2  ;;  %v3464_v50 = vpack.c.bf16 %v3448_v37, %v3447_v54 }
 0x604   :  { %v4496_v34 = vunpack.i.h.bf16 %v4494_v59  ;;  %v4495_v28 = vunpack.i.l.bf16 %v4494_v59 }
 0x605   :  { %3703 = vmatprep.mubr.bf16.mxu0 %v3464_v50 }
 0x606   :  { %v3432_v47 = vsel %vm1826_vm0, %v6786_v46, %v4496_v34  ;;  %v3431_v35 = vsel %vm1826_vm0, %v6787_v13, %v4495_v28 }
 0x607   :  { %v3463_v16 = vpack.c.bf16 %v3432_v47, %v3431_v35  ;;  %v4509_v63 = vpop.permute.xlu1 %4508 }
 0x608   :  { %v4511_v18 = vunpack.i.h.bf16 %v4509_v63  ;;  %v4510_v49 = vunpack.i.l.bf16 %v4509_v63 }
 0x609   :  { %3704 = vmatmul.mubr.bf16.vlgmr.msra.gmra.mrb[128].mxu0 %v3463_v16 }
 0x60a   :  { %3764 = vmatmul.mubr.bf16.gmra.mrb[144].mxu1 %v3475_v10  ;;  %v3449_v0 = vsel %vm1826_vm0, %v6788_v12, %v4510_v49  ;;  %v3450_v3 = vsel %vm1826_vm0, %v6789_v20, %v4511_v18 }
 0x60b   :  { %v4519_v2 = vpop.permute.xlu1 %4518  ;;  %3773 = vmatprep.mubr.bf16.mxu1 %v3478_v44  ;;  %v3466_v53 = vpack.c.bf16 %v3450_v3, %v3449_v0 }
 0x60c   :  { %v4521_v5 = vunpack.i.h.bf16 %v4519_v2  ;;  %v4520_v8 = vunpack.i.l.bf16 %v4519_v2 }
 0x60d   :  { %3713 = vmatprep.mubr.bf16.mxu0 %v3466_v53 }
 0x60e   :  { %v3433_v19 = vsel %vm1826_vm0, %v6790_v1, %v4520_v8  ;;  %v3434_v31 = vsel %vm1826_vm0, %v6791_v23, %v4521_v5 }
 0x60f   :  { %v3465_v38 = vpack.c.bf16 %v3434_v31, %v3433_v19 }
 0x611   :  { %3714 = vmatmul.mubr.bf16.gmra.mrb[132].mxu0 %v3465_v38 }
 0x612   :  { %3774 = vmatmul.mubr.bf16.gmra.mrb[148].mxu1 %v3477_v25 }
 0x68a   :  { %v3725_v10 = vpop.f32.mrb[128].mxu1 }
 0x68b   :  { %3792 = vst [vmem:[#allocation14 + $0x40] sm:$0xff] %v3725_v10  ;;  %v3727_v22 = vpop.f32.mrb[129].mxu1 }
 0x68c   :  { %3793 = vst [vmem:[#allocation14 + $0x48] sm:$0xff] %v3727_v22  ;;  %v3729_v60 = vpop.f32.mrb[130].mxu1 }
 0x68d   :  { %3794 = vst [vmem:[#allocation14 + $0x50] sm:$0xff] %v3729_v60  ;;  %v3731_v44 = vpop.f32.mrb[131].mxu1 }
 0x68e   :  { %3795 = vst [vmem:[#allocation14 + $0x58] sm:$0xff] %v3731_v44 }
 0x692   :  { %v3735_v24 = vpop.f32.mrb[132].mxu1 }
 0x693   :  { %3796 = vst [vmem:[#allocation14 + $0x60] sm:$0xff] %v3735_v24  ;;  %v3737_v45 = vpop.f32.mrb[133].mxu1 }
 0x694   :  { %3797 = vst [vmem:[#allocation14 + $0x68] sm:$0xff] %v3737_v45  ;;  %v3739_v42 = vpop.f32.mrb[134].mxu1 }
 0x695   :  { %3798 = vst [vmem:[#allocation14 + $0x70] sm:$0xff] %v3739_v42  ;;  %v3741_v6 = vpop.f32.mrb[135].mxu1 }
 0x696   :  { %3799 = vst [vmem:[#allocation14 + $0x78] sm:$0xff] %v3741_v6 }
 0x6cd   :  { %v3745_v15 = vpop.f32.mrb[136].mxu1 }
 0x6ce   :  { %3800 = vst [vmem:[#allocation14 + $0x80] sm:$0xff] %v3745_v15  ;;  %v3747_v17 = vpop.f32.mrb[137].mxu1 }
 0x6cf   :  { %3801 = vst [vmem:[#allocation14 + $0x88] sm:$0xff] %v3747_v17  ;;  %v3749_v26 = vpop.f32.mrb[138].mxu1 }
 0x6d0   :  { %3802 = vst [vmem:[#allocation14 + $0x90] sm:$0xff] %v3749_v26  ;;  %v3751_v39 = vpop.f32.mrb[139].mxu1 }
 0x6d1   :  { %3803 = vst [vmem:[#allocation14 + $0x98] sm:$0xff] %v3751_v39 }
 0x6d5   :  { %v3755_v56 = vpop.f32.mrb[140].mxu1 }
 0x6d6   :  { %3804 = vst [vmem:[#allocation14 + $0xa0] sm:$0xff] %v3755_v56  ;;  %v3757_v61 = vpop.f32.mrb[141].mxu1 }
 0x6d7   :  { %3805 = vst [vmem:[#allocation14 + $0xa8] sm:$0xff] %v3757_v61  ;;  %v3759_v62 = vpop.f32.mrb[142].mxu1 }
 0x6d8   :  { %3806 = vst [vmem:[#allocation14 + $0xb0] sm:$0xff] %v3759_v62  ;;  %v3761_v58 = vpop.f32.mrb[143].mxu1 }
 0x6d9   :  { %3807 = vst [vmem:[#allocation14 + $0xb8] sm:$0xff] %v3761_v58 }
 0x6dc   :  { %v3705_v9 = vpop.f32.mrb[128].mxu0 }
 0x6dd   :  { %3784 = vst [vmem:[#allocation14] sm:$0xff] %v3705_v9  ;;  %v3707_v48 = vpop.f32.mrb[129].mxu0  ;;  %v3765_v33 = vpop.f32.mrb[144].mxu1 }
 0x6de   :  { %3785 = vst [vmem:[#allocation14 + $0x8] sm:$0xff] %v3707_v48  ;;  %3808 = vst [vmem:[#allocation14 + $0xc0] sm:$0xff] %v3765_v33  ;;  %v3709_v41 = vpop.f32.mrb[130].mxu0  ;;  %v3767_v55 = vpop.f32.mrb[145].mxu1 }
 0x6df   :  { %3786 = vst [vmem:[#allocation14 + $0x10] sm:$0xff] %v3709_v41  ;;  %3809 = vst [vmem:[#allocation14 + $0xc8] sm:$0xff] %v3767_v55  ;;  %v3711_v29 = vpop.f32.mrb[131].mxu0  ;;  %v3769_v4 = vpop.f32.mrb[146].mxu1 }
 0x6e0   :  { %3787 = vst [vmem:[#allocation14 + $0x18] sm:$0xff] %v3711_v29  ;;  %3810 = vst [vmem:[#allocation14 + $0xd0] sm:$0xff] %v3769_v4  ;;  %v3771_v43 = vpop.f32.mrb[147].mxu1 }
 0x6e1   :  { %3811 = vst [vmem:[#allocation14 + $0xd8] sm:$0xff] %v3771_v43 }
 0x6e4   :  { %v3715_v30 = vpop.f32.mrb[132].mxu0 }
 0x6e5   :  { %3788 = vst [vmem:[#allocation14 + $0x20] sm:$0xff] %v3715_v30  ;;  %v3717_v36 = vpop.f32.mrb[133].mxu0  ;;  %v3775_v14 = vpop.f32.mrb[148].mxu1 }
 0x6e6   :  { %3789 = vst [vmem:[#allocation14 + $0x28] sm:$0xff] %v3717_v36  ;;  %3812 = vst [vmem:[#allocation14 + $0xe0] sm:$0xff] %v3775_v14  ;;  %v3719_v21 = vpop.f32.mrb[134].mxu0  ;;  %v3777_v51 = vpop.f32.mrb[149].mxu1 }
 0x6e7   :  { %3790 = vst [vmem:[#allocation14 + $0x30] sm:$0xff] %v3719_v21  ;;  %3813 = vst [vmem:[#allocation14 + $0xe8] sm:$0xff] %v3777_v51  ;;  %v3721_v7 = vpop.f32.mrb[135].mxu0  ;;  %v3779_v25 = vpop.f32.mrb[150].mxu1 }
 0x6e8   :  { %3791 = vst [vmem:[#allocation14 + $0x38] sm:$0xff] %v3721_v7  ;;  %3814 = vst [vmem:[#allocation14 + $0xf0] sm:$0xff] %v3779_v25  ;;  %v3781_v11 = vpop.f32.mrb[151].mxu1 }
 0x6e9   :  { %3815 = vst [vmem:[#allocation14 + $0xf8] sm:$0xff] %v3781_v11 }
 0x6ea   :  { %5180 = shalt.err (!%p5177_p4)
}
 0x6eb   :  { %s5181_s25 = scalar_lea.hbm %s6709_s9, 4096 }
 0x6ec   :  { %p5182_p5 = scmp.ne.s32.totalorder %s6709_s9, %s5181_s25  ;;  %p5185_p6 = scmp.lt.u32.totalorder %s5181_s25, %s6709_s9 }
 0x6ee   :  { %p5187_p7 = pnand %p5185_p6, %p5182_p5 }
 0x6f0   :  { %5190 = shalt.err (!%p5187_p7)
}
 0x6f1   :  { %3827 = dma.vmem_to_hbm [thread:$0]  %s3822_s0, 4096, %s6709_s9, [#allocation4], %s5205_s2, %s5205_s2, %s5206_s10  }
 0x6f2   :  { %5199 = dma.done.wait [#allocation4], 4096  }
 0x6f3   :  { %5200 = vsyncadd [#allocation4], 4294963200 }
 0x6f4   :  { %3831 = vsyncpa [#allocation3], 1 }
 0x6f5   :  { %3832 = vsyncpa [#allocation6], 1 }
 0x6f6   :  { %3833 = vsyncpa [#allocation9], 1 }
 0x6f7   :  { %3834 = vsyncpa [#allocation12], 1 }
 0x6f8   :  { %3835 = vsyncpa [#allocation4], 1 }

</bundles_post_ra>
